<compile_context>
chip_gen: v6e
topology: v6e:2x2x1
jax: 0.10.0
libtpu: 0.0.40
codegen_flags: <defaults>
</compile_context>

<pallas_src>
import functools

import jax
import jax.numpy as jnp
from jax.experimental import pallas as pl
from jax.experimental.pallas import tpu as pltpu


ACT_DTYPE = jnp.bfloat16      # activation storage dtype between fused kernels
COMPUTE_DTYPE = jnp.bfloat16  # MXU operand dtype (accumulation is f32 everywhere)
VMEM_LIMIT = 32 * 1024 * 1024


def _round_up(x, m):
    return (x + m - 1) // m * m


def _pick_batch_tile(n, max_tile=4):
    """Largest divisor of n <= max_tile that still leaves >=2 grid blocks."""
    limit = max(1, min(max_tile, n // 2))
    for t in range(limit, 0, -1):
        if n % t == 0:
            return t
    return 1


def _pick_fc_tile(dim, max_tile):
    """dim is a multiple of 128; largest multiple of 128 <= max_tile dividing dim."""
    t = min(dim, max_tile)
    t = (t // 128) * 128
    while t > 128 and dim % t != 0:
        t -= 128
    return max(t, 128)


# ----------------------------------------------------------------------------
# Fused ResBlock kernels
# ----------------------------------------------------------------------------
def _conv3x1_bn(x, w2d, shift):
    """Conv1d(k=3, pad=1, stride=1) + folded BN as ONE im2col MXU matmul.

    x: (C_in, L) compute dtype; w2d: (C_out, 3*C_in) tap-major with BN scale
    folded in; shift: (C_out, 1) f32.  Returns f32 (C_out, L).
    """
    c_in, L = x.shape
    z = jnp.zeros((c_in, 1), x.dtype)
    left = jnp.concatenate([z, x[:, : L - 1]], axis=1)   # tap k=0 -> x[l-1]
    right = jnp.concatenate([x[:, 1:], z], axis=1)       # tap k=2 -> x[l+1]
    xs = jnp.concatenate([left, x, right], axis=0)       # (3*C_in, L), built in VMEM
    return jnp.dot(w2d, xs, preferred_element_type=jnp.float32) + shift


def _resblock_body(x, w1, s1, w2, s2, w3, s3, down):
    """conv1/bn1/relu -> conv2/bn2/relu -> conv3/bn3 + (downsample or identity) + relu."""
    h = jnp.maximum(_conv3x1_bn(x, w1, s1), 0.0)
    h = jnp.maximum(_conv3x1_bn(h.astype(COMPUTE_DTYPE), w2, s2), 0.0)
    if down is None:
        res = x.astype(jnp.float32)
    else:
        wd, sd = down
        res = jnp.dot(wd, x, preferred_element_type=jnp.float32) + sd   # 1x1 conv + bn
    out = _conv3x1_bn(h.astype(COMPUTE_DTYPE), w3, s3) + res
    return jnp.maximum(out, 0.0)


def _resblock_pair_kernel(*refs, b_tile, has_down):
    """One (branch, batch-tile) grid point of a paired stage (layer1k & layer2k)."""
    x_ref = refs[0]                                        # (1, b_tile, C_in, L)
    w1_ref, s1_ref, w2_ref, s2_ref, w3_ref, s3_ref = refs[1:7]
    idx = 7
    if has_down:
        wd_ref, sd_ref = refs[7:9]
        idx = 9
    o_ref = refs[idx]                                      # (1, b_tile, C_out, L)

    # Hoist weight loads out of the (unrolled) batch-tile loop.
    w1, w2, w3 = w1_ref[0], w2_ref[0], w3_ref[0]
    s1, s2, s3 = s1_ref[0], s2_ref[0], s3_ref[0]
    down = (wd_ref[0], sd_ref[0]) if has_down else None

    for b in range(b_tile):
        x = x_ref[0, b].astype(COMPUTE_DTYPE)
        out = _resblock_body(x, w1, s1, w2, s2, w3, s3, down)
        o_ref[0, b] = out.astype(o_ref.dtype)


def _resblock_merge_kernel(*refs, b_tile, has_down):
    """layer35: channel-concat of the two branches (in VMEM) + fused ResBlock."""
    x_ref = refs[0]                                        # (2, b_tile, C_half, L)
    w1_ref, s1_ref, w2_ref, s2_ref, w3_ref, s3_ref = refs[1:7]
    idx = 7
    if has_down:
        wd_ref, sd_ref = refs[7:9]
        idx = 9
    o_ref = refs[idx]                                      # (b_tile, C_out, L)

    w1, w2, w3 = w1_ref[...], w2_ref[...], w3_ref[...]
    s1, s2, s3 = s1_ref[...], s2_ref[...], s3_ref[...]
    down = (wd_ref[...], sd_ref[...]) if has_down else None

    for b in range(b_tile):
        # torch.cat((f, s), dim=1) done on the VMEM blocks, no HBM concat.
        x = jnp.concatenate([x_ref[0, b], x_ref[1, b]], axis=0).astype(COMPUTE_DTYPE)
        out = _resblock_body(x, w1, s1, w2, s2, w3, s3, down)
        o_ref[b] = out.astype(o_ref.dtype)


_WEIGHT_NAMES = ("w1", "sh1", "w2", "sh2", "w3", "sh3")
_DOWN_NAMES = ("wd", "shd")


def resblock_pair(p, x):
    """Both-branch ResBlock stage. x: (2, N, C_in, L) stacked [f, s] -> (2, N, C_out, L).

    Weights in `p` are stacked with a leading branch dim of 2; the branch grid
    index selects the per-branch weight block via the index_map.
    """
    _, N, C_in, L = x.shape
    C_out = p["sh1"].shape[1]
    has_down = "wd" in p
    b_tile = _pick_batch_tile(N)
    grid = (2, N // b_tile)

    def w_spec(a):
        nd = a.ndim
        return pl.BlockSpec((1,) + a.shape[1:], lambda br, n, _nd=nd: (br,) + (0,) * (_nd - 1))

    in_specs = [pl.BlockSpec((1, b_tile, C_in, L), lambda br, n: (br, n, 0, 0))]
    args = [x]
    names = _WEIGHT_NAMES + (_DOWN_NAMES if has_down else ())
    for name in names:
        in_specs.append(w_spec(p[name]))
        args.append(p[name])

    kernel = functools.partial(_resblock_pair_kernel, b_tile=b_tile, has_down=has_down)
    # TODO(synk): at production (L=650) pad the lane dim to a multiple of 128
    # (with per-conv zero re-masking) for fully unmasked vector stores.
    return pl.pallas_call(
        kernel,
        out_shape=jax.ShapeDtypeStruct((2, N, C_out, L), ACT_DTYPE),
        grid_spec=pltpu.PrefetchScalarGridSpec(
            num_scalar_prefetch=0,
            grid=grid,
            in_specs=in_specs,
            out_specs=pl.BlockSpec((1, b_tile, C_out, L), lambda br, n: (br, n, 0, 0)),
        ),
        compiler_params=pltpu.CompilerParams(
            dimension_semantics=("parallel", "parallel"),
            vmem_limit_bytes=VMEM_LIMIT),
    )(*args)


def resblock_merge(p, x):
    """layer35: x (2, N, C_half, L) -> ResBlock(cat(f, s, channels)) -> (N, C_out, L)."""
    _, N, C_half, L = x.shape
    C_out = p["sh1"].shape[0]
    has_down = "wd" in p
    b_tile = _pick_batch_tile(N)
    grid = (N // b_tile,)

    def full_spec(a):
        nd = a.ndim
        return pl.BlockSpec(a.shape, lambda n, _nd=nd: (0,) * _nd)

    in_specs = [pl.BlockSpec((2, b_tile, C_half, L), lambda n: (0, n, 0, 0))]
    args = [x]
    names = _WEIGHT_NAMES + (_DOWN_NAMES if has_down else ())
    for name in names:
        in_specs.append(full_spec(p[name]))
        args.append(p[name])

    kernel = functools.partial(_resblock_merge_kernel, b_tile=b_tile, has_down=has_down)
    return pl.pallas_call(
        kernel,
        out_shape=jax.ShapeDtypeStruct((N, C_out, L), ACT_DTYPE),
        grid_spec=pltpu.PrefetchScalarGridSpec(
            num_scalar_prefetch=0,
            grid=grid,
            in_specs=in_specs,
            out_specs=pl.BlockSpec((b_tile, C_out, L), lambda n: (n, 0, 0)),
        ),
        compiler_params=pltpu.CompilerParams(
            dimension_semantics=("parallel",),
            vmem_limit_bytes=VMEM_LIMIT),
    )(*args)


# ----------------------------------------------------------------------------
# Tiled fully-connected kernel (matmul + bias + optional ReLU)
# ----------------------------------------------------------------------------
def _linear_kernel(x_ref, w_ref, b_ref, o_ref, acc_ref, *, apply_relu):
    @pl.when(pl.program_id(1) == 0)
    def _():
        acc_ref[...] = jnp.zeros_like(acc_ref)

    acc_ref[...] += jnp.dot(x_ref[...], w_ref[...],
                            preferred_element_type=jnp.float32)

    @pl.when(pl.program_id(1) == pl.num_programs(1) - 1)
    def _():
        y = acc_ref[...] + b_ref[...]
        if apply_relu:
            y = jnp.maximum(y, 0.0)
        o_ref[...] = y.astype(o_ref.dtype)


def linear(x, w, b, apply_relu=False, tk_max=512, tn_max=512):
    """x: (N, F); w: (F, H) [torch W.T layout]; b: (H,). Returns f32 (N, H).

    K and output dims are zero-padded to multiples of 128 so the weight streams
    as (tk, tn) tiles into an f32 VMEM accumulator -- the production fc1 weight
    never needs to fit VMEM as a single block.
    """
    N, F = x.shape
    H = w.shape[1]
    F_pad = _round_up(F, 128)
    H_pad = _round_up(H, 128)

    x = x.astype(COMPUTE_DTYPE)
    w = w.astype(COMPUTE_DTYPE)
    b = b.astype(jnp.float32)
    if F_pad != F:
        x = jnp.pad(x, ((0, 0), (0, F_pad - F)))
        w = jnp.pad(w, ((0, F_pad - F), (0, 0)))
    if H_pad != H:
        w = jnp.pad(w, ((0, 0), (0, H_pad - H)))
        b = jnp.pad(b, (0, H_pad - H))

    tk = _pick_fc_tile(F_pad, tk_max)
    tn = _pick_fc_tile(H_pad, tn_max)
    grid = (H_pad // tn, F_pad // tk)  # reduction (K) axis last

    out = pl.pallas_call(
        functools.partial(_linear_kernel, apply_relu=apply_relu),
        out_shape=jax.ShapeDtypeStruct((N, H_pad), jnp.float32),
        grid_spec=pltpu.PrefetchScalarGridSpec(
            num_scalar_prefetch=0,
            grid=grid,
            in_specs=[
                pl.BlockSpec((N, tk), lambda j, k: (0, k)),
                pl.BlockSpec((tk, tn), lambda j, k: (k, j)),
                pl.BlockSpec((1, tn), lambda j, k: (0, j)),
            ],
            out_specs=pl.BlockSpec((N, tn), lambda j, k: (0, j)),
            scratch_shapes=[pltpu.VMEM((N, tn), jnp.float32)],
        ),
        compiler_params=pltpu.CompilerParams(
            dimension_semantics=("parallel", "arbitrary"),
            vmem_limit_bytes=VMEM_LIMIT),
    )(x, w, b.reshape(1, H_pad))
    return out[:, :H]


# ----------------------------------------------------------------------------
# Parameter init (deterministic, synthetic) with host-side BN folding
# ----------------------------------------------------------------------------
def init_conv(key, c_out, c_in, k):
    fan_in = c_in * k
    bound = (1.0 / fan_in) ** 0.5
    return jax.random.uniform(key, (c_out, c_in, k), jnp.float32, -bound, bound)


def init_bn(c, eps=1e-5):
    # eval-mode BatchNorm1d with default params / running stats -> scale, shift
    gamma = jnp.ones((c,), jnp.float32)
    beta = jnp.zeros((c,), jnp.float32)
    mean = jnp.zeros((c,), jnp.float32)
    var = jnp.ones((c,), jnp.float32)
    scale = gamma / jnp.sqrt(var + eps)
    shift = beta - mean * scale
    return scale, shift


def fold_conv_bn(w, scale, shift):
    """Fold BN scale into conv weight, reshape to im2col (C_out, K*C_in), cast bf16."""
    c_out, c_in, k = w.shape
    w2d = (w * scale[:, None, None]).transpose(0, 2, 1).reshape(c_out, k * c_in)
    return w2d.astype(COMPUTE_DTYPE), shift.reshape(c_out, 1).astype(jnp.float32)


def init_resblock(key, c_in, c_out, k=3):
    k1, k2, k3, k4 = jax.random.split(key, 4)
    p = {}
    p["w1"], p["sh1"] = fold_conv_bn(init_conv(k1, c_out, c_in, k), *init_bn(c_out))
    p["w2"], p["sh2"] = fold_conv_bn(init_conv(k2, c_out, c_out, k), *init_bn(c_out))
    p["w3"], p["sh3"] = fold_conv_bn(init_conv(k3, c_out, c_out, k), *init_bn(c_out))
    if c_in != c_out:   # stride is always 1 in this model
        p["wd"], p["shd"] = fold_conv_bn(init_conv(k4, c_out, c_in, 1), *init_bn(c_out))
    return p


def stack_pair(p_f, p_s):
    """Stack layer1k / layer2k folded params along a leading branch dim of 2."""
    return {name: jnp.stack([p_f[name], p_s[name]]) for name in p_f}


def init_linear(key, f_in, f_out):
    k1, k2 = jax.random.split(key)
    bound = (1.0 / f_in) ** 0.5
    w = jax.random.uniform(k1, (f_in, f_out), jnp.float32, -bound, bound)
    b = jax.random.uniform(k2, (f_out,), jnp.float32, -bound, bound)
    return w.astype(COMPUTE_DTYPE), b


# ----------------------------------------------------------------------------
# Forward pass (output-equivalent to ResnetPCA_wide.forward, eval mode)
# ----------------------------------------------------------------------------
def model_forward(params, input1, input2):
    # Keep both branches stacked along a leading dim for the whole tower.
    x = jnp.stack([input1, input2]).astype(ACT_DTYPE)     # (2, N, 2, L)
    x = resblock_pair(params["stage1"], x)                # layer11 / layer21
    x = resblock_pair(params["stage2"], x)                # layer12 / layer22
    x = resblock_pair(params["stage3"], x)                # layer13 / layer23
    x = resblock_pair(params["stage4"], x)                # layer14 / layer24
    x = resblock_pair(params["stage5"], x)                # layer15 / layer25
    # fs1..fs4 (layer31..layer34) are computed but unused in the PyTorch forward;
    # they never influence the output, so they are intentionally not computed here.
    fs5 = resblock_merge(params["layer35"], x)            # torch.cat((f5, s5), 1) fused
    fs6 = fs5.reshape(fs5.shape[0], -1)                   # (N, c6 * num_keypoints)
    h = linear(fs6, *params["fc1"], apply_relu=True)
    # Dropout(0.5): identity in eval mode
    h = linear(h, *params["fc2"], apply_relu=True)
    # Dropout(0.5): identity in eval mode
    out = linear(h, *params["fc3"], apply_relu=False)
    return out
    # TODO(synk): training-mode Dropout / batch-statistics BatchNorm not implemented (eval semantics).


# ----------------------------------------------------------------------------
if __name__ == "__main__":
    # Scaled-down config (same structure as ResnetPCA_wide: original is
    # c=(64,128,192,192,144,144), num_keypoints=650, hidden=(1024,512)).
    c1, c2, c3, c4, c5, c6 = 8, 16, 24, 24, 16, 16
    num_keypoints = 16
    hidden1, hidden2, len_out = 64, 32, 10
    batch = 2

    key = jax.random.PRNGKey(0)
    keys = jax.random.split(key, 20)
    ki = iter(keys)

    params = {
        "stage1": stack_pair(init_resblock(next(ki), 2, c1),
                             init_resblock(next(ki), 2, c1)),
        "stage2": stack_pair(init_resblock(next(ki), c1, c2),
                             init_resblock(next(ki), c1, c2)),
        "stage3": stack_pair(init_resblock(next(ki), c2, c3),
                             init_resblock(next(ki), c2, c3)),
        "stage4": stack_pair(init_resblock(next(ki), c3, c4),
                             init_resblock(next(ki), c3, c4)),
        "stage5": stack_pair(init_resblock(next(ki), c4, c5),
                             init_resblock(next(ki), c4, c5)),
        # layer31..34 exist in the torch module but are dead w.r.t. the output
        # and are therefore not instantiated / computed.
        "layer35": init_resblock(next(ki), 2 * c5, c6),
        "fc1": init_linear(next(ki), num_keypoints * c6, hidden1),
        "fc2": init_linear(next(ki), hidden1, hidden2),
        "fc3": init_linear(next(ki), hidden2, len_out),
    }

    kin1, kin2 = jax.random.split(next(ki))
    input1 = jax.random.normal(kin1, (batch, 2, num_keypoints), jnp.float32)
    input2 = jax.random.normal(kin2, (batch, 2, num_keypoints), jnp.float32)

    out = jax.jit(model_forward)(params, input1, input2)
    jax.block_until_ready(out)
    assert out.shape == (batch, len_out), out.shape
    assert bool(jnp.all(jnp.isfinite(out)))
    print("KERNEL_OK")
</pallas_src>

<mosaic_0001>
module attributes {stable_mosaic.version = 11 : i64} {
  func.func @_resblock_pair_kernel(%arg0: i32, %arg1: i32, %arg2: memref<1x1x2x16xbf16, #tpu.memory_space<vmem>>, %arg3: memref<1x8x6xbf16, #tpu.memory_space<vmem>>, %arg4: memref<1x8x1xf32, #tpu.memory_space<vmem>>, %arg5: memref<1x8x24xbf16, #tpu.memory_space<vmem>>, %arg6: memref<1x8x1xf32, #tpu.memory_space<vmem>>, %arg7: memref<1x8x24xbf16, #tpu.memory_space<vmem>>, %arg8: memref<1x8x1xf32, #tpu.memory_space<vmem>>, %arg9: memref<1x8x2xbf16, #tpu.memory_space<vmem>>, %arg10: memref<1x8x1xf32, #tpu.memory_space<vmem>>, %arg11: memref<1x1x8x16xbf16, #tpu.memory_space<vmem>>) attributes {dimension_semantics = [#tpu.dimension_semantics<parallel>, #tpu.dimension_semantics<parallel>], iteration_bounds = array<i64: 2, 2>, scalar_prefetch = 0 : i64, scratch_operands = 0 : i64, tpu.core_type = #tpu.core_type<tc>, window_params = [{transform_indices = @transform_0, window_bounds = array<i64: 1, 1, 2, 16>}, {transform_indices = @transform_1, window_bounds = array<i64: 1, 8, 6>}, {transform_indices = @transform_2, window_bounds = array<i64: 1, 8, 1>}, {transform_indices = @transform_3, window_bounds = array<i64: 1, 8, 24>}, {transform_indices = @transform_4, window_bounds = array<i64: 1, 8, 1>}, {transform_indices = @transform_5, window_bounds = array<i64: 1, 8, 24>}, {transform_indices = @transform_6, window_bounds = array<i64: 1, 8, 1>}, {transform_indices = @transform_7, window_bounds = array<i64: 1, 8, 2>}, {transform_indices = @transform_8, window_bounds = array<i64: 1, 8, 1>}, {transform_indices = @transform_9, window_bounds = array<i64: 1, 1, 8, 16>}]} {
    %c0 = arith.constant 0 : index
    %c0_0 = arith.constant 0 : index
    %c0_1 = arith.constant 0 : index
    %0 = vector.load %arg3[%c0, %c0_0, %c0_1] : memref<1x8x6xbf16, #tpu.memory_space<vmem>>, vector<1x8x6xbf16>
    %1 = vector.shape_cast %0 : vector<1x8x6xbf16> to vector<8x6xbf16>
    %c0_2 = arith.constant 0 : index
    %c0_3 = arith.constant 0 : index
    %c0_4 = arith.constant 0 : index
    %2 = vector.load %arg5[%c0_2, %c0_3, %c0_4] : memref<1x8x24xbf16, #tpu.memory_space<vmem>>, vector<1x8x24xbf16>
    %3 = vector.shape_cast %2 : vector<1x8x24xbf16> to vector<8x24xbf16>
    %c0_5 = arith.constant 0 : index
    %c0_6 = arith.constant 0 : index
    %c0_7 = arith.constant 0 : index
    %4 = vector.load %arg7[%c0_5, %c0_6, %c0_7] : memref<1x8x24xbf16, #tpu.memory_space<vmem>>, vector<1x8x24xbf16>
    %5 = vector.shape_cast %4 : vector<1x8x24xbf16> to vector<8x24xbf16>
    %c0_8 = arith.constant 0 : index
    %c0_9 = arith.constant 0 : index
    %c0_10 = arith.constant 0 : index
    %6 = vector.load %arg4[%c0_8, %c0_9, %c0_10] : memref<1x8x1xf32, #tpu.memory_space<vmem>>, vector<1x8x1xf32>
    %7 = vector.shape_cast %6 : vector<1x8x1xf32> to vector<8x1xf32>
    %c0_11 = arith.constant 0 : index
    %c0_12 = arith.constant 0 : index
    %c0_13 = arith.constant 0 : index
    %8 = vector.load %arg6[%c0_11, %c0_12, %c0_13] : memref<1x8x1xf32, #tpu.memory_space<vmem>>, vector<1x8x1xf32>
    %9 = vector.shape_cast %8 : vector<1x8x1xf32> to vector<8x1xf32>
    %c0_14 = arith.constant 0 : index
    %c0_15 = arith.constant 0 : index
    %c0_16 = arith.constant 0 : index
    %10 = vector.load %arg8[%c0_14, %c0_15, %c0_16] : memref<1x8x1xf32, #tpu.memory_space<vmem>>, vector<1x8x1xf32>
    %11 = vector.shape_cast %10 : vector<1x8x1xf32> to vector<8x1xf32>
    %c0_17 = arith.constant 0 : index
    %c0_18 = arith.constant 0 : index
    %c0_19 = arith.constant 0 : index
    %12 = vector.load %arg9[%c0_17, %c0_18, %c0_19] : memref<1x8x2xbf16, #tpu.memory_space<vmem>>, vector<1x8x2xbf16>
    %13 = vector.shape_cast %12 : vector<1x8x2xbf16> to vector<8x2xbf16>
    %c0_20 = arith.constant 0 : index
    %c0_21 = arith.constant 0 : index
    %c0_22 = arith.constant 0 : index
    %14 = vector.load %arg10[%c0_20, %c0_21, %c0_22] : memref<1x8x1xf32, #tpu.memory_space<vmem>>, vector<1x8x1xf32>
    %15 = vector.shape_cast %14 : vector<1x8x1xf32> to vector<8x1xf32>
    %c0_23 = arith.constant 0 : index
    %c0_24 = arith.constant 0 : index
    %c0_25 = arith.constant 0 : index
    %c0_26 = arith.constant 0 : index
    %16 = vector.load %arg2[%c0_23, %c0_24, %c0_25, %c0_26] : memref<1x1x2x16xbf16, #tpu.memory_space<vmem>>, vector<1x1x2x16xbf16>
    %17 = vector.shape_cast %16 : vector<1x1x2x16xbf16> to vector<2x16xbf16>
    %cst = arith.constant 0.000000e+00 : bf16
    %18 = vector.broadcast %cst : bf16 to vector<2x1xbf16>
    %19 = vector.extract_strided_slice %17 {offsets = [0, 0], sizes = [2, 15], strides = [1, 1]} : vector<2x16xbf16> to vector<2x15xbf16>
    %20 = tpu.concatenate %18, %19 in 1 : vector<2x1xbf16>, vector<2x15xbf16> -> vector<2x16xbf16>
    %21 = vector.extract_strided_slice %17 {offsets = [0, 1], sizes = [2, 15], strides = [1, 1]} : vector<2x16xbf16> to vector<2x15xbf16>
    %22 = tpu.concatenate %21, %18 in 1 : vector<2x15xbf16>, vector<2x1xbf16> -> vector<2x16xbf16>
    %23 = tpu.concatenate %20, %17, %22 in 0 : vector<2x16xbf16>, vector<2x16xbf16>, vector<2x16xbf16> -> vector<6x16xbf16>
    %cst_27 = arith.constant dense<0.000000e+00> : vector<8x16xf32>
    %24 = tpu.matmul %1, %23, %cst_27 {dimension_numbers = #tpu.dot_dimension_numbers<[1], [0], [0], [1], [0, 0, 1, 1], [], []>} : vector<8x6xbf16>, vector<6x16xbf16>, vector<8x16xf32> -> vector<8x16xf32>
    %25 = vector.broadcast %7 : vector<8x1xf32> to vector<8x16xf32>
    %26 = arith.addf %24, %25 : vector<8x16xf32>
    %cst_28 = arith.constant 0.000000e+00 : f32
    %27 = vector.broadcast %cst_28 : f32 to vector<8x16xf32>
    %28 = arith.maximumf %26, %27 : vector<8x16xf32>
    %29 = arith.truncf %28 : vector<8x16xf32> to vector<8x16xbf16>
    %cst_29 = arith.constant 0.000000e+00 : bf16
    %30 = vector.broadcast %cst_29 : bf16 to vector<8x1xbf16>
    %31 = vector.extract_strided_slice %29 {offsets = [0, 0], sizes = [8, 15], strides = [1, 1]} : vector<8x16xbf16> to vector<8x15xbf16>
    %32 = tpu.concatenate %30, %31 in 1 : vector<8x1xbf16>, vector<8x15xbf16> -> vector<8x16xbf16>
    %33 = vector.extract_strided_slice %29 {offsets = [0, 1], sizes = [8, 15], strides = [1, 1]} : vector<8x16xbf16> to vector<8x15xbf16>
    %34 = tpu.concatenate %33, %30 in 1 : vector<8x15xbf16>, vector<8x1xbf16> -> vector<8x16xbf16>
    %35 = tpu.concatenate %32, %29, %34 in 0 : vector<8x16xbf16>, vector<8x16xbf16>, vector<8x16xbf16> -> vector<24x16xbf16>
    %cst_30 = arith.constant dense<0.000000e+00> : vector<8x16xf32>
    %36 = tpu.matmul %3, %35, %cst_30 {dimension_numbers = #tpu.dot_dimension_numbers<[1], [0], [0], [1], [0, 0, 1, 1], [], []>} : vector<8x24xbf16>, vector<24x16xbf16>, vector<8x16xf32> -> vector<8x16xf32>
    %37 = vector.broadcast %9 : vector<8x1xf32> to vector<8x16xf32>
    %38 = arith.addf %36, %37 : vector<8x16xf32>
    %cst_31 = arith.constant 0.000000e+00 : f32
    %39 = vector.broadcast %cst_31 : f32 to vector<8x16xf32>
    %40 = arith.maximumf %38, %39 : vector<8x16xf32>
    %cst_32 = arith.constant dense<0.000000e+00> : vector<8x16xf32>
    %41 = tpu.matmul %13, %17, %cst_32 {dimension_numbers = #tpu.dot_dimension_numbers<[1], [0], [0], [1], [0, 0, 1, 1], [], []>} : vector<8x2xbf16>, vector<2x16xbf16>, vector<8x16xf32> -> vector<8x16xf32>
    %42 = vector.broadcast %15 : vector<8x1xf32> to vector<8x16xf32>
    %43 = arith.addf %41, %42 : vector<8x16xf32>
    %44 = arith.truncf %40 : vector<8x16xf32> to vector<8x16xbf16>
    %cst_33 = arith.constant 0.000000e+00 : bf16
    %45 = vector.broadcast %cst_33 : bf16 to vector<8x1xbf16>
    %46 = vector.extract_strided_slice %44 {offsets = [0, 0], sizes = [8, 15], strides = [1, 1]} : vector<8x16xbf16> to vector<8x15xbf16>
    %47 = tpu.concatenate %45, %46 in 1 : vector<8x1xbf16>, vector<8x15xbf16> -> vector<8x16xbf16>
    %48 = vector.extract_strided_slice %44 {offsets = [0, 1], sizes = [8, 15], strides = [1, 1]} : vector<8x16xbf16> to vector<8x15xbf16>
    %49 = tpu.concatenate %48, %45 in 1 : vector<8x15xbf16>, vector<8x1xbf16> -> vector<8x16xbf16>
    %50 = tpu.concatenate %47, %44, %49 in 0 : vector<8x16xbf16>, vector<8x16xbf16>, vector<8x16xbf16> -> vector<24x16xbf16>
    %cst_34 = arith.constant dense<0.000000e+00> : vector<8x16xf32>
    %51 = tpu.matmul %5, %50, %cst_34 {dimension_numbers = #tpu.dot_dimension_numbers<[1], [0], [0], [1], [0, 0, 1, 1], [], []>} : vector<8x24xbf16>, vector<24x16xbf16>, vector<8x16xf32> -> vector<8x16xf32>
    %52 = vector.broadcast %11 : vector<8x1xf32> to vector<8x16xf32>
    %53 = arith.addf %51, %52 : vector<8x16xf32>
    %54 = arith.addf %53, %43 : vector<8x16xf32>
    %cst_35 = arith.constant 0.000000e+00 : f32
    %55 = vector.broadcast %cst_35 : f32 to vector<8x16xf32>
    %56 = arith.maximumf %54, %55 : vector<8x16xf32>
    %57 = arith.truncf %56 : vector<8x16xf32> to vector<8x16xbf16>
    %c0_36 = arith.constant 0 : index
    %c0_37 = arith.constant 0 : index
    %c0_38 = arith.constant 0 : index
    %c0_39 = arith.constant 0 : index
    %58 = vector.load %arg11[%c0_36, %c0_37, %c0_38, %c0_39] : memref<1x1x8x16xbf16, #tpu.memory_space<vmem>>, vector<1x1x8x16xbf16>
    %59 = vector.shape_cast %58 : vector<1x1x8x16xbf16> to vector<8x16xbf16>
    %60 = vector.shape_cast %57 : vector<8x16xbf16> to vector<1x1x8x16xbf16>
    tpu.vector_store %arg11[%c0_36, %c0_37, %c0_38, %c0_39], %60 {strides = array<i32>} : memref<1x1x8x16xbf16, #tpu.memory_space<vmem>>, vector<1x1x8x16xbf16>,
    return
  }
  func.func @transform_0(%arg0: i32, %arg1: i32) -> (i32, i32, i32, i32) {
    %c0_i32 = arith.constant 0 : i32
    %c0_i32_0 = arith.constant 0 : i32
    %c0_i32_1 = arith.constant 0 : i32
    return %arg0, %arg1, %c0_i32, %c0_i32_0 : i32, i32, i32, i32
  }
  func.func @transform_1(%arg0: i32, %arg1: i32) -> (i32, i32, i32) {
    %c0_i32 = arith.constant 0 : i32
    %c0_i32_0 = arith.constant 0 : i32
    %c0_i32_1 = arith.constant 0 : i32
    return %arg0, %c0_i32, %c0_i32_0 : i32, i32, i32
  }
  func.func @transform_2(%arg0: i32, %arg1: i32) -> (i32, i32, i32) {
    %c0_i32 = arith.constant 0 : i32
    %c0_i32_0 = arith.constant 0 : i32
    %c0_i32_1 = arith.constant 0 : i32
    return %arg0, %c0_i32, %c0_i32_0 : i32, i32, i32
  }
  func.func @transform_3(%arg0: i32, %arg1: i32) -> (i32, i32, i32) {
    %c0_i32 = arith.constant 0 : i32
    %c0_i32_0 = arith.constant 0 : i32
    %c0_i32_1 = arith.constant 0 : i32
    return %arg0, %c0_i32, %c0_i32_0 : i32, i32, i32
  }
  func.func @transform_4(%arg0: i32, %arg1: i32) -> (i32, i32, i32) {
    %c0_i32 = arith.constant 0 : i32
    %c0_i32_0 = arith.constant 0 : i32
    %c0_i32_1 = arith.constant 0 : i32
    return %arg0, %c0_i32, %c0_i32_0 : i32, i32, i32
  }
  func.func @transform_5(%arg0: i32, %arg1: i32) -> (i32, i32, i32) {
    %c0_i32 = arith.constant 0 : i32
    %c0_i32_0 = arith.constant 0 : i32
    %c0_i32_1 = arith.constant 0 : i32
    return %arg0, %c0_i32, %c0_i32_0 : i32, i32, i32
  }
  func.func @transform_6(%arg0: i32, %arg1: i32) -> (i32, i32, i32) {
    %c0_i32 = arith.constant 0 : i32
    %c0_i32_0 = arith.constant 0 : i32
    %c0_i32_1 = arith.constant 0 : i32
    return %arg0, %c0_i32, %c0_i32_0 : i32, i32, i32
  }
  func.func @transform_7(%arg0: i32, %arg1: i32) -> (i32, i32, i32) {
    %c0_i32 = arith.constant 0 : i32
    %c0_i32_0 = arith.constant 0 : i32
    %c0_i32_1 = arith.constant 0 : i32
    return %arg0, %c0_i32, %c0_i32_0 : i32, i32, i32
  }
  func.func @transform_8(%arg0: i32, %arg1: i32) -> (i32, i32, i32) {
    %c0_i32 = arith.constant 0 : i32
    %c0_i32_0 = arith.constant 0 : i32
    %c0_i32_1 = arith.constant 0 : i32
    return %arg0, %c0_i32, %c0_i32_0 : i32, i32, i32
  }
  func.func @transform_9(%arg0: i32, %arg1: i32) -> (i32, i32, i32, i32) {
    %c0_i32 = arith.constant 0 : i32
    %c0_i32_0 = arith.constant 0 : i32
    %c0_i32_1 = arith.constant 0 : i32
    return %arg0, %arg1, %c0_i32, %c0_i32_0 : i32, i32, i32, i32
  }
}

module attributes {stable_mosaic.version = 11 : i64} {
  func.func @_resblock_pair_kernel(%arg0: i32, %arg1: i32, %arg2: memref<1x1x8x16xbf16, #tpu.memory_space<vmem>>, %arg3: memref<1x16x24xbf16, #tpu.memory_space<vmem>>, %arg4: memref<1x16x1xf32, #tpu.memory_space<vmem>>, %arg5: memref<1x16x48xbf16, #tpu.memory_space<vmem>>, %arg6: memref<1x16x1xf32, #tpu.memory_space<vmem>>, %arg7: memref<1x16x48xbf16, #tpu.memory_space<vmem>>, %arg8: memref<1x16x1xf32, #tpu.memory_space<vmem>>, %arg9: memref<1x16x8xbf16, #tpu.memory_space<vmem>>, %arg10: memref<1x16x1xf32, #tpu.memory_space<vmem>>, %arg11: memref<1x1x16x16xbf16, #tpu.memory_space<vmem>>) attributes {dimension_semantics = [#tpu.dimension_semantics<parallel>, #tpu.dimension_semantics<parallel>], iteration_bounds = array<i64: 2, 2>, scalar_prefetch = 0 : i64, scratch_operands = 0 : i64, tpu.core_type = #tpu.core_type<tc>, window_params = [{transform_indices = @transform_0, window_bounds = array<i64: 1, 1, 8, 16>}, {transform_indices = @transform_1, window_bounds = array<i64: 1, 16, 24>}, {transform_indices = @transform_2, window_bounds = array<i64: 1, 16, 1>}, {transform_indices = @transform_3, window_bounds = array<i64: 1, 16, 48>}, {transform_indices = @transform_4, window_bounds = array<i64: 1, 16, 1>}, {transform_indices = @transform_5, window_bounds = array<i64: 1, 16, 48>}, {transform_indices = @transform_6, window_bounds = array<i64: 1, 16, 1>}, {transform_indices = @transform_7, window_bounds = array<i64: 1, 16, 8>}, {transform_indices = @transform_8, window_bounds = array<i64: 1, 16, 1>}, {transform_indices = @transform_9, window_bounds = array<i64: 1, 1, 16, 16>}]} {
    %c0 = arith.constant 0 : index
    %c0_0 = arith.constant 0 : index
    %c0_1 = arith.constant 0 : index
    %0 = vector.load %arg3[%c0, %c0_0, %c0_1] : memref<1x16x24xbf16, #tpu.memory_space<vmem>>, vector<1x16x24xbf16>
    %1 = vector.shape_cast %0 : vector<1x16x24xbf16> to vector<16x24xbf16>
    %c0_2 = arith.constant 0 : index
    %c0_3 = arith.constant 0 : index
    %c0_4 = arith.constant 0 : index
    %2 = vector.load %arg5[%c0_2, %c0_3, %c0_4] : memref<1x16x48xbf16, #tpu.memory_space<vmem>>, vector<1x16x48xbf16>
    %3 = vector.shape_cast %2 : vector<1x16x48xbf16> to vector<16x48xbf16>
    %c0_5 = arith.constant 0 : index
    %c0_6 = arith.constant 0 : index
    %c0_7 = arith.constant 0 : index
    %4 = vector.load %arg7[%c0_5, %c0_6, %c0_7] : memref<1x16x48xbf16, #tpu.memory_space<vmem>>, vector<1x16x48xbf16>
    %5 = vector.shape_cast %4 : vector<1x16x48xbf16> to vector<16x48xbf16>
    %c0_8 = arith.constant 0 : index
    %c0_9 = arith.constant 0 : index
    %c0_10 = arith.constant 0 : index
    %6 = vector.load %arg4[%c0_8, %c0_9, %c0_10] : memref<1x16x1xf32, #tpu.memory_space<vmem>>, vector<1x16x1xf32>
    %7 = vector.shape_cast %6 : vector<1x16x1xf32> to vector<16x1xf32>
    %c0_11 = arith.constant 0 : index
    %c0_12 = arith.constant 0 : index
    %c0_13 = arith.constant 0 : index
    %8 = vector.load %arg6[%c0_11, %c0_12, %c0_13] : memref<1x16x1xf32, #tpu.memory_space<vmem>>, vector<1x16x1xf32>
    %9 = vector.shape_cast %8 : vector<1x16x1xf32> to vector<16x1xf32>
    %c0_14 = arith.constant 0 : index
    %c0_15 = arith.constant 0 : index
    %c0_16 = arith.constant 0 : index
    %10 = vector.load %arg8[%c0_14, %c0_15, %c0_16] : memref<1x16x1xf32, #tpu.memory_space<vmem>>, vector<1x16x1xf32>
    %11 = vector.shape_cast %10 : vector<1x16x1xf32> to vector<16x1xf32>
    %c0_17 = arith.constant 0 : index
    %c0_18 = arith.constant 0 : index
    %c0_19 = arith.constant 0 : index
    %12 = vector.load %arg9[%c0_17, %c0_18, %c0_19] : memref<1x16x8xbf16, #tpu.memory_space<vmem>>, vector<1x16x8xbf16>
    %13 = vector.shape_cast %12 : vector<1x16x8xbf16> to vector<16x8xbf16>
    %c0_20 = arith.constant 0 : index
    %c0_21 = arith.constant 0 : index
    %c0_22 = arith.constant 0 : index
    %14 = vector.load %arg10[%c0_20, %c0_21, %c0_22] : memref<1x16x1xf32, #tpu.memory_space<vmem>>, vector<1x16x1xf32>
    %15 = vector.shape_cast %14 : vector<1x16x1xf32> to vector<16x1xf32>
    %c0_23 = arith.constant 0 : index
    %c0_24 = arith.constant 0 : index
    %c0_25 = arith.constant 0 : index
    %c0_26 = arith.constant 0 : index
    %16 = vector.load %arg2[%c0_23, %c0_24, %c0_25, %c0_26] : memref<1x1x8x16xbf16, #tpu.memory_space<vmem>>, vector<1x1x8x16xbf16>
    %17 = vector.shape_cast %16 : vector<1x1x8x16xbf16> to vector<8x16xbf16>
    %cst = arith.constant 0.000000e+00 : bf16
    %18 = vector.broadcast %cst : bf16 to vector<8x1xbf16>
    %19 = vector.extract_strided_slice %17 {offsets = [0, 0], sizes = [8, 15], strides = [1, 1]} : vector<8x16xbf16> to vector<8x15xbf16>
    %20 = tpu.concatenate %18, %19 in 1 : vector<8x1xbf16>, vector<8x15xbf16> -> vector<8x16xbf16>
    %21 = vector.extract_strided_slice %17 {offsets = [0, 1], sizes = [8, 15], strides = [1, 1]} : vector<8x16xbf16> to vector<8x15xbf16>
    %22 = tpu.concatenate %21, %18 in 1 : vector<8x15xbf16>, vector<8x1xbf16> -> vector<8x16xbf16>
    %23 = tpu.concatenate %20, %17, %22 in 0 : vector<8x16xbf16>, vector<8x16xbf16>, vector<8x16xbf16> -> vector<24x16xbf16>
    %cst_27 = arith.constant dense<0.000000e+00> : vector<16x16xf32>
    %24 = tpu.matmul %1, %23, %cst_27 {dimension_numbers = #tpu.dot_dimension_numbers<[1], [0], [0], [1], [0, 0, 1, 1], [], []>} : vector<16x24xbf16>, vector<24x16xbf16>, vector<16x16xf32> -> vector<16x16xf32>
    %25 = vector.broadcast %7 : vector<16x1xf32> to vector<16x16xf32>
    %26 = arith.addf %24, %25 : vector<16x16xf32>
    %cst_28 = arith.constant 0.000000e+00 : f32
    %27 = vector.broadcast %cst_28 : f32 to vector<16x16xf32>
    %28 = arith.maximumf %26, %27 : vector<16x16xf32>
    %29 = arith.truncf %28 : vector<16x16xf32> to vector<16x16xbf16>
    %cst_29 = arith.constant 0.000000e+00 : bf16
    %30 = vector.broadcast %cst_29 : bf16 to vector<16x1xbf16>
    %31 = vector.extract_strided_slice %29 {offsets = [0, 0], sizes = [16, 15], strides = [1, 1]} : vector<16x16xbf16> to vector<16x15xbf16>
    %32 = tpu.concatenate %30, %31 in 1 : vector<16x1xbf16>, vector<16x15xbf16> -> vector<16x16xbf16>
    %33 = vector.extract_strided_slice %29 {offsets = [0, 1], sizes = [16, 15], strides = [1, 1]} : vector<16x16xbf16> to vector<16x15xbf16>
    %34 = tpu.concatenate %33, %30 in 1 : vector<16x15xbf16>, vector<16x1xbf16> -> vector<16x16xbf16>
    %35 = tpu.concatenate %32, %29, %34 in 0 : vector<16x16xbf16>, vector<16x16xbf16>, vector<16x16xbf16> -> vector<48x16xbf16>
    %cst_30 = arith.constant dense<0.000000e+00> : vector<16x16xf32>
    %36 = tpu.matmul %3, %35, %cst_30 {dimension_numbers = #tpu.dot_dimension_numbers<[1], [0], [0], [1], [0, 0, 1, 1], [], []>} : vector<16x48xbf16>, vector<48x16xbf16>, vector<16x16xf32> -> vector<16x16xf32>
    %37 = vector.broadcast %9 : vector<16x1xf32> to vector<16x16xf32>
    %38 = arith.addf %36, %37 : vector<16x16xf32>
    %cst_31 = arith.constant 0.000000e+00 : f32
    %39 = vector.broadcast %cst_31 : f32 to vector<16x16xf32>
    %40 = arith.maximumf %38, %39 : vector<16x16xf32>
    %cst_32 = arith.constant dense<0.000000e+00> : vector<16x16xf32>
    %41 = tpu.matmul %13, %17, %cst_32 {dimension_numbers = #tpu.dot_dimension_numbers<[1], [0], [0], [1], [0, 0, 1, 1], [], []>} : vector<16x8xbf16>, vector<8x16xbf16>, vector<16x16xf32> -> vector<16x16xf32>
    %42 = vector.broadcast %15 : vector<16x1xf32> to vector<16x16xf32>
    %43 = arith.addf %41, %42 : vector<16x16xf32>
    %44 = arith.truncf %40 : vector<16x16xf32> to vector<16x16xbf16>
    %cst_33 = arith.constant 0.000000e+00 : bf16
    %45 = vector.broadcast %cst_33 : bf16 to vector<16x1xbf16>
    %46 = vector.extract_strided_slice %44 {offsets = [0, 0], sizes = [16, 15], strides = [1, 1]} : vector<16x16xbf16> to vector<16x15xbf16>
    %47 = tpu.concatenate %45, %46 in 1 : vector<16x1xbf16>, vector<16x15xbf16> -> vector<16x16xbf16>
    %48 = vector.extract_strided_slice %44 {offsets = [0, 1], sizes = [16, 15], strides = [1, 1]} : vector<16x16xbf16> to vector<16x15xbf16>
    %49 = tpu.concatenate %48, %45 in 1 : vector<16x15xbf16>, vector<16x1xbf16> -> vector<16x16xbf16>
    %50 = tpu.concatenate %47, %44, %49 in 0 : vector<16x16xbf16>, vector<16x16xbf16>, vector<16x16xbf16> -> vector<48x16xbf16>
    %cst_34 = arith.constant dense<0.000000e+00> : vector<16x16xf32>
    %51 = tpu.matmul %5, %50, %cst_34 {dimension_numbers = #tpu.dot_dimension_numbers<[1], [0], [0], [1], [0, 0, 1, 1], [], []>} : vector<16x48xbf16>, vector<48x16xbf16>, vector<16x16xf32> -> vector<16x16xf32>
    %52 = vector.broadcast %11 : vector<16x1xf32> to vector<16x16xf32>
    %53 = arith.addf %51, %52 : vector<16x16xf32>
    %54 = arith.addf %53, %43 : vector<16x16xf32>
    %cst_35 = arith.constant 0.000000e+00 : f32
    %55 = vector.broadcast %cst_35 : f32 to vector<16x16xf32>
    %56 = arith.maximumf %54, %55 : vector<16x16xf32>
    %57 = arith.truncf %56 : vector<16x16xf32> to vector<16x16xbf16>
    %c0_36 = arith.constant 0 : index
    %c0_37 = arith.constant 0 : index
    %c0_38 = arith.constant 0 : index
    %c0_39 = arith.constant 0 : index
    %58 = vector.load %arg11[%c0_36, %c0_37, %c0_38, %c0_39] : memref<1x1x16x16xbf16, #tpu.memory_space<vmem>>, vector<1x1x16x16xbf16>
    %59 = vector.shape_cast %58 : vector<1x1x16x16xbf16> to vector<16x16xbf16>
    %60 = vector.shape_cast %57 : vector<16x16xbf16> to vector<1x1x16x16xbf16>
    tpu.vector_store %arg11[%c0_36, %c0_37, %c0_38, %c0_39], %60 {strides = array<i32>} : memref<1x1x16x16xbf16, #tpu.memory_space<vmem>>, vector<1x1x16x16xbf16>,
    return
  }
  func.func @transform_0(%arg0: i32, %arg1: i32) -> (i32, i32, i32, i32) {
    %c0_i32 = arith.constant 0 : i32
    %c0_i32_0 = arith.constant 0 : i32
    %c0_i32_1 = arith.constant 0 : i32
    return %arg0, %arg1, %c0_i32, %c0_i32_0 : i32, i32, i32, i32
  }
  func.func @transform_1(%arg0: i32, %arg1: i32) -> (i32, i32, i32) {
    %c0_i32 = arith.constant 0 : i32
    %c0_i32_0 = arith.constant 0 : i32
    %c0_i32_1 = arith.constant 0 : i32
    return %arg0, %c0_i32, %c0_i32_0 : i32, i32, i32
  }
  func.func @transform_2(%arg0: i32, %arg1: i32) -> (i32, i32, i32) {
    %c0_i32 = arith.constant 0 : i32
    %c0_i32_0 = arith.constant 0 : i32
    %c0_i32_1 = arith.constant 0 : i32
    return %arg0, %c0_i32, %c0_i32_0 : i32, i32, i32
  }
  func.func @transform_3(%arg0: i32, %arg1: i32) -> (i32, i32, i32) {
    %c0_i32 = arith.constant 0 : i32
    %c0_i32_0 = arith.constant 0 : i32
    %c0_i32_1 = arith.constant 0 : i32
    return %arg0, %c0_i32, %c0_i32_0 : i32, i32, i32
  }
  func.func @transform_4(%arg0: i32, %arg1: i32) -> (i32, i32, i32) {
    %c0_i32 = arith.constant 0 : i32
    %c0_i32_0 = arith.constant 0 : i32
    %c0_i32_1 = arith.constant 0 : i32
    return %arg0, %c0_i32, %c0_i32_0 : i32, i32, i32
  }
  func.func @transform_5(%arg0: i32, %arg1: i32) -> (i32, i32, i32) {
    %c0_i32 = arith.constant 0 : i32
    %c0_i32_0 = arith.constant 0 : i32
    %c0_i32_1 = arith.constant 0 : i32
    return %arg0, %c0_i32, %c0_i32_0 : i32, i32, i32
  }
  func.func @transform_6(%arg0: i32, %arg1: i32) -> (i32, i32, i32) {
    %c0_i32 = arith.constant 0 : i32
    %c0_i32_0 = arith.constant 0 : i32
    %c0_i32_1 = arith.constant 0 : i32
    return %arg0, %c0_i32, %c0_i32_0 : i32, i32, i32
  }
  func.func @transform_7(%arg0: i32, %arg1: i32) -> (i32, i32, i32) {
    %c0_i32 = arith.constant 0 : i32
    %c0_i32_0 = arith.constant 0 : i32
    %c0_i32_1 = arith.constant 0 : i32
    return %arg0, %c0_i32, %c0_i32_0 : i32, i32, i32
  }
  func.func @transform_8(%arg0: i32, %arg1: i32) -> (i32, i32, i32) {
    %c0_i32 = arith.constant 0 : i32
    %c0_i32_0 = arith.constant 0 : i32
    %c0_i32_1 = arith.constant 0 : i32
    return %arg0, %c0_i32, %c0_i32_0 : i32, i32, i32
  }
  func.func @transform_9(%arg0: i32, %arg1: i32) -> (i32, i32, i32, i32) {
    %c0_i32 = arith.constant 0 : i32
    %c0_i32_0 = arith.constant 0 : i32
    %c0_i32_1 = arith.constant 0 : i32
    return %arg0, %arg1, %c0_i32, %c0_i32_0 : i32, i32, i32, i32
  }
}

module attributes {stable_mosaic.version = 11 : i64} {
  func.func @_resblock_pair_kernel(%arg0: i32, %arg1: i32, %arg2: memref<1x1x16x16xbf16, #tpu.memory_space<vmem>>, %arg3: memref<1x24x48xbf16, #tpu.memory_space<vmem>>, %arg4: memref<1x24x1xf32, #tpu.memory_space<vmem>>, %arg5: memref<1x24x72xbf16, #tpu.memory_space<vmem>>, %arg6: memref<1x24x1xf32, #tpu.memory_space<vmem>>, %arg7: memref<1x24x72xbf16, #tpu.memory_space<vmem>>, %arg8: memref<1x24x1xf32, #tpu.memory_space<vmem>>, %arg9: memref<1x24x16xbf16, #tpu.memory_space<vmem>>, %arg10: memref<1x24x1xf32, #tpu.memory_space<vmem>>, %arg11: memref<1x1x24x16xbf16, #tpu.memory_space<vmem>>) attributes {dimension_semantics = [#tpu.dimension_semantics<parallel>, #tpu.dimension_semantics<parallel>], iteration_bounds = array<i64: 2, 2>, scalar_prefetch = 0 : i64, scratch_operands = 0 : i64, tpu.core_type = #tpu.core_type<tc>, window_params = [{transform_indices = @transform_0, window_bounds = array<i64: 1, 1, 16, 16>}, {transform_indices = @transform_1, window_bounds = array<i64: 1, 24, 48>}, {transform_indices = @transform_2, window_bounds = array<i64: 1, 24, 1>}, {transform_indices = @transform_3, window_bounds = array<i64: 1, 24, 72>}, {transform_indices = @transform_4, window_bounds = array<i64: 1, 24, 1>}, {transform_indices = @transform_5, window_bounds = array<i64: 1, 24, 72>}, {transform_indices = @transform_6, window_bounds = array<i64: 1, 24, 1>}, {transform_indices = @transform_7, window_bounds = array<i64: 1, 24, 16>}, {transform_indices = @transform_8, window_bounds = array<i64: 1, 24, 1>}, {transform_indices = @transform_9, window_bounds = array<i64: 1, 1, 24, 16>}]} {
    %c0 = arith.constant 0 : index
    %c0_0 = arith.constant 0 : index
    %c0_1 = arith.constant 0 : index
    %0 = vector.load %arg3[%c0, %c0_0, %c0_1] : memref<1x24x48xbf16, #tpu.memory_space<vmem>>, vector<1x24x48xbf16>
    %1 = vector.shape_cast %0 : vector<1x24x48xbf16> to vector<24x48xbf16>
    %c0_2 = arith.constant 0 : index
    %c0_3 = arith.constant 0 : index
    %c0_4 = arith.constant 0 : index
    %2 = vector.load %arg5[%c0_2, %c0_3, %c0_4] : memref<1x24x72xbf16, #tpu.memory_space<vmem>>, vector<1x24x72xbf16>
    %3 = vector.shape_cast %2 : vector<1x24x72xbf16> to vector<24x72xbf16>
    %c0_5 = arith.constant 0 : index
    %c0_6 = arith.constant 0 : index
    %c0_7 = arith.constant 0 : index
    %4 = vector.load %arg7[%c0_5, %c0_6, %c0_7] : memref<1x24x72xbf16, #tpu.memory_space<vmem>>, vector<1x24x72xbf16>
    %5 = vector.shape_cast %4 : vector<1x24x72xbf16> to vector<24x72xbf16>
    %c0_8 = arith.constant 0 : index
    %c0_9 = arith.constant 0 : index
    %c0_10 = arith.constant 0 : index
    %6 = vector.load %arg4[%c0_8, %c0_9, %c0_10] : memref<1x24x1xf32, #tpu.memory_space<vmem>>, vector<1x24x1xf32>
    %7 = vector.shape_cast %6 : vector<1x24x1xf32> to vector<24x1xf32>
    %c0_11 = arith.constant 0 : index
    %c0_12 = arith.constant 0 : index
    %c0_13 = arith.constant 0 : index
    %8 = vector.load %arg6[%c0_11, %c0_12, %c0_13] : memref<1x24x1xf32, #tpu.memory_space<vmem>>, vector<1x24x1xf32>
    %9 = vector.shape_cast %8 : vector<1x24x1xf32> to vector<24x1xf32>
    %c0_14 = arith.constant 0 : index
    %c0_15 = arith.constant 0 : index
    %c0_16 = arith.constant 0 : index
    %10 = vector.load %arg8[%c0_14, %c0_15, %c0_16] : memref<1x24x1xf32, #tpu.memory_space<vmem>>, vector<1x24x1xf32>
    %11 = vector.shape_cast %10 : vector<1x24x1xf32> to vector<24x1xf32>
    %c0_17 = arith.constant 0 : index
    %c0_18 = arith.constant 0 : index
    %c0_19 = arith.constant 0 : index
    %12 = vector.load %arg9[%c0_17, %c0_18, %c0_19] : memref<1x24x16xbf16, #tpu.memory_space<vmem>>, vector<1x24x16xbf16>
    %13 = vector.shape_cast %12 : vector<1x24x16xbf16> to vector<24x16xbf16>
    %c0_20 = arith.constant 0 : index
    %c0_21 = arith.constant 0 : index
    %c0_22 = arith.constant 0 : index
    %14 = vector.load %arg10[%c0_20, %c0_21, %c0_22] : memref<1x24x1xf32, #tpu.memory_space<vmem>>, vector<1x24x1xf32>
    %15 = vector.shape_cast %14 : vector<1x24x1xf32> to vector<24x1xf32>
    %c0_23 = arith.constant 0 : index
    %c0_24 = arith.constant 0 : index
    %c0_25 = arith.constant 0 : index
    %c0_26 = arith.constant 0 : index
    %16 = vector.load %arg2[%c0_23, %c0_24, %c0_25, %c0_26] : memref<1x1x16x16xbf16, #tpu.memory_space<vmem>>, vector<1x1x16x16xbf16>
    %17 = vector.shape_cast %16 : vector<1x1x16x16xbf16> to vector<16x16xbf16>
    %cst = arith.constant 0.000000e+00 : bf16
    %18 = vector.broadcast %cst : bf16 to vector<16x1xbf16>
    %19 = vector.extract_strided_slice %17 {offsets = [0, 0], sizes = [16, 15], strides = [1, 1]} : vector<16x16xbf16> to vector<16x15xbf16>
    %20 = tpu.concatenate %18, %19 in 1 : vector<16x1xbf16>, vector<16x15xbf16> -> vector<16x16xbf16>
    %21 = vector.extract_strided_slice %17 {offsets = [0, 1], sizes = [16, 15], strides = [1, 1]} : vector<16x16xbf16> to vector<16x15xbf16>
    %22 = tpu.concatenate %21, %18 in 1 : vector<16x15xbf16>, vector<16x1xbf16> -> vector<16x16xbf16>
    %23 = tpu.concatenate %20, %17, %22 in 0 : vector<16x16xbf16>, vector<16x16xbf16>, vector<16x16xbf16> -> vector<48x16xbf16>
    %cst_27 = arith.constant dense<0.000000e+00> : vector<24x16xf32>
    %24 = tpu.matmul %1, %23, %cst_27 {dimension_numbers = #tpu.dot_dimension_numbers<[1], [0], [0], [1], [0, 0, 1, 1], [], []>} : vector<24x48xbf16>, vector<48x16xbf16>, vector<24x16xf32> -> vector<24x16xf32>
    %25 = vector.broadcast %7 : vector<24x1xf32> to vector<24x16xf32>
    %26 = arith.addf %24, %25 : vector<24x16xf32>
    %cst_28 = arith.constant 0.000000e+00 : f32
    %27 = vector.broadcast %cst_28 : f32 to vector<24x16xf32>
    %28 = arith.maximumf %26, %27 : vector<24x16xf32>
    %29 = arith.truncf %28 : vector<24x16xf32> to vector<24x16xbf16>
    %cst_29 = arith.constant 0.000000e+00 : bf16
    %30 = vector.broadcast %cst_29 : bf16 to vector<24x1xbf16>
    %31 = vector.extract_strided_slice %29 {offsets = [0, 0], sizes = [24, 15], strides = [1, 1]} : vector<24x16xbf16> to vector<24x15xbf16>
    %32 = tpu.concatenate %30, %31 in 1 : vector<24x1xbf16>, vector<24x15xbf16> -> vector<24x16xbf16>
    %33 = vector.extract_strided_slice %29 {offsets = [0, 1], sizes = [24, 15], strides = [1, 1]} : vector<24x16xbf16> to vector<24x15xbf16>
    %34 = tpu.concatenate %33, %30 in 1 : vector<24x15xbf16>, vector<24x1xbf16> -> vector<24x16xbf16>
    %35 = tpu.concatenate %32, %29, %34 in 0 : vector<24x16xbf16>, vector<24x16xbf16>, vector<24x16xbf16> -> vector<72x16xbf16>
    %cst_30 = arith.constant dense<0.000000e+00> : vector<24x16xf32>
    %36 = tpu.matmul %3, %35, %cst_30 {dimension_numbers = #tpu.dot_dimension_numbers<[1], [0], [0], [1], [0, 0, 1, 1], [], []>} : vector<24x72xbf16>, vector<72x16xbf16>, vector<24x16xf32> -> vector<24x16xf32>
    %37 = vector.broadcast %9 : vector<24x1xf32> to vector<24x16xf32>
    %38 = arith.addf %36, %37 : vector<24x16xf32>
    %cst_31 = arith.constant 0.000000e+00 : f32
    %39 = vector.broadcast %cst_31 : f32 to vector<24x16xf32>
    %40 = arith.maximumf %38, %39 : vector<24x16xf32>
    %cst_32 = arith.constant dense<0.000000e+00> : vector<24x16xf32>
    %41 = tpu.matmul %13, %17, %cst_32 {dimension_numbers = #tpu.dot_dimension_numbers<[1], [0], [0], [1], [0, 0, 1, 1], [], []>} : vector<24x16xbf16>, vector<16x16xbf16>, vector<24x16xf32> -> vector<24x16xf32>
    %42 = vector.broadcast %15 : vector<24x1xf32> to vector<24x16xf32>
    %43 = arith.addf %41, %42 : vector<24x16xf32>
    %44 = arith.truncf %40 : vector<24x16xf32> to vector<24x16xbf16>
    %cst_33 = arith.constant 0.000000e+00 : bf16
    %45 = vector.broadcast %cst_33 : bf16 to vector<24x1xbf16>
    %46 = vector.extract_strided_slice %44 {offsets = [0, 0], sizes = [24, 15], strides = [1, 1]} : vector<24x16xbf16> to vector<24x15xbf16>
    %47 = tpu.concatenate %45, %46 in 1 : vector<24x1xbf16>, vector<24x15xbf16> -> vector<24x16xbf16>
    %48 = vector.extract_strided_slice %44 {offsets = [0, 1], sizes = [24, 15], strides = [1, 1]} : vector<24x16xbf16> to vector<24x15xbf16>
    %49 = tpu.concatenate %48, %45 in 1 : vector<24x15xbf16>, vector<24x1xbf16> -> vector<24x16xbf16>
    %50 = tpu.concatenate %47, %44, %49 in 0 : vector<24x16xbf16>, vector<24x16xbf16>, vector<24x16xbf16> -> vector<72x16xbf16>
    %cst_34 = arith.constant dense<0.000000e+00> : vector<24x16xf32>
    %51 = tpu.matmul %5, %50, %cst_34 {dimension_numbers = #tpu.dot_dimension_numbers<[1], [0], [0], [1], [0, 0, 1, 1], [], []>} : vector<24x72xbf16>, vector<72x16xbf16>, vector<24x16xf32> -> vector<24x16xf32>
    %52 = vector.broadcast %11 : vector<24x1xf32> to vector<24x16xf32>
    %53 = arith.addf %51, %52 : vector<24x16xf32>
    %54 = arith.addf %53, %43 : vector<24x16xf32>
    %cst_35 = arith.constant 0.000000e+00 : f32
    %55 = vector.broadcast %cst_35 : f32 to vector<24x16xf32>
    %56 = arith.maximumf %54, %55 : vector<24x16xf32>
    %57 = arith.truncf %56 : vector<24x16xf32> to vector<24x16xbf16>
    %c0_36 = arith.constant 0 : index
    %c0_37 = arith.constant 0 : index
    %c0_38 = arith.constant 0 : index
    %c0_39 = arith.constant 0 : index
    %58 = vector.load %arg11[%c0_36, %c0_37, %c0_38, %c0_39] : memref<1x1x24x16xbf16, #tpu.memory_space<vmem>>, vector<1x1x24x16xbf16>
    %59 = vector.shape_cast %58 : vector<1x1x24x16xbf16> to vector<24x16xbf16>
    %60 = vector.shape_cast %57 : vector<24x16xbf16> to vector<1x1x24x16xbf16>
    tpu.vector_store %arg11[%c0_36, %c0_37, %c0_38, %c0_39], %60 {strides = array<i32>} : memref<1x1x24x16xbf16, #tpu.memory_space<vmem>>, vector<1x1x24x16xbf16>,
    return
  }
  func.func @transform_0(%arg0: i32, %arg1: i32) -> (i32, i32, i32, i32) {
    %c0_i32 = arith.constant 0 : i32
    %c0_i32_0 = arith.constant 0 : i32
    %c0_i32_1 = arith.constant 0 : i32
    return %arg0, %arg1, %c0_i32, %c0_i32_0 : i32, i32, i32, i32
  }
  func.func @transform_1(%arg0: i32, %arg1: i32) -> (i32, i32, i32) {
    %c0_i32 = arith.constant 0 : i32
    %c0_i32_0 = arith.constant 0 : i32
    %c0_i32_1 = arith.constant 0 : i32
    return %arg0, %c0_i32, %c0_i32_0 : i32, i32, i32
  }
  func.func @transform_2(%arg0: i32, %arg1: i32) -> (i32, i32, i32) {
    %c0_i32 = arith.constant 0 : i32
    %c0_i32_0 = arith.constant 0 : i32
    %c0_i32_1 = arith.constant 0 : i32
    return %arg0, %c0_i32, %c0_i32_0 : i32, i32, i32
  }
  func.func @transform_3(%arg0: i32, %arg1: i32) -> (i32, i32, i32) {
    %c0_i32 = arith.constant 0 : i32
    %c0_i32_0 = arith.constant 0 : i32
    %c0_i32_1 = arith.constant 0 : i32
    return %arg0, %c0_i32, %c0_i32_0 : i32, i32, i32
  }
  func.func @transform_4(%arg0: i32, %arg1: i32) -> (i32, i32, i32) {
    %c0_i32 = arith.constant 0 : i32
    %c0_i32_0 = arith.constant 0 : i32
    %c0_i32_1 = arith.constant 0 : i32
    return %arg0, %c0_i32, %c0_i32_0 : i32, i32, i32
  }
  func.func @transform_5(%arg0: i32, %arg1: i32) -> (i32, i32, i32) {
    %c0_i32 = arith.constant 0 : i32
    %c0_i32_0 = arith.constant 0 : i32
    %c0_i32_1 = arith.constant 0 : i32
    return %arg0, %c0_i32, %c0_i32_0 : i32, i32, i32
  }
  func.func @transform_6(%arg0: i32, %arg1: i32) -> (i32, i32, i32) {
    %c0_i32 = arith.constant 0 : i32
    %c0_i32_0 = arith.constant 0 : i32
    %c0_i32_1 = arith.constant 0 : i32
    return %arg0, %c0_i32, %c0_i32_0 : i32, i32, i32
  }
  func.func @transform_7(%arg0: i32, %arg1: i32) -> (i32, i32, i32) {
    %c0_i32 = arith.constant 0 : i32
    %c0_i32_0 = arith.constant 0 : i32
    %c0_i32_1 = arith.constant 0 : i32
    return %arg0, %c0_i32, %c0_i32_0 : i32, i32, i32
  }
  func.func @transform_8(%arg0: i32, %arg1: i32) -> (i32, i32, i32) {
    %c0_i32 = arith.constant 0 : i32
    %c0_i32_0 = arith.constant 0 : i32
    %c0_i32_1 = arith.constant 0 : i32
    return %arg0, %c0_i32, %c0_i32_0 : i32, i32, i32
  }
  func.func @transform_9(%arg0: i32, %arg1: i32) -> (i32, i32, i32, i32) {
    %c0_i32 = arith.constant 0 : i32
    %c0_i32_0 = arith.constant 0 : i32
    %c0_i32_1 = arith.constant 0 : i32
    return %arg0, %arg1, %c0_i32, %c0_i32_0 : i32, i32, i32, i32
  }
}

module attributes {stable_mosaic.version = 11 : i64} {
  func.func @_resblock_pair_kernel(%arg0: i32, %arg1: i32, %arg2: memref<1x1x24x16xbf16, #tpu.memory_space<vmem>>, %arg3: memref<1x24x72xbf16, #tpu.memory_space<vmem>>, %arg4: memref<1x24x1xf32, #tpu.memory_space<vmem>>, %arg5: memref<1x24x72xbf16, #tpu.memory_space<vmem>>, %arg6: memref<1x24x1xf32, #tpu.memory_space<vmem>>, %arg7: memref<1x24x72xbf16, #tpu.memory_space<vmem>>, %arg8: memref<1x24x1xf32, #tpu.memory_space<vmem>>, %arg9: memref<1x1x24x16xbf16, #tpu.memory_space<vmem>>) attributes {dimension_semantics = [#tpu.dimension_semantics<parallel>, #tpu.dimension_semantics<parallel>], iteration_bounds = array<i64: 2, 2>, scalar_prefetch = 0 : i64, scratch_operands = 0 : i64, tpu.core_type = #tpu.core_type<tc>, window_params = [{transform_indices = @transform_0, window_bounds = array<i64: 1, 1, 24, 16>}, {transform_indices = @transform_1, window_bounds = array<i64: 1, 24, 72>}, {transform_indices = @transform_2, window_bounds = array<i64: 1, 24, 1>}, {transform_indices = @transform_3, window_bounds = array<i64: 1, 24, 72>}, {transform_indices = @transform_4, window_bounds = array<i64: 1, 24, 1>}, {transform_indices = @transform_5, window_bounds = array<i64: 1, 24, 72>}, {transform_indices = @transform_6, window_bounds = array<i64: 1, 24, 1>}, {transform_indices = @transform_7, window_bounds = array<i64: 1, 1, 24, 16>}]} {
    %c0 = arith.constant 0 : index
    %c0_0 = arith.constant 0 : index
    %c0_1 = arith.constant 0 : index
    %0 = vector.load %arg3[%c0, %c0_0, %c0_1] : memref<1x24x72xbf16, #tpu.memory_space<vmem>>, vector<1x24x72xbf16>
    %1 = vector.shape_cast %0 : vector<1x24x72xbf16> to vector<24x72xbf16>
    %c0_2 = arith.constant 0 : index
    %c0_3 = arith.constant 0 : index
    %c0_4 = arith.constant 0 : index
    %2 = vector.load %arg5[%c0_2, %c0_3, %c0_4] : memref<1x24x72xbf16, #tpu.memory_space<vmem>>, vector<1x24x72xbf16>
    %3 = vector.shape_cast %2 : vector<1x24x72xbf16> to vector<24x72xbf16>
    %c0_5 = arith.constant 0 : index
    %c0_6 = arith.constant 0 : index
    %c0_7 = arith.constant 0 : index
    %4 = vector.load %arg7[%c0_5, %c0_6, %c0_7] : memref<1x24x72xbf16, #tpu.memory_space<vmem>>, vector<1x24x72xbf16>
    %5 = vector.shape_cast %4 : vector<1x24x72xbf16> to vector<24x72xbf16>
    %c0_8 = arith.constant 0 : index
    %c0_9 = arith.constant 0 : index
    %c0_10 = arith.constant 0 : index
    %6 = vector.load %arg4[%c0_8, %c0_9, %c0_10] : memref<1x24x1xf32, #tpu.memory_space<vmem>>, vector<1x24x1xf32>
    %7 = vector.shape_cast %6 : vector<1x24x1xf32> to vector<24x1xf32>
    %c0_11 = arith.constant 0 : index
    %c0_12 = arith.constant 0 : index
    %c0_13 = arith.constant 0 : index
    %8 = vector.load %arg6[%c0_11, %c0_12, %c0_13] : memref<1x24x1xf32, #tpu.memory_space<vmem>>, vector<1x24x1xf32>
    %9 = vector.shape_cast %8 : vector<1x24x1xf32> to vector<24x1xf32>
    %c0_14 = arith.constant 0 : index
    %c0_15 = arith.constant 0 : index
    %c0_16 = arith.constant 0 : index
    %10 = vector.load %arg8[%c0_14, %c0_15, %c0_16] : memref<1x24x1xf32, #tpu.memory_space<vmem>>, vector<1x24x1xf32>
    %11 = vector.shape_cast %10 : vector<1x24x1xf32> to vector<24x1xf32>
    %c0_17 = arith.constant 0 : index
    %c0_18 = arith.constant 0 : index
    %c0_19 = arith.constant 0 : index
    %c0_20 = arith.constant 0 : index
    %12 = vector.load %arg2[%c0_17, %c0_18, %c0_19, %c0_20] : memref<1x1x24x16xbf16, #tpu.memory_space<vmem>>, vector<1x1x24x16xbf16>
    %13 = vector.shape_cast %12 : vector<1x1x24x16xbf16> to vector<24x16xbf16>
    %cst = arith.constant 0.000000e+00 : bf16
    %14 = vector.broadcast %cst : bf16 to vector<24x1xbf16>
    %15 = vector.extract_strided_slice %13 {offsets = [0, 0], sizes = [24, 15], strides = [1, 1]} : vector<24x16xbf16> to vector<24x15xbf16>
    %16 = tpu.concatenate %14, %15 in 1 : vector<24x1xbf16>, vector<24x15xbf16> -> vector<24x16xbf16>
    %17 = vector.extract_strided_slice %13 {offsets = [0, 1], sizes = [24, 15], strides = [1, 1]} : vector<24x16xbf16> to vector<24x15xbf16>
    %18 = tpu.concatenate %17, %14 in 1 : vector<24x15xbf16>, vector<24x1xbf16> -> vector<24x16xbf16>
    %19 = tpu.concatenate %16, %13, %18 in 0 : vector<24x16xbf16>, vector<24x16xbf16>, vector<24x16xbf16> -> vector<72x16xbf16>
    %cst_21 = arith.constant dense<0.000000e+00> : vector<24x16xf32>
    %20 = tpu.matmul %1, %19, %cst_21 {dimension_numbers = #tpu.dot_dimension_numbers<[1], [0], [0], [1], [0, 0, 1, 1], [], []>} : vector<24x72xbf16>, vector<72x16xbf16>, vector<24x16xf32> -> vector<24x16xf32>
    %21 = vector.broadcast %7 : vector<24x1xf32> to vector<24x16xf32>
    %22 = arith.addf %20, %21 : vector<24x16xf32>
    %cst_22 = arith.constant 0.000000e+00 : f32
    %23 = vector.broadcast %cst_22 : f32 to vector<24x16xf32>
    %24 = arith.maximumf %22, %23 : vector<24x16xf32>
    %25 = arith.truncf %24 : vector<24x16xf32> to vector<24x16xbf16>
    %cst_23 = arith.constant 0.000000e+00 : bf16
    %26 = vector.broadcast %cst_23 : bf16 to vector<24x1xbf16>
    %27 = vector.extract_strided_slice %25 {offsets = [0, 0], sizes = [24, 15], strides = [1, 1]} : vector<24x16xbf16> to vector<24x15xbf16>
    %28 = tpu.concatenate %26, %27 in 1 : vector<24x1xbf16>, vector<24x15xbf16> -> vector<24x16xbf16>
    %29 = vector.extract_strided_slice %25 {offsets = [0, 1], sizes = [24, 15], strides = [1, 1]} : vector<24x16xbf16> to vector<24x15xbf16>
    %30 = tpu.concatenate %29, %26 in 1 : vector<24x15xbf16>, vector<24x1xbf16> -> vector<24x16xbf16>
    %31 = tpu.concatenate %28, %25, %30 in 0 : vector<24x16xbf16>, vector<24x16xbf16>, vector<24x16xbf16> -> vector<72x16xbf16>
    %cst_24 = arith.constant dense<0.000000e+00> : vector<24x16xf32>
    %32 = tpu.matmul %3, %31, %cst_24 {dimension_numbers = #tpu.dot_dimension_numbers<[1], [0], [0], [1], [0, 0, 1, 1], [], []>} : vector<24x72xbf16>, vector<72x16xbf16>, vector<24x16xf32> -> vector<24x16xf32>
    %33 = vector.broadcast %9 : vector<24x1xf32> to vector<24x16xf32>
    %34 = arith.addf %32, %33 : vector<24x16xf32>
    %cst_25 = arith.constant 0.000000e+00 : f32
    %35 = vector.broadcast %cst_25 : f32 to vector<24x16xf32>
    %36 = arith.maximumf %34, %35 : vector<24x16xf32>
    %37 = arith.extf %13 : vector<24x16xbf16> to vector<24x16xf32>
    %38 = arith.truncf %36 : vector<24x16xf32> to vector<24x16xbf16>
    %cst_26 = arith.constant 0.000000e+00 : bf16
    %39 = vector.broadcast %cst_26 : bf16 to vector<24x1xbf16>
    %40 = vector.extract_strided_slice %38 {offsets = [0, 0], sizes = [24, 15], strides = [1, 1]} : vector<24x16xbf16> to vector<24x15xbf16>
    %41 = tpu.concatenate %39, %40 in 1 : vector<24x1xbf16>, vector<24x15xbf16> -> vector<24x16xbf16>
    %42 = vector.extract_strided_slice %38 {offsets = [0, 1], sizes = [24, 15], strides = [1, 1]} : vector<24x16xbf16> to vector<24x15xbf16>
    %43 = tpu.concatenate %42, %39 in 1 : vector<24x15xbf16>, vector<24x1xbf16> -> vector<24x16xbf16>
    %44 = tpu.concatenate %41, %38, %43 in 0 : vector<24x16xbf16>, vector<24x16xbf16>, vector<24x16xbf16> -> vector<72x16xbf16>
    %cst_27 = arith.constant dense<0.000000e+00> : vector<24x16xf32>
    %45 = tpu.matmul %5, %44, %cst_27 {dimension_numbers = #tpu.dot_dimension_numbers<[1], [0], [0], [1], [0, 0, 1, 1], [], []>} : vector<24x72xbf16>, vector<72x16xbf16>, vector<24x16xf32> -> vector<24x16xf32>
    %46 = vector.broadcast %11 : vector<24x1xf32> to vector<24x16xf32>
    %47 = arith.addf %45, %46 : vector<24x16xf32>
    %48 = arith.addf %47, %37 : vector<24x16xf32>
    %cst_28 = arith.constant 0.000000e+00 : f32
    %49 = vector.broadcast %cst_28 : f32 to vector<24x16xf32>
    %50 = arith.maximumf %48, %49 : vector<24x16xf32>
    %51 = arith.truncf %50 : vector<24x16xf32> to vector<24x16xbf16>
    %c0_29 = arith.constant 0 : index
    %c0_30 = arith.constant 0 : index
    %c0_31 = arith.constant 0 : index
    %c0_32 = arith.constant 0 : index
    %52 = vector.load %arg9[%c0_29, %c0_30, %c0_31, %c0_32] : memref<1x1x24x16xbf16, #tpu.memory_space<vmem>>, vector<1x1x24x16xbf16>
    %53 = vector.shape_cast %52 : vector<1x1x24x16xbf16> to vector<24x16xbf16>
    %54 = vector.shape_cast %51 : vector<24x16xbf16> to vector<1x1x24x16xbf16>
    tpu.vector_store %arg9[%c0_29, %c0_30, %c0_31, %c0_32], %54 {strides = array<i32>} : memref<1x1x24x16xbf16, #tpu.memory_space<vmem>>, vector<1x1x24x16xbf16>,
    return
  }
  func.func @transform_0(%arg0: i32, %arg1: i32) -> (i32, i32, i32, i32) {
    %c0_i32 = arith.constant 0 : i32
    %c0_i32_0 = arith.constant 0 : i32
    %c0_i32_1 = arith.constant 0 : i32
    return %arg0, %arg1, %c0_i32, %c0_i32_0 : i32, i32, i32, i32
  }
  func.func @transform_1(%arg0: i32, %arg1: i32) -> (i32, i32, i32) {
    %c0_i32 = arith.constant 0 : i32
    %c0_i32_0 = arith.constant 0 : i32
    %c0_i32_1 = arith.constant 0 : i32
    return %arg0, %c0_i32, %c0_i32_0 : i32, i32, i32
  }
  func.func @transform_2(%arg0: i32, %arg1: i32) -> (i32, i32, i32) {
    %c0_i32 = arith.constant 0 : i32
    %c0_i32_0 = arith.constant 0 : i32
    %c0_i32_1 = arith.constant 0 : i32
    return %arg0, %c0_i32, %c0_i32_0 : i32, i32, i32
  }
  func.func @transform_3(%arg0: i32, %arg1: i32) -> (i32, i32, i32) {
    %c0_i32 = arith.constant 0 : i32
    %c0_i32_0 = arith.constant 0 : i32
    %c0_i32_1 = arith.constant 0 : i32
    return %arg0, %c0_i32, %c0_i32_0 : i32, i32, i32
  }
  func.func @transform_4(%arg0: i32, %arg1: i32) -> (i32, i32, i32) {
    %c0_i32 = arith.constant 0 : i32
    %c0_i32_0 = arith.constant 0 : i32
    %c0_i32_1 = arith.constant 0 : i32
    return %arg0, %c0_i32, %c0_i32_0 : i32, i32, i32
  }
  func.func @transform_5(%arg0: i32, %arg1: i32) -> (i32, i32, i32) {
    %c0_i32 = arith.constant 0 : i32
    %c0_i32_0 = arith.constant 0 : i32
    %c0_i32_1 = arith.constant 0 : i32
    return %arg0, %c0_i32, %c0_i32_0 : i32, i32, i32
  }
  func.func @transform_6(%arg0: i32, %arg1: i32) -> (i32, i32, i32) {
    %c0_i32 = arith.constant 0 : i32
    %c0_i32_0 = arith.constant 0 : i32
    %c0_i32_1 = arith.constant 0 : i32
    return %arg0, %c0_i32, %c0_i32_0 : i32, i32, i32
  }
  func.func @transform_7(%arg0: i32, %arg1: i32) -> (i32, i32, i32, i32) {
    %c0_i32 = arith.constant 0 : i32
    %c0_i32_0 = arith.constant 0 : i32
    %c0_i32_1 = arith.constant 0 : i32
    return %arg0, %arg1, %c0_i32, %c0_i32_0 : i32, i32, i32, i32
  }
}

module attributes {stable_mosaic.version = 11 : i64} {
  func.func @_resblock_pair_kernel(%arg0: i32, %arg1: i32, %arg2: memref<1x1x24x16xbf16, #tpu.memory_space<vmem>>, %arg3: memref<1x16x72xbf16, #tpu.memory_space<vmem>>, %arg4: memref<1x16x1xf32, #tpu.memory_space<vmem>>, %arg5: memref<1x16x48xbf16, #tpu.memory_space<vmem>>, %arg6: memref<1x16x1xf32, #tpu.memory_space<vmem>>, %arg7: memref<1x16x48xbf16, #tpu.memory_space<vmem>>, %arg8: memref<1x16x1xf32, #tpu.memory_space<vmem>>, %arg9: memref<1x16x24xbf16, #tpu.memory_space<vmem>>, %arg10: memref<1x16x1xf32, #tpu.memory_space<vmem>>, %arg11: memref<1x1x16x16xbf16, #tpu.memory_space<vmem>>) attributes {dimension_semantics = [#tpu.dimension_semantics<parallel>, #tpu.dimension_semantics<parallel>], iteration_bounds = array<i64: 2, 2>, scalar_prefetch = 0 : i64, scratch_operands = 0 : i64, tpu.core_type = #tpu.core_type<tc>, window_params = [{transform_indices = @transform_0, window_bounds = array<i64: 1, 1, 24, 16>}, {transform_indices = @transform_1, window_bounds = array<i64: 1, 16, 72>}, {transform_indices = @transform_2, window_bounds = array<i64: 1, 16, 1>}, {transform_indices = @transform_3, window_bounds = array<i64: 1, 16, 48>}, {transform_indices = @transform_4, window_bounds = array<i64: 1, 16, 1>}, {transform_indices = @transform_5, window_bounds = array<i64: 1, 16, 48>}, {transform_indices = @transform_6, window_bounds = array<i64: 1, 16, 1>}, {transform_indices = @transform_7, window_bounds = array<i64: 1, 16, 24>}, {transform_indices = @transform_8, window_bounds = array<i64: 1, 16, 1>}, {transform_indices = @transform_9, window_bounds = array<i64: 1, 1, 16, 16>}]} {
    %c0 = arith.constant 0 : index
    %c0_0 = arith.constant 0 : index
    %c0_1 = arith.constant 0 : index
    %0 = vector.load %arg3[%c0, %c0_0, %c0_1] : memref<1x16x72xbf16, #tpu.memory_space<vmem>>, vector<1x16x72xbf16>
    %1 = vector.shape_cast %0 : vector<1x16x72xbf16> to vector<16x72xbf16>
    %c0_2 = arith.constant 0 : index
    %c0_3 = arith.constant 0 : index
    %c0_4 = arith.constant 0 : index
    %2 = vector.load %arg5[%c0_2, %c0_3, %c0_4] : memref<1x16x48xbf16, #tpu.memory_space<vmem>>, vector<1x16x48xbf16>
    %3 = vector.shape_cast %2 : vector<1x16x48xbf16> to vector<16x48xbf16>
    %c0_5 = arith.constant 0 : index
    %c0_6 = arith.constant 0 : index
    %c0_7 = arith.constant 0 : index
    %4 = vector.load %arg7[%c0_5, %c0_6, %c0_7] : memref<1x16x48xbf16, #tpu.memory_space<vmem>>, vector<1x16x48xbf16>
    %5 = vector.shape_cast %4 : vector<1x16x48xbf16> to vector<16x48xbf16>
    %c0_8 = arith.constant 0 : index
    %c0_9 = arith.constant 0 : index
    %c0_10 = arith.constant 0 : index
    %6 = vector.load %arg4[%c0_8, %c0_9, %c0_10] : memref<1x16x1xf32, #tpu.memory_space<vmem>>, vector<1x16x1xf32>
    %7 = vector.shape_cast %6 : vector<1x16x1xf32> to vector<16x1xf32>
    %c0_11 = arith.constant 0 : index
    %c0_12 = arith.constant 0 : index
    %c0_13 = arith.constant 0 : index
    %8 = vector.load %arg6[%c0_11, %c0_12, %c0_13] : memref<1x16x1xf32, #tpu.memory_space<vmem>>, vector<1x16x1xf32>
    %9 = vector.shape_cast %8 : vector<1x16x1xf32> to vector<16x1xf32>
    %c0_14 = arith.constant 0 : index
    %c0_15 = arith.constant 0 : index
    %c0_16 = arith.constant 0 : index
    %10 = vector.load %arg8[%c0_14, %c0_15, %c0_16] : memref<1x16x1xf32, #tpu.memory_space<vmem>>, vector<1x16x1xf32>
    %11 = vector.shape_cast %10 : vector<1x16x1xf32> to vector<16x1xf32>
    %c0_17 = arith.constant 0 : index
    %c0_18 = arith.constant 0 : index
    %c0_19 = arith.constant 0 : index
    %12 = vector.load %arg9[%c0_17, %c0_18, %c0_19] : memref<1x16x24xbf16, #tpu.memory_space<vmem>>, vector<1x16x24xbf16>
    %13 = vector.shape_cast %12 : vector<1x16x24xbf16> to vector<16x24xbf16>
    %c0_20 = arith.constant 0 : index
    %c0_21 = arith.constant 0 : index
    %c0_22 = arith.constant 0 : index
    %14 = vector.load %arg10[%c0_20, %c0_21, %c0_22] : memref<1x16x1xf32, #tpu.memory_space<vmem>>, vector<1x16x1xf32>
    %15 = vector.shape_cast %14 : vector<1x16x1xf32> to vector<16x1xf32>
    %c0_23 = arith.constant 0 : index
    %c0_24 = arith.constant 0 : index
    %c0_25 = arith.constant 0 : index
    %c0_26 = arith.constant 0 : index
    %16 = vector.load %arg2[%c0_23, %c0_24, %c0_25, %c0_26] : memref<1x1x24x16xbf16, #tpu.memory_space<vmem>>, vector<1x1x24x16xbf16>
    %17 = vector.shape_cast %16 : vector<1x1x24x16xbf16> to vector<24x16xbf16>
    %cst = arith.constant 0.000000e+00 : bf16
    %18 = vector.broadcast %cst : bf16 to vector<24x1xbf16>
    %19 = vector.extract_strided_slice %17 {offsets = [0, 0], sizes = [24, 15], strides = [1, 1]} : vector<24x16xbf16> to vector<24x15xbf16>
    %20 = tpu.concatenate %18, %19 in 1 : vector<24x1xbf16>, vector<24x15xbf16> -> vector<24x16xbf16>
    %21 = vector.extract_strided_slice %17 {offsets = [0, 1], sizes = [24, 15], strides = [1, 1]} : vector<24x16xbf16> to vector<24x15xbf16>
    %22 = tpu.concatenate %21, %18 in 1 : vector<24x15xbf16>, vector<24x1xbf16> -> vector<24x16xbf16>
    %23 = tpu.concatenate %20, %17, %22 in 0 : vector<24x16xbf16>, vector<24x16xbf16>, vector<24x16xbf16> -> vector<72x16xbf16>
    %cst_27 = arith.constant dense<0.000000e+00> : vector<16x16xf32>
    %24 = tpu.matmul %1, %23, %cst_27 {dimension_numbers = #tpu.dot_dimension_numbers<[1], [0], [0], [1], [0, 0, 1, 1], [], []>} : vector<16x72xbf16>, vector<72x16xbf16>, vector<16x16xf32> -> vector<16x16xf32>
    %25 = vector.broadcast %7 : vector<16x1xf32> to vector<16x16xf32>
    %26 = arith.addf %24, %25 : vector<16x16xf32>
    %cst_28 = arith.constant 0.000000e+00 : f32
    %27 = vector.broadcast %cst_28 : f32 to vector<16x16xf32>
    %28 = arith.maximumf %26, %27 : vector<16x16xf32>
    %29 = arith.truncf %28 : vector<16x16xf32> to vector<16x16xbf16>
    %cst_29 = arith.constant 0.000000e+00 : bf16
    %30 = vector.broadcast %cst_29 : bf16 to vector<16x1xbf16>
    %31 = vector.extract_strided_slice %29 {offsets = [0, 0], sizes = [16, 15], strides = [1, 1]} : vector<16x16xbf16> to vector<16x15xbf16>
    %32 = tpu.concatenate %30, %31 in 1 : vector<16x1xbf16>, vector<16x15xbf16> -> vector<16x16xbf16>
    %33 = vector.extract_strided_slice %29 {offsets = [0, 1], sizes = [16, 15], strides = [1, 1]} : vector<16x16xbf16> to vector<16x15xbf16>
    %34 = tpu.concatenate %33, %30 in 1 : vector<16x15xbf16>, vector<16x1xbf16> -> vector<16x16xbf16>
    %35 = tpu.concatenate %32, %29, %34 in 0 : vector<16x16xbf16>, vector<16x16xbf16>, vector<16x16xbf16> -> vector<48x16xbf16>
    %cst_30 = arith.constant dense<0.000000e+00> : vector<16x16xf32>
    %36 = tpu.matmul %3, %35, %cst_30 {dimension_numbers = #tpu.dot_dimension_numbers<[1], [0], [0], [1], [0, 0, 1, 1], [], []>} : vector<16x48xbf16>, vector<48x16xbf16>, vector<16x16xf32> -> vector<16x16xf32>
    %37 = vector.broadcast %9 : vector<16x1xf32> to vector<16x16xf32>
    %38 = arith.addf %36, %37 : vector<16x16xf32>
    %cst_31 = arith.constant 0.000000e+00 : f32
    %39 = vector.broadcast %cst_31 : f32 to vector<16x16xf32>
    %40 = arith.maximumf %38, %39 : vector<16x16xf32>
    %cst_32 = arith.constant dense<0.000000e+00> : vector<16x16xf32>
    %41 = tpu.matmul %13, %17, %cst_32 {dimension_numbers = #tpu.dot_dimension_numbers<[1], [0], [0], [1], [0, 0, 1, 1], [], []>} : vector<16x24xbf16>, vector<24x16xbf16>, vector<16x16xf32> -> vector<16x16xf32>
    %42 = vector.broadcast %15 : vector<16x1xf32> to vector<16x16xf32>
    %43 = arith.addf %41, %42 : vector<16x16xf32>
    %44 = arith.truncf %40 : vector<16x16xf32> to vector<16x16xbf16>
    %cst_33 = arith.constant 0.000000e+00 : bf16
    %45 = vector.broadcast %cst_33 : bf16 to vector<16x1xbf16>
    %46 = vector.extract_strided_slice %44 {offsets = [0, 0], sizes = [16, 15], strides = [1, 1]} : vector<16x16xbf16> to vector<16x15xbf16>
    %47 = tpu.concatenate %45, %46 in 1 : vector<16x1xbf16>, vector<16x15xbf16> -> vector<16x16xbf16>
    %48 = vector.extract_strided_slice %44 {offsets = [0, 1], sizes = [16, 15], strides = [1, 1]} : vector<16x16xbf16> to vector<16x15xbf16>
    %49 = tpu.concatenate %48, %45 in 1 : vector<16x15xbf16>, vector<16x1xbf16> -> vector<16x16xbf16>
    %50 = tpu.concatenate %47, %44, %49 in 0 : vector<16x16xbf16>, vector<16x16xbf16>, vector<16x16xbf16> -> vector<48x16xbf16>
    %cst_34 = arith.constant dense<0.000000e+00> : vector<16x16xf32>
    %51 = tpu.matmul %5, %50, %cst_34 {dimension_numbers = #tpu.dot_dimension_numbers<[1], [0], [0], [1], [0, 0, 1, 1], [], []>} : vector<16x48xbf16>, vector<48x16xbf16>, vector<16x16xf32> -> vector<16x16xf32>
    %52 = vector.broadcast %11 : vector<16x1xf32> to vector<16x16xf32>
    %53 = arith.addf %51, %52 : vector<16x16xf32>
    %54 = arith.addf %53, %43 : vector<16x16xf32>
    %cst_35 = arith.constant 0.000000e+00 : f32
    %55 = vector.broadcast %cst_35 : f32 to vector<16x16xf32>
    %56 = arith.maximumf %54, %55 : vector<16x16xf32>
    %57 = arith.truncf %56 : vector<16x16xf32> to vector<16x16xbf16>
    %c0_36 = arith.constant 0 : index
    %c0_37 = arith.constant 0 : index
    %c0_38 = arith.constant 0 : index
    %c0_39 = arith.constant 0 : index
    %58 = vector.load %arg11[%c0_36, %c0_37, %c0_38, %c0_39] : memref<1x1x16x16xbf16, #tpu.memory_space<vmem>>, vector<1x1x16x16xbf16>
    %59 = vector.shape_cast %58 : vector<1x1x16x16xbf16> to vector<16x16xbf16>
    %60 = vector.shape_cast %57 : vector<16x16xbf16> to vector<1x1x16x16xbf16>
    tpu.vector_store %arg11[%c0_36, %c0_37, %c0_38, %c0_39], %60 {strides = array<i32>} : memref<1x1x16x16xbf16, #tpu.memory_space<vmem>>, vector<1x1x16x16xbf16>,
    return
  }
  func.func @transform_0(%arg0: i32, %arg1: i32) -> (i32, i32, i32, i32) {
    %c0_i32 = arith.constant 0 : i32
    %c0_i32_0 = arith.constant 0 : i32
    %c0_i32_1 = arith.constant 0 : i32
    return %arg0, %arg1, %c0_i32, %c0_i32_0 : i32, i32, i32, i32
  }
  func.func @transform_1(%arg0: i32, %arg1: i32) -> (i32, i32, i32) {
    %c0_i32 = arith.constant 0 : i32
    %c0_i32_0 = arith.constant 0 : i32
    %c0_i32_1 = arith.constant 0 : i32
    return %arg0, %c0_i32, %c0_i32_0 : i32, i32, i32
  }
  func.func @transform_2(%arg0: i32, %arg1: i32) -> (i32, i32, i32) {
    %c0_i32 = arith.constant 0 : i32
    %c0_i32_0 = arith.constant 0 : i32
    %c0_i32_1 = arith.constant 0 : i32
    return %arg0, %c0_i32, %c0_i32_0 : i32, i32, i32
  }
  func.func @transform_3(%arg0: i32, %arg1: i32) -> (i32, i32, i32) {
    %c0_i32 = arith.constant 0 : i32
    %c0_i32_0 = arith.constant 0 : i32
    %c0_i32_1 = arith.constant 0 : i32
    return %arg0, %c0_i32, %c0_i32_0 : i32, i32, i32
  }
  func.func @transform_4(%arg0: i32, %arg1: i32) -> (i32, i32, i32) {
    %c0_i32 = arith.constant 0 : i32
    %c0_i32_0 = arith.constant 0 : i32
    %c0_i32_1 = arith.constant 0 : i32
    return %arg0, %c0_i32, %c0_i32_0 : i32, i32, i32
  }
  func.func @transform_5(%arg0: i32, %arg1: i32) -> (i32, i32, i32) {
    %c0_i32 = arith.constant 0 : i32
    %c0_i32_0 = arith.constant 0 : i32
    %c0_i32_1 = arith.constant 0 : i32
    return %arg0, %c0_i32, %c0_i32_0 : i32, i32, i32
  }
  func.func @transform_6(%arg0: i32, %arg1: i32) -> (i32, i32, i32) {
    %c0_i32 = arith.constant 0 : i32
    %c0_i32_0 = arith.constant 0 : i32
    %c0_i32_1 = arith.constant 0 : i32
    return %arg0, %c0_i32, %c0_i32_0 : i32, i32, i32
  }
  func.func @transform_7(%arg0: i32, %arg1: i32) -> (i32, i32, i32) {
    %c0_i32 = arith.constant 0 : i32
    %c0_i32_0 = arith.constant 0 : i32
    %c0_i32_1 = arith.constant 0 : i32
    return %arg0, %c0_i32, %c0_i32_0 : i32, i32, i32
  }
  func.func @transform_8(%arg0: i32, %arg1: i32) -> (i32, i32, i32) {
    %c0_i32 = arith.constant 0 : i32
    %c0_i32_0 = arith.constant 0 : i32
    %c0_i32_1 = arith.constant 0 : i32
    return %arg0, %c0_i32, %c0_i32_0 : i32, i32, i32
  }
  func.func @transform_9(%arg0: i32, %arg1: i32) -> (i32, i32, i32, i32) {
    %c0_i32 = arith.constant 0 : i32
    %c0_i32_0 = arith.constant 0 : i32
    %c0_i32_1 = arith.constant 0 : i32
    return %arg0, %arg1, %c0_i32, %c0_i32_0 : i32, i32, i32, i32
  }
}

module attributes {stable_mosaic.version = 11 : i64} {
  func.func @_resblock_merge_kernel(%arg0: i32, %arg1: memref<2x1x16x16xbf16, #tpu.memory_space<vmem>>, %arg2: memref<16x96xbf16, #tpu.memory_space<vmem>>, %arg3: memref<16x1xf32, #tpu.memory_space<vmem>>, %arg4: memref<16x48xbf16, #tpu.memory_space<vmem>>, %arg5: memref<16x1xf32, #tpu.memory_space<vmem>>, %arg6: memref<16x48xbf16, #tpu.memory_space<vmem>>, %arg7: memref<16x1xf32, #tpu.memory_space<vmem>>, %arg8: memref<16x32xbf16, #tpu.memory_space<vmem>>, %arg9: memref<16x1xf32, #tpu.memory_space<vmem>>, %arg10: memref<1x16x16xbf16, #tpu.memory_space<vmem>>) attributes {dimension_semantics = [#tpu.dimension_semantics<parallel>], iteration_bounds = array<i64: 2>, scalar_prefetch = 0 : i64, scratch_operands = 0 : i64, tpu.core_type = #tpu.core_type<tc>, window_params = [{transform_indices = @transform_0, window_bounds = array<i64: 2, 1, 16, 16>}, {pipeline_mode = #tpu.pipeline_mode<synchronous>, transform_indices = @transform_1, window_bounds = array<i64: 16, 96>}, {pipeline_mode = #tpu.pipeline_mode<synchronous>, transform_indices = @transform_2, window_bounds = array<i64: 16, 1>}, {pipeline_mode = #tpu.pipeline_mode<synchronous>, transform_indices = @transform_3, window_bounds = array<i64: 16, 48>}, {pipeline_mode = #tpu.pipeline_mode<synchronous>, transform_indices = @transform_4, window_bounds = array<i64: 16, 1>}, {pipeline_mode = #tpu.pipeline_mode<synchronous>, transform_indices = @transform_5, window_bounds = array<i64: 16, 48>}, {pipeline_mode = #tpu.pipeline_mode<synchronous>, transform_indices = @transform_6, window_bounds = array<i64: 16, 1>}, {pipeline_mode = #tpu.pipeline_mode<synchronous>, transform_indices = @transform_7, window_bounds = array<i64: 16, 32>}, {pipeline_mode = #tpu.pipeline_mode<synchronous>, transform_indices = @transform_8, window_bounds = array<i64: 16, 1>}, {transform_indices = @transform_9, window_bounds = array<i64: 1, 16, 16>}]} {
    %c0 = arith.constant 0 : index
    %c0_0 = arith.constant 0 : index
    %0 = vector.load %arg2[%c0, %c0_0] : memref<16x96xbf16, #tpu.memory_space<vmem>>, vector<16x96xbf16>
    %c0_1 = arith.constant 0 : index
    %c0_2 = arith.constant 0 : index
    %1 = vector.load %arg4[%c0_1, %c0_2] : memref<16x48xbf16, #tpu.memory_space<vmem>>, vector<16x48xbf16>
    %c0_3 = arith.constant 0 : index
    %c0_4 = arith.constant 0 : index
    %2 = vector.load %arg6[%c0_3, %c0_4] : memref<16x48xbf16, #tpu.memory_space<vmem>>, vector<16x48xbf16>
    %c0_5 = arith.constant 0 : index
    %c0_6 = arith.constant 0 : index
    %3 = vector.load %arg3[%c0_5, %c0_6] : memref<16x1xf32, #tpu.memory_space<vmem>>, vector<16x1xf32>
    %c0_7 = arith.constant 0 : index
    %c0_8 = arith.constant 0 : index
    %4 = vector.load %arg5[%c0_7, %c0_8] : memref<16x1xf32, #tpu.memory_space<vmem>>, vector<16x1xf32>
    %c0_9 = arith.constant 0 : index
    %c0_10 = arith.constant 0 : index
    %5 = vector.load %arg7[%c0_9, %c0_10] : memref<16x1xf32, #tpu.memory_space<vmem>>, vector<16x1xf32>
    %c0_11 = arith.constant 0 : index
    %c0_12 = arith.constant 0 : index
    %6 = vector.load %arg8[%c0_11, %c0_12] : memref<16x32xbf16, #tpu.memory_space<vmem>>, vector<16x32xbf16>
    %c0_13 = arith.constant 0 : index
    %c0_14 = arith.constant 0 : index
    %7 = vector.load %arg9[%c0_13, %c0_14] : memref<16x1xf32, #tpu.memory_space<vmem>>, vector<16x1xf32>
    %c0_15 = arith.constant 0 : index
    %c0_16 = arith.constant 0 : index
    %c0_17 = arith.constant 0 : index
    %c0_18 = arith.constant 0 : index
    %8 = vector.load %arg1[%c0_15, %c0_16, %c0_17, %c0_18] : memref<2x1x16x16xbf16, #tpu.memory_space<vmem>>, vector<1x1x16x16xbf16>
    %9 = vector.shape_cast %8 : vector<1x1x16x16xbf16> to vector<16x16xbf16>
    %c1 = arith.constant 1 : index
    %c0_19 = arith.constant 0 : index
    %c0_20 = arith.constant 0 : index
    %c0_21 = arith.constant 0 : index
    %10 = vector.load %arg1[%c1, %c0_19, %c0_20, %c0_21] : memref<2x1x16x16xbf16, #tpu.memory_space<vmem>>, vector<1x1x16x16xbf16>
    %11 = vector.shape_cast %10 : vector<1x1x16x16xbf16> to vector<16x16xbf16>
    %12 = tpu.concatenate %9, %11 in 0 : vector<16x16xbf16>, vector<16x16xbf16> -> vector<32x16xbf16>
    %cst = arith.constant 0.000000e+00 : bf16
    %13 = vector.broadcast %cst : bf16 to vector<32x1xbf16>
    %14 = vector.extract_strided_slice %12 {offsets = [0, 0], sizes = [32, 15], strides = [1, 1]} : vector<32x16xbf16> to vector<32x15xbf16>
    %15 = tpu.concatenate %13, %14 in 1 : vector<32x1xbf16>, vector<32x15xbf16> -> vector<32x16xbf16>
    %16 = vector.extract_strided_slice %12 {offsets = [0, 1], sizes = [32, 15], strides = [1, 1]} : vector<32x16xbf16> to vector<32x15xbf16>
    %17 = tpu.concatenate %16, %13 in 1 : vector<32x15xbf16>, vector<32x1xbf16> -> vector<32x16xbf16>
    %18 = tpu.concatenate %15, %12, %17 in 0 : vector<32x16xbf16>, vector<32x16xbf16>, vector<32x16xbf16> -> vector<96x16xbf16>
    %cst_22 = arith.constant dense<0.000000e+00> : vector<16x16xf32>
    %19 = tpu.matmul %0, %18, %cst_22 {dimension_numbers = #tpu.dot_dimension_numbers<[1], [0], [0], [1], [0, 0, 1, 1], [], []>} : vector<16x96xbf16>, vector<96x16xbf16>, vector<16x16xf32> -> vector<16x16xf32>
    %20 = vector.broadcast %3 : vector<16x1xf32> to vector<16x16xf32>
    %21 = arith.addf %19, %20 : vector<16x16xf32>
    %cst_23 = arith.constant 0.000000e+00 : f32
    %22 = vector.broadcast %cst_23 : f32 to vector<16x16xf32>
    %23 = arith.maximumf %21, %22 : vector<16x16xf32>
    %24 = arith.truncf %23 : vector<16x16xf32> to vector<16x16xbf16>
    %cst_24 = arith.constant 0.000000e+00 : bf16
    %25 = vector.broadcast %cst_24 : bf16 to vector<16x1xbf16>
    %26 = vector.extract_strided_slice %24 {offsets = [0, 0], sizes = [16, 15], strides = [1, 1]} : vector<16x16xbf16> to vector<16x15xbf16>
    %27 = tpu.concatenate %25, %26 in 1 : vector<16x1xbf16>, vector<16x15xbf16> -> vector<16x16xbf16>
    %28 = vector.extract_strided_slice %24 {offsets = [0, 1], sizes = [16, 15], strides = [1, 1]} : vector<16x16xbf16> to vector<16x15xbf16>
    %29 = tpu.concatenate %28, %25 in 1 : vector<16x15xbf16>, vector<16x1xbf16> -> vector<16x16xbf16>
    %30 = tpu.concatenate %27, %24, %29 in 0 : vector<16x16xbf16>, vector<16x16xbf16>, vector<16x16xbf16> -> vector<48x16xbf16>
    %cst_25 = arith.constant dense<0.000000e+00> : vector<16x16xf32>
    %31 = tpu.matmul %1, %30, %cst_25 {dimension_numbers = #tpu.dot_dimension_numbers<[1], [0], [0], [1], [0, 0, 1, 1], [], []>} : vector<16x48xbf16>, vector<48x16xbf16>, vector<16x16xf32> -> vector<16x16xf32>
    %32 = vector.broadcast %4 : vector<16x1xf32> to vector<16x16xf32>
    %33 = arith.addf %31, %32 : vector<16x16xf32>
    %cst_26 = arith.constant 0.000000e+00 : f32
    %34 = vector.broadcast %cst_26 : f32 to vector<16x16xf32>
    %35 = arith.maximumf %33, %34 : vector<16x16xf32>
    %cst_27 = arith.constant dense<0.000000e+00> : vector<16x16xf32>
    %36 = tpu.matmul %6, %12, %cst_27 {dimension_numbers = #tpu.dot_dimension_numbers<[1], [0], [0], [1], [0, 0, 1, 1], [], []>} : vector<16x32xbf16>, vector<32x16xbf16>, vector<16x16xf32> -> vector<16x16xf32>
    %37 = vector.broadcast %7 : vector<16x1xf32> to vector<16x16xf32>
    %38 = arith.addf %36, %37 : vector<16x16xf32>
    %39 = arith.truncf %35 : vector<16x16xf32> to vector<16x16xbf16>
    %cst_28 = arith.constant 0.000000e+00 : bf16
    %40 = vector.broadcast %cst_28 : bf16 to vector<16x1xbf16>
    %41 = vector.extract_strided_slice %39 {offsets = [0, 0], sizes = [16, 15], strides = [1, 1]} : vector<16x16xbf16> to vector<16x15xbf16>
    %42 = tpu.concatenate %40, %41 in 1 : vector<16x1xbf16>, vector<16x15xbf16> -> vector<16x16xbf16>
    %43 = vector.extract_strided_slice %39 {offsets = [0, 1], sizes = [16, 15], strides = [1, 1]} : vector<16x16xbf16> to vector<16x15xbf16>
    %44 = tpu.concatenate %43, %40 in 1 : vector<16x15xbf16>, vector<16x1xbf16> -> vector<16x16xbf16>
    %45 = tpu.concatenate %42, %39, %44 in 0 : vector<16x16xbf16>, vector<16x16xbf16>, vector<16x16xbf16> -> vector<48x16xbf16>
    %cst_29 = arith.constant dense<0.000000e+00> : vector<16x16xf32>
    %46 = tpu.matmul %2, %45, %cst_29 {dimension_numbers = #tpu.dot_dimension_numbers<[1], [0], [0], [1], [0, 0, 1, 1], [], []>} : vector<16x48xbf16>, vector<48x16xbf16>, vector<16x16xf32> -> vector<16x16xf32>
    %47 = vector.broadcast %5 : vector<16x1xf32> to vector<16x16xf32>
    %48 = arith.addf %46, %47 : vector<16x16xf32>
    %49 = arith.addf %48, %38 : vector<16x16xf32>
    %cst_30 = arith.constant 0.000000e+00 : f32
    %50 = vector.broadcast %cst_30 : f32 to vector<16x16xf32>
    %51 = arith.maximumf %49, %50 : vector<16x16xf32>
    %52 = arith.truncf %51 : vector<16x16xf32> to vector<16x16xbf16>
    %c0_31 = arith.constant 0 : index
    %c0_32 = arith.constant 0 : index
    %c0_33 = arith.constant 0 : index
    %53 = vector.load %arg10[%c0_31, %c0_32, %c0_33] : memref<1x16x16xbf16, #tpu.memory_space<vmem>>, vector<1x16x16xbf16>
    %54 = vector.shape_cast %53 : vector<1x16x16xbf16> to vector<16x16xbf16>
    %55 = vector.shape_cast %52 : vector<16x16xbf16> to vector<1x16x16xbf16>
    tpu.vector_store %arg10[%c0_31, %c0_32, %c0_33], %55 {strides = array<i32>} : memref<1x16x16xbf16, #tpu.memory_space<vmem>>, vector<1x16x16xbf16>,
    return
  }
  func.func @transform_0(%arg0: i32) -> (i32, i32, i32, i32) {
    %c0_i32 = arith.constant 0 : i32
    %c0_i32_0 = arith.constant 0 : i32
    %c0_i32_1 = arith.constant 0 : i32
    %c0_i32_2 = arith.constant 0 : i32
    return %c0_i32, %arg0, %c0_i32_0, %c0_i32_1 : i32, i32, i32, i32
  }
  func.func @transform_1(%arg0: i32) -> (i32, i32) {
    %c0_i32 = arith.constant 0 : i32
    %c0_i32_0 = arith.constant 0 : i32
    %c0_i32_1 = arith.constant 0 : i32
    return %c0_i32, %c0_i32_0 : i32, i32
  }
  func.func @transform_2(%arg0: i32) -> (i32, i32) {
    %c0_i32 = arith.constant 0 : i32
    %c0_i32_0 = arith.constant 0 : i32
    %c0_i32_1 = arith.constant 0 : i32
    return %c0_i32, %c0_i32_0 : i32, i32
  }
  func.func @transform_3(%arg0: i32) -> (i32, i32) {
    %c0_i32 = arith.constant 0 : i32
    %c0_i32_0 = arith.constant 0 : i32
    %c0_i32_1 = arith.constant 0 : i32
    return %c0_i32, %c0_i32_0 : i32, i32
  }
  func.func @transform_4(%arg0: i32) -> (i32, i32) {
    %c0_i32 = arith.constant 0 : i32
    %c0_i32_0 = arith.constant 0 : i32
    %c0_i32_1 = arith.constant 0 : i32
    return %c0_i32, %c0_i32_0 : i32, i32
  }
  func.func @transform_5(%arg0: i32) -> (i32, i32) {
    %c0_i32 = arith.constant 0 : i32
    %c0_i32_0 = arith.constant 0 : i32
    %c0_i32_1 = arith.constant 0 : i32
    return %c0_i32, %c0_i32_0 : i32, i32
  }
  func.func @transform_6(%arg0: i32) -> (i32, i32) {
    %c0_i32 = arith.constant 0 : i32
    %c0_i32_0 = arith.constant 0 : i32
    %c0_i32_1 = arith.constant 0 : i32
    return %c0_i32, %c0_i32_0 : i32, i32
  }
  func.func @transform_7(%arg0: i32) -> (i32, i32) {
    %c0_i32 = arith.constant 0 : i32
    %c0_i32_0 = arith.constant 0 : i32
    %c0_i32_1 = arith.constant 0 : i32
    return %c0_i32, %c0_i32_0 : i32, i32
  }
  func.func @transform_8(%arg0: i32) -> (i32, i32) {
    %c0_i32 = arith.constant 0 : i32
    %c0_i32_0 = arith.constant 0 : i32
    %c0_i32_1 = arith.constant 0 : i32
    return %c0_i32, %c0_i32_0 : i32, i32
  }
  func.func @transform_9(%arg0: i32) -> (i32, i32, i32) {
    %c0_i32 = arith.constant 0 : i32
    %c0_i32_0 = arith.constant 0 : i32
    %c0_i32_1 = arith.constant 0 : i32
    return %arg0, %c0_i32, %c0_i32_0 : i32, i32, i32
  }
}

module attributes {stable_mosaic.version = 11 : i64} {
  func.func @_linear_kernel(%arg0: i32, %arg1: i32, %arg2: memref<2x256xbf16, #tpu.memory_space<vmem>>, %arg3: memref<256x128xbf16, #tpu.memory_space<vmem>>, %arg4: memref<1x128xf32, #tpu.memory_space<vmem>>, %arg5: memref<2x128xf32, #tpu.memory_space<vmem>>, %arg6: memref<2x128xf32, #tpu.memory_space<vmem>>) attributes {dimension_semantics = [#tpu.dimension_semantics<parallel>, #tpu.dimension_semantics<arbitrary>], iteration_bounds = array<i64: 1, 1>, scalar_prefetch = 0 : i64, scratch_operands = 1 : i64, tpu.core_type = #tpu.core_type<tc>, window_params = [{transform_indices = @transform_0, window_bounds = array<i64: 2, 256>}, {transform_indices = @transform_1, window_bounds = array<i64: 256, 128>}, {transform_indices = @transform_2, window_bounds = array<i64: 1, 128>}, {transform_indices = @transform_3, window_bounds = array<i64: 2, 128>}]} {
    %c0_i32 = arith.constant 0 : i32
    %0 = arith.cmpi eq, %arg1, %c0_i32 : i32
    %1 = arith.extui %0 : i1 to i32
    %c0_i32_0 = arith.constant 0 : i32
    %2 = arith.cmpi ne, %1, %c0_i32_0 : i32
    scf.if %2 {
      %cst_10 = arith.constant 0.000000e+00 : f32
      %12 = vector.broadcast %cst_10 : f32 to vector<2x128xf32>
      %c0_11 = arith.constant 0 : index
      %c0_12 = arith.constant 0 : index
      %13 = vector.load %arg6[%c0_11, %c0_12] : memref<2x128xf32, #tpu.memory_space<vmem>>, vector<2x128xf32>
      tpu.vector_store %arg6[%c0_11, %c0_12], %12 {strides = array<i32>} : memref<2x128xf32, #tpu.memory_space<vmem>>, vector<2x128xf32>,
    } else {
    }
    %c0 = arith.constant 0 : index
    %c0_1 = arith.constant 0 : index
    %3 = vector.load %arg6[%c0, %c0_1] : memref<2x128xf32, #tpu.memory_space<vmem>>, vector<2x128xf32>
    %c0_2 = arith.constant 0 : index
    %c0_3 = arith.constant 0 : index
    %4 = vector.load %arg2[%c0_2, %c0_3] : memref<2x256xbf16, #tpu.memory_space<vmem>>, vector<2x256xbf16>
    %c0_4 = arith.constant 0 : index
    %c0_5 = arith.constant 0 : index
    %5 = vector.load %arg3[%c0_4, %c0_5] : memref<256x128xbf16, #tpu.memory_space<vmem>>, vector<256x128xbf16>
    %cst = arith.constant dense<0.000000e+00> : vector<2x128xf32>
    %6 = tpu.matmul %4, %5, %cst {dimension_numbers = #tpu.dot_dimension_numbers<[1], [0], [0], [1], [0, 0, 1, 1], [], []>} : vector<2x256xbf16>, vector<256x128xbf16>, vector<2x128xf32> -> vector<2x128xf32>
    %7 = arith.addf %3, %6 : vector<2x128xf32>
    %c0_6 = arith.constant 0 : index
    %c0_7 = arith.constant 0 : index
    %8 = vector.load %arg6[%c0_6, %c0_7] : memref<2x128xf32, #tpu.memory_space<vmem>>, vector<2x128xf32>
    tpu.vector_store %arg6[%c0_6, %c0_7], %7 {strides = array<i32>} : memref<2x128xf32, #tpu.memory_space<vmem>>, vector<2x128xf32>,
    %c0_i32_8 = arith.constant 0 : i32
    %9 = arith.cmpi eq, %arg1, %c0_i32_8 : i32
    %10 = arith.extui %9 : i1 to i32
    %c0_i32_9 = arith.constant 0 : i32
    %11 = arith.cmpi ne, %10, %c0_i32_9 : i32
    scf.if %11 {
      %c0_10 = arith.constant 0 : index
      %c0_11 = arith.constant 0 : index
      %12 = vector.load %arg6[%c0_10, %c0_11] : memref<2x128xf32, #tpu.memory_space<vmem>>, vector<2x128xf32>
      %c0_12 = arith.constant 0 : index
      %c0_13 = arith.constant 0 : index
      %13 = vector.load %arg4[%c0_12, %c0_13] : memref<1x128xf32, #tpu.memory_space<vmem>>, vector<1x128xf32>
      %14 = vector.broadcast %13 : vector<1x128xf32> to vector<2x128xf32>
      %15 = arith.addf %12, %14 : vector<2x128xf32>
      %cst_14 = arith.constant 0.000000e+00 : f32
      %16 = vector.broadcast %cst_14 : f32 to vector<2x128xf32>
      %17 = arith.maximumf %15, %16 : vector<2x128xf32>
      %c0_15 = arith.constant 0 : index
      %c0_16 = arith.constant 0 : index
      %18 = vector.load %arg5[%c0_15, %c0_16] : memref<2x128xf32, #tpu.memory_space<vmem>>, vector<2x128xf32>
      tpu.vector_store %arg5[%c0_15, %c0_16], %17 {strides = array<i32>} : memref<2x128xf32, #tpu.memory_space<vmem>>, vector<2x128xf32>,
    } else {
    }
    return
  }
  func.func @transform_0(%arg0: i32, %arg1: i32) -> (i32, i32) {
    %c0_i32 = arith.constant 0 : i32
    %c0_i32_0 = arith.constant 0 : i32
    return %c0_i32, %arg1 : i32, i32
  }
  func.func @transform_1(%arg0: i32, %arg1: i32) -> (i32, i32) {
    %c0_i32 = arith.constant 0 : i32
    return %arg1, %arg0 : i32, i32
  }
  func.func @transform_2(%arg0: i32, %arg1: i32) -> (i32, i32) {
    %c0_i32 = arith.constant 0 : i32
    %c0_i32_0 = arith.constant 0 : i32
    return %c0_i32, %arg0 : i32, i32
  }
  func.func @transform_3(%arg0: i32, %arg1: i32) -> (i32, i32) {
    %c0_i32 = arith.constant 0 : i32
    %c0_i32_0 = arith.constant 0 : i32
    return %c0_i32, %arg0 : i32, i32
  }
}

module attributes {stable_mosaic.version = 11 : i64} {
  func.func @_linear_kernel(%arg0: i32, %arg1: i32, %arg2: memref<2x128xbf16, #tpu.memory_space<vmem>>, %arg3: memref<128x128xbf16, #tpu.memory_space<vmem>>, %arg4: memref<1x128xf32, #tpu.memory_space<vmem>>, %arg5: memref<2x128xf32, #tpu.memory_space<vmem>>, %arg6: memref<2x128xf32, #tpu.memory_space<vmem>>) attributes {dimension_semantics = [#tpu.dimension_semantics<parallel>, #tpu.dimension_semantics<arbitrary>], iteration_bounds = array<i64: 1, 1>, scalar_prefetch = 0 : i64, scratch_operands = 1 : i64, tpu.core_type = #tpu.core_type<tc>, window_params = [{transform_indices = @transform_0, window_bounds = array<i64: 2, 128>}, {transform_indices = @transform_1, window_bounds = array<i64: 128, 128>}, {transform_indices = @transform_2, window_bounds = array<i64: 1, 128>}, {transform_indices = @transform_3, window_bounds = array<i64: 2, 128>}]} {
    %c0_i32 = arith.constant 0 : i32
    %0 = arith.cmpi eq, %arg1, %c0_i32 : i32
    %1 = arith.extui %0 : i1 to i32
    %c0_i32_0 = arith.constant 0 : i32
    %2 = arith.cmpi ne, %1, %c0_i32_0 : i32
    scf.if %2 {
      %cst_10 = arith.constant 0.000000e+00 : f32
      %12 = vector.broadcast %cst_10 : f32 to vector<2x128xf32>
      %c0_11 = arith.constant 0 : index
      %c0_12 = arith.constant 0 : index
      %13 = vector.load %arg6[%c0_11, %c0_12] : memref<2x128xf32, #tpu.memory_space<vmem>>, vector<2x128xf32>
      tpu.vector_store %arg6[%c0_11, %c0_12], %12 {strides = array<i32>} : memref<2x128xf32, #tpu.memory_space<vmem>>, vector<2x128xf32>,
    } else {
    }
    %c0 = arith.constant 0 : index
    %c0_1 = arith.constant 0 : index
    %3 = vector.load %arg6[%c0, %c0_1] : memref<2x128xf32, #tpu.memory_space<vmem>>, vector<2x128xf32>
    %c0_2 = arith.constant 0 : index
    %c0_3 = arith.constant 0 : index
    %4 = vector.load %arg2[%c0_2, %c0_3] : memref<2x128xbf16, #tpu.memory_space<vmem>>, vector<2x128xbf16>
    %c0_4 = arith.constant 0 : index
    %c0_5 = arith.constant 0 : index
    %5 = vector.load %arg3[%c0_4, %c0_5] : memref<128x128xbf16, #tpu.memory_space<vmem>>, vector<128x128xbf16>
    %cst = arith.constant dense<0.000000e+00> : vector<2x128xf32>
    %6 = tpu.matmul %4, %5, %cst {dimension_numbers = #tpu.dot_dimension_numbers<[1], [0], [0], [1], [0, 0, 1, 1], [], []>} : vector<2x128xbf16>, vector<128x128xbf16>, vector<2x128xf32> -> vector<2x128xf32>
    %7 = arith.addf %3, %6 : vector<2x128xf32>
    %c0_6 = arith.constant 0 : index
    %c0_7 = arith.constant 0 : index
    %8 = vector.load %arg6[%c0_6, %c0_7] : memref<2x128xf32, #tpu.memory_space<vmem>>, vector<2x128xf32>
    tpu.vector_store %arg6[%c0_6, %c0_7], %7 {strides = array<i32>} : memref<2x128xf32, #tpu.memory_space<vmem>>, vector<2x128xf32>,
    %c0_i32_8 = arith.constant 0 : i32
    %9 = arith.cmpi eq, %arg1, %c0_i32_8 : i32
    %10 = arith.extui %9 : i1 to i32
    %c0_i32_9 = arith.constant 0 : i32
    %11 = arith.cmpi ne, %10, %c0_i32_9 : i32
    scf.if %11 {
      %c0_10 = arith.constant 0 : index
      %c0_11 = arith.constant 0 : index
      %12 = vector.load %arg6[%c0_10, %c0_11] : memref<2x128xf32, #tpu.memory_space<vmem>>, vector<2x128xf32>
      %c0_12 = arith.constant 0 : index
      %c0_13 = arith.constant 0 : index
      %13 = vector.load %arg4[%c0_12, %c0_13] : memref<1x128xf32, #tpu.memory_space<vmem>>, vector<1x128xf32>
      %14 = vector.broadcast %13 : vector<1x128xf32> to vector<2x128xf32>
      %15 = arith.addf %12, %14 : vector<2x128xf32>
      %cst_14 = arith.constant 0.000000e+00 : f32
      %16 = vector.broadcast %cst_14 : f32 to vector<2x128xf32>
      %17 = arith.maximumf %15, %16 : vector<2x128xf32>
      %c0_15 = arith.constant 0 : index
      %c0_16 = arith.constant 0 : index
      %18 = vector.load %arg5[%c0_15, %c0_16] : memref<2x128xf32, #tpu.memory_space<vmem>>, vector<2x128xf32>
      tpu.vector_store %arg5[%c0_15, %c0_16], %17 {strides = array<i32>} : memref<2x128xf32, #tpu.memory_space<vmem>>, vector<2x128xf32>,
    } else {
    }
    return
  }
  func.func @transform_0(%arg0: i32, %arg1: i32) -> (i32, i32) {
    %c0_i32 = arith.constant 0 : i32
    %c0_i32_0 = arith.constant 0 : i32
    return %c0_i32, %arg1 : i32, i32
  }
  func.func @transform_1(%arg0: i32, %arg1: i32) -> (i32, i32) {
    %c0_i32 = arith.constant 0 : i32
    return %arg1, %arg0 : i32, i32
  }
  func.func @transform_2(%arg0: i32, %arg1: i32) -> (i32, i32) {
    %c0_i32 = arith.constant 0 : i32
    %c0_i32_0 = arith.constant 0 : i32
    return %c0_i32, %arg0 : i32, i32
  }
  func.func @transform_3(%arg0: i32, %arg1: i32) -> (i32, i32) {
    %c0_i32 = arith.constant 0 : i32
    %c0_i32_0 = arith.constant 0 : i32
    return %c0_i32, %arg0 : i32, i32
  }
}

module attributes {stable_mosaic.version = 11 : i64} {
  func.func @_linear_kernel(%arg0: i32, %arg1: i32, %arg2: memref<2x128xbf16, #tpu.memory_space<vmem>>, %arg3: memref<128x128xbf16, #tpu.memory_space<vmem>>, %arg4: memref<1x128xf32, #tpu.memory_space<vmem>>, %arg5: memref<2x128xf32, #tpu.memory_space<vmem>>, %arg6: memref<2x128xf32, #tpu.memory_space<vmem>>) attributes {dimension_semantics = [#tpu.dimension_semantics<parallel>, #tpu.dimension_semantics<arbitrary>], iteration_bounds = array<i64: 1, 1>, scalar_prefetch = 0 : i64, scratch_operands = 1 : i64, tpu.core_type = #tpu.core_type<tc>, window_params = [{transform_indices = @transform_0, window_bounds = array<i64: 2, 128>}, {transform_indices = @transform_1, window_bounds = array<i64: 128, 128>}, {transform_indices = @transform_2, window_bounds = array<i64: 1, 128>}, {transform_indices = @transform_3, window_bounds = array<i64: 2, 128>}]} {
    %c0_i32 = arith.constant 0 : i32
    %0 = arith.cmpi eq, %arg1, %c0_i32 : i32
    %1 = arith.extui %0 : i1 to i32
    %c0_i32_0 = arith.constant 0 : i32
    %2 = arith.cmpi ne, %1, %c0_i32_0 : i32
    scf.if %2 {
      %cst_10 = arith.constant 0.000000e+00 : f32
      %12 = vector.broadcast %cst_10 : f32 to vector<2x128xf32>
      %c0_11 = arith.constant 0 : index
      %c0_12 = arith.constant 0 : index
      %13 = vector.load %arg6[%c0_11, %c0_12] : memref<2x128xf32, #tpu.memory_space<vmem>>, vector<2x128xf32>
      tpu.vector_store %arg6[%c0_11, %c0_12], %12 {strides = array<i32>} : memref<2x128xf32, #tpu.memory_space<vmem>>, vector<2x128xf32>,
    } else {
    }
    %c0 = arith.constant 0 : index
    %c0_1 = arith.constant 0 : index
    %3 = vector.load %arg6[%c0, %c0_1] : memref<2x128xf32, #tpu.memory_space<vmem>>, vector<2x128xf32>
    %c0_2 = arith.constant 0 : index
    %c0_3 = arith.constant 0 : index
    %4 = vector.load %arg2[%c0_2, %c0_3] : memref<2x128xbf16, #tpu.memory_space<vmem>>, vector<2x128xbf16>
    %c0_4 = arith.constant 0 : index
    %c0_5 = arith.constant 0 : index
    %5 = vector.load %arg3[%c0_4, %c0_5] : memref<128x128xbf16, #tpu.memory_space<vmem>>, vector<128x128xbf16>
    %cst = arith.constant dense<0.000000e+00> : vector<2x128xf32>
    %6 = tpu.matmul %4, %5, %cst {dimension_numbers = #tpu.dot_dimension_numbers<[1], [0], [0], [1], [0, 0, 1, 1], [], []>} : vector<2x128xbf16>, vector<128x128xbf16>, vector<2x128xf32> -> vector<2x128xf32>
    %7 = arith.addf %3, %6 : vector<2x128xf32>
    %c0_6 = arith.constant 0 : index
    %c0_7 = arith.constant 0 : index
    %8 = vector.load %arg6[%c0_6, %c0_7] : memref<2x128xf32, #tpu.memory_space<vmem>>, vector<2x128xf32>
    tpu.vector_store %arg6[%c0_6, %c0_7], %7 {strides = array<i32>} : memref<2x128xf32, #tpu.memory_space<vmem>>, vector<2x128xf32>,
    %c0_i32_8 = arith.constant 0 : i32
    %9 = arith.cmpi eq, %arg1, %c0_i32_8 : i32
    %10 = arith.extui %9 : i1 to i32
    %c0_i32_9 = arith.constant 0 : i32
    %11 = arith.cmpi ne, %10, %c0_i32_9 : i32
    scf.if %11 {
      %c0_10 = arith.constant 0 : index
      %c0_11 = arith.constant 0 : index
      %12 = vector.load %arg6[%c0_10, %c0_11] : memref<2x128xf32, #tpu.memory_space<vmem>>, vector<2x128xf32>
      %c0_12 = arith.constant 0 : index
      %c0_13 = arith.constant 0 : index
      %13 = vector.load %arg4[%c0_12, %c0_13] : memref<1x128xf32, #tpu.memory_space<vmem>>, vector<1x128xf32>
      %14 = vector.broadcast %13 : vector<1x128xf32> to vector<2x128xf32>
      %15 = arith.addf %12, %14 : vector<2x128xf32>
      %c0_14 = arith.constant 0 : index
      %c0_15 = arith.constant 0 : index
      %16 = vector.load %arg5[%c0_14, %c0_15] : memref<2x128xf32, #tpu.memory_space<vmem>>, vector<2x128xf32>
      tpu.vector_store %arg5[%c0_14, %c0_15], %15 {strides = array<i32>} : memref<2x128xf32, #tpu.memory_space<vmem>>, vector<2x128xf32>,
    } else {
    }
    return
  }
  func.func @transform_0(%arg0: i32, %arg1: i32) -> (i32, i32) {
    %c0_i32 = arith.constant 0 : i32
    %c0_i32_0 = arith.constant 0 : i32
    return %c0_i32, %arg1 : i32, i32
  }
  func.func @transform_1(%arg0: i32, %arg1: i32) -> (i32, i32) {
    %c0_i32 = arith.constant 0 : i32
    return %arg1, %arg0 : i32, i32
  }
  func.func @transform_2(%arg0: i32, %arg1: i32) -> (i32, i32) {
    %c0_i32 = arith.constant 0 : i32
    %c0_i32_0 = arith.constant 0 : i32
    return %c0_i32, %arg0 : i32, i32
  }
  func.func @transform_3(%arg0: i32, %arg1: i32) -> (i32, i32) {
    %c0_i32 = arith.constant 0 : i32
    %c0_i32_0 = arith.constant 0 : i32
    return %c0_i32, %arg0 : i32, i32
  }
}

</mosaic_0001>

<bundles_post_ra>
// kernel: model_forward.10
= control target key start
LH: loop header
LB: loop body
LE: loop exit
PB: predicated region body
PF: predicated region fallthrough
CT: control target
= control target key end

     0   :  { %s1284_s30 = smov 0   ;;  %s1286_s10 = smov 0   ;;  %s1422_s0 = inlined_call_operand.vmem [shape: bf16[2,2,8,16], index: 0, kind: input, shape index: {}]   ;;  %s1423_s1 = inlined_call_operand.vmem [shape: bf16[2,16,24], index: 1, kind: input, shape index: {}]   ;;  %s1424_s2 = inlined_call_operand.vmem [shape: f32[2,16,1], index: 2, kind: input, shape index: {}]   ;;  %s1425_s3 = inlined_call_operand.vmem [shape: bf16[2,16,48], index: 3, kind: input, shape index: {}]   ;;  %s1426_s4 = inlined_call_operand.vmem [shape: f32[2,16,1], index: 4, kind: input, shape index: {}]   ;;  %s1427_s5 = inlined_call_operand.vmem [shape: bf16[2,16,48], index: 5, kind: input, shape index: {}]   ;;  %s1428_s6 = inlined_call_operand.vmem [shape: f32[2,16,1], index: 6, kind: input, shape index: {}]   ;;  %s1429_s7 = inlined_call_operand.vmem [shape: bf16[2,16,8], index: 7, kind: input, shape index: {}]   ;;  %s1430_s8 = inlined_call_operand.vmem [shape: f32[2,16,1], index: 8, kind: input, shape index: {}]   ;;  %s1431_s9 = inlined_call_operand.vmem [shape: bf16[2,2,16,16], index: 9, kind: output, shape index: {}]  }
   0x1   :  { %s1288_s11 = smov 0   ;;  %s1290_s12 = smov 0  }
   0x2   :  { %s1292_s13 = smov 0  }
   0x3 LB: > { %s28_s14 = sadd.s32 1, %s1219_s11  ;;  %s31_s15 = sadd.s32 1, %s1223_s12  ;;  %s1227_s13 = sphi %s1292_s13, %s19_s13   ;;  %s1223_s12 = sphi %s1290_s12, %s1437_s12   ;;  %s1219_s11 = sphi %s1288_s11, %s1436_s11   ;;  %s1215_s10 = sphi %s1286_s10, %s1435_s10   ;;  %s1211_s30 = sphi %s1284_s30, %s1434_s30  }
   0x4   : > { %p29_p0 = scmp.ge.s32.totalorder %s28_s14, 2  ;;  %p1041_p1 = scmp.ge.s32.totalorder %s1227_s13, 1 }
   0x5   : > { %p386_p2 = scmp.lt.s32.totalorder %s1227_s13, 5 }
   0x6   : > { %s1439_s14 = smov (%p29_p0, %s28_s14), 0  ;;  %s1441_s15 = smov (!%p29_p0, %s31_s15), %s1223_s12 }
   0x7   : > { %p387_p3 = pnand %p1041_p1, %p386_p2  ;;  %p33_p4 = scmp.ge.s32.totalorder %s1441_s15, 2 }
   0x8   : > { %p469_p5 = scmp.lt.s32.totalorder (!%p387_p3), %s1215_s10, 1  ;;  %p471_p6 = scmp.lt.s32.totalorder (!%p387_p3), %s1211_s30, 1 }
   0x9   : > { %s1443_s15 = smov (%p33_p4, %s1441_s15), 0  ;;  %390 = sbr.rel (%p387_p3) target bundleno = 1012 (0x3f4), region = 56 }
   0xe   : > { %v1229_v0 = vmov 0.0   ;;  %s1445_s10 = smov (!%p469_p5, %s1215_s10), 1  ;;  %s1447_s30 = smov (!%p471_p6, %s1211_s30), 1  ;;  %vm1230_vm0 = vmmov 0   ;;  %v1231_v2 = vmov 0   ;;  %vm555_vm1 = vcmask 121856  }
   0xf   : > { %1103 = vmatprep.subr.bf16.mxu0 %v1229_v0  ;;  %1111 = vmatprep.subr.bf16.mxu1 %v1229_v0  ;;  %s1042_s16 = sshll.u32 %s1445_s10, 1  ;;  %s1322_s17 = sshll.u32 %s1445_s10, 3  ;;  %vm558_vm2 = vcmask 1043456   ;;  %vm549_vm3 = vcmask 7168   ;;  %vm577_vm4 = vcmask 195584   ;;  %vm715_vm5 = vcmask 64512  }
  0x10   : > { %s474_s18 = sadd.s32 %s1042_s16, %s1447_s30  ;;  %1107 = vmatprep.mubr.msk.bf16.mxu0 %vm1230_vm0, %v1229_v0  ;;  %1117 = vmatprep.mubr.msk.bf16.mxu1 %vm1230_vm0, %v1229_v0  ;;  %s481_s22 = scalar_lea.vmem %s1423_s1, %s1322_s17  ;;  %vm1371_vm6 = vmneg %vm549_vm3  ;;  %vm653_vm7 = vcmask 392192   ;;  %vm846_vm8 = vcmask 125952  }
  0x11   : > { %s1043_s19 = sshll.u32 %s474_s18, 2  ;;  %1182 = vset.pattern.permute.xlu1 %v1231_v2  ;;  %s1337_s26 = sshll.u32 %s1445_s10, 4  ;;  %1183 = vset.pattern.permute.xlu0 %v1231_v2  ;;  %v1185_v12 = vld [vmem:[%s481_s22] sm:$0xff]  }
  0x12   : > { %s476_s25 = scalar_lea.vmem %s1422_s0, %s1043_s19  ;;  %s486_s29 = scalar_lea.vmem %s1424_s2, %s1337_s26 }
  0x13   : > { %v543_v1 = vld [vmem:[%s476_s25] sm:$0xf]  ;;  %s1232_s16 = smov 127   ;;  %v534_v5 = vld [vmem:[%s486_s29 + $0x8] sm:$0xff]  ;;  %s1233_s18 = smov 1  }
  0x14   : > { %v1063_v3 = vcombine.low %v543_v1, %v543_v1  ;;  %v533_v4 = vld [vmem:[%s486_s29] sm:$0xff]  ;;  %s491_s21 = scalar_lea.vmem %s1425_s3, %s1322_s17  ;;  %s496_s24 = scalar_lea.vmem %s1426_s4, %s1337_s26  ;;  %v720_v24 = vsel %vm558_vm2, %v543_v1, 0 }
  0x15   : > { %564 = vperm.xlu1 %1182, %v533_v4   ;;  %s511_s28 = scalar_lea.vmem %s1429_s7, %s1322_s17  ;;  %v536_v25 = vld [vmem:[%s496_s24 + $0x8] sm:$0xff]  ;;  %v535_v26 = vld [vmem:[%s496_s24] sm:$0xff]  ;;  %s501_s20 = scalar_lea.vmem %s1427_s5, %s1322_s17 }
  0x16   : > { %553 = vrot.lane.b32.xlu0 %v1063_v3, %s1232_s16  ;;  %v1187_v27 = vld [vmem:[%s511_s28] sm:$0xff]   ;;  %s516_s23 = scalar_lea.vmem %s1430_s8, %s1337_s26  ;;  %s506_s27 = scalar_lea.vmem %s1428_s6, %s1337_s26 }
  0x17   : > { %v1186_v32 = vld [vmem:[%s491_s21] sm:$0xff]   ;;  %v542_v47 = vld [vmem:[%s516_s23 + $0x8] sm:$0xff]  ;;  %s1060_s17 = sshll.u32 %s1447_s30, 1  ;;  %s1061_s26 = sshll.u32 %s1445_s10, 2 }
  0x18   : > { %v541_v48 = vld [vmem:[%s516_s23] sm:$0xff]  ;;  %v538_v50 = vld [vmem:[%s506_s27 + $0x8] sm:$0xff] }
  0x19   : > { %569 = vperm.xlu1 %1182, %v534_v5   ;;  %v537_v51 = vld [vmem:[%s506_s27] sm:$0xff] }
  0x1a   : > { %547 = vrot.lane.b32.xlu0 %v1063_v3, %s1233_s18  ;;  %v1188_v55 = vld [vmem:[%s501_s20] sm:$0xff]  }
  0x88   : > { %v554_v6 = vpop.permute.xlu0 %553 }
  0x89   : > { %v557_v7 = vsel %vm555_vm1, %v554_v6, 0 }
  0x8a   : > { %v581_v8 = vsel %vm558_vm2, %v557_v7, 0 }
  0x8b   : > { %1104 = vmatpush3.bf16.msra.mxu0 %v581_v8 }
  0x8c   : > { %v548_v9 = vpop.permute.xlu0 %547  ;;  %1105 = vmatprep.subr.bf16.mxu0 %v1229_v0 }
  0x8d   : > { %v552_v10 = vsel %vm549_vm3, 0, %v548_v9 }
  0x8e   : > { %v560_v11 = vsel %vm558_vm2, %v552_v10, %v1063_v3 }
  0x8f   : > { %1106 = vmatpush3.bf16.msra.mxu0 %v560_v11 }
  0x90   : > { %1121 = vmatprep.subr.bf16.mxu0 %v1229_v0  ;;  %v565_v13 = vpop.permute.xlu1 %564 }
  0x92   : > { %1108 = vmatmul.mubr.msk.bf16.vlgmr.msra.gmra.mxu0 %vm577_vm4, %v1185_v12 }
  0x93   : > { %1123 = vmatprep.mubr.msk.bf16.mxu0 %vm1230_vm0, %v1229_v0  ;;  %1122 = vmatpush3.bf16.msra.mxu0 %v720_v24 }
  0x94   : > { %v570_v17 = vpop.permute.xlu1 %569 }
  0x9a   : > { %1124 = vmatmul.mubr.msk.bf16.vlgmr.msra.gmra.mxu0 %vm715_vm5, %v1187_v27 }
 0x152   : > { %v617_v14 = vpop.f32.mrf.mxu0 }
 0x153   : > { %v618_v16 = vadd.f32 %v617_v14, %v565_v13 }
 0x154   : > { %v1109_v15 = vpop.f32.mrf.mxu0 }
 0x155   : > { %v624_v21 = vmax.f32 %v618_v16, 0.0 }
 0x156   : > { %v620_v18 = vpop.f32.mrf.mxu0 }
 0x157   : > { %v621_v19 = vadd.f32 %v620_v18, %v570_v17 }
 0x158   : > { %v1110_v20 = vpop.f32.mrf.mxu0 }
 0x159   : > { %v625_v22 = vmax.f32 %v621_v19, 0.0 }
 0x15a   : > { %v756_v37 = vpop.f32.mrf.mxu0 }
 0x15b   : > { %v626_v23 = vpack.c.bf16 %v625_v22, %v624_v21 }
 0x15c   : > { %v1125_v41 = vpop.f32.mrf.mxu0 }
 0x15d   : > { %628 = vrot.lane.b32.xlu1 %v626_v23, %s1233_s18  ;;  %633 = vrot.lane.b32.xlu0 %v626_v23, %s1232_s16 }
 0x15e   : > { %v759_v46 = vpop.f32.mrf.mxu0 }
 0x160   : > { %v1126_v49 = vpop.f32.mrf.mxu0 }
 0x161   : > { %645 = vperm.xlu1 %1182, %v536_v25   ;;  %640 = vperm.xlu0 %1183, %v535_v26  }
 0x1cf   : > { %v634_v28 = vpop.permute.xlu0 %633  ;;  %v629_v31 = vpop.permute.xlu1 %628 }
 0x1d0   : > { %v636_v29 = vsel %vm555_vm1, %v634_v28, 0 }
 0x1d1   : > { %1112 = vmatpush3.bf16.msra.mxu1 %v636_v29 }
 0x1d2   : > { %1113 = vmatprep.subr.bf16.mxu1 %v1229_v0 }
 0x1d5   : > { %1114 = vmatpush3.bf16.msra.mxu1 %v626_v23 }
 0x1d6   : > { %1115 = vmatprep.subr.bf16.mxu1 %v1229_v0 }
 0x1d9   : > { %1116 = vmatpush3.bf16.msk.msra.mxu1 %vm1371_vm6, %v629_v31 }
 0x1da   : > { %1127 = vmatprep.subr.bf16.mxu1 %v1229_v0 }
 0x1dc   : > { %1118 = vmatmul.mubr.msk.bf16.vlgmr.msra.gmra.mxu1 %vm653_vm7, %v1186_v32  ;;  %v641_v34 = vpop.permute.xlu0 %640  ;;  %v646_v38 = vpop.permute.xlu1 %645 }
 0x1dd   : > { %1133 = vmatprep.mubr.msk.bf16.mxu1 %vm1230_vm0, %v1229_v0 }
 0x29c   : > { %v691_v33 = vpop.f32.mrf.mxu1 }
 0x29d   : > { %v692_v36 = vadd.f32 %v691_v33, %v641_v34 }
 0x29e   : > { %v1119_v35 = vpop.f32.mrf.mxu1 }
 0x29f   : > { %v698_v43 = vmax.f32 %v692_v36, 0.0 }
 0x2a0   : > { %v694_v39 = vpop.f32.mrf.mxu1 }
 0x2a1   : > { %v695_v40 = vadd.f32 %v694_v39, %v646_v38 }
 0x2a2   : > { %v1120_v42 = vpop.f32.mrf.mxu1 }
 0x2a3   : > { %v699_v44 = vmax.f32 %v695_v40, 0.0 }
 0x2a5   : > { %v763_v45 = vpack.c.bf16 %v699_v44, %v698_v43 }
 0x2a7   : > { %765 = vrot.lane.b32.xlu0 %v763_v45, %s1233_s18  ;;  %770 = vrot.lane.b32.xlu1 %v763_v45, %s1232_s16  ;;  %s523_s16 = sadd.s32 %s1061_s26, %s1060_s17 }
 0x2a8   : > { %s1062_s18 = sshll.u32 %s523_s16, 2 }
 0x2a9   : > { %s525_s19 = scalar_lea.vmem %s1431_s9, %s1062_s18 }
 0x2ab   : > { %707 = vperm.xlu0 %1183, %v542_v47   ;;  %702 = vperm.xlu1 %1182, %v541_v48  }
 0x2af   : > { %782 = vperm.xlu0 %1183, %v538_v50   ;;  %777 = vperm.xlu1 %1182, %v537_v51  }
 0x319   : > { %v771_v52 = vpop.permute.xlu1 %770  ;;  %v766_v54 = vpop.permute.xlu0 %765 }
 0x31a   : > { %v773_v53 = vsel %vm555_vm1, %v771_v52, 0 }
 0x31b   : > { %1128 = vmatpush3.bf16.msra.mxu1 %v773_v53 }
 0x31c   : > { %1129 = vmatprep.subr.bf16.mxu1 %v1229_v0 }
 0x31f   : > { %1130 = vmatpush3.bf16.msra.mxu1 %v763_v45 }
 0x320   : > { %1131 = vmatprep.subr.bf16.mxu1 %v1229_v0 }
 0x323   : > { %1132 = vmatpush3.bf16.msk.msra.mxu1 %vm1371_vm6, %v766_v54 }
 0x326   : > { %1134 = vmatmul.mubr.msk.bf16.vlgmr.msra.gmra.mxu1 %vm653_vm7, %v1188_v55  ;;  %v703_v56 = vpop.permute.xlu1 %702  ;;  %v708_v57 = vpop.permute.xlu0 %707 }
 0x327   : > { %v757_v60 = vadd.f32 %v756_v37, %v703_v56  ;;  %v760_v2 = vadd.f32 %v759_v46, %v708_v57 }
 0x32a   : > { %v778_v58 = vpop.permute.xlu1 %777  ;;  %v783_v0 = vpop.permute.xlu0 %782 }
 0x3e6   : > { %v827_v59 = vpop.f32.mrf.mxu1 }
 0x3e7   : > { %v828_v61 = vadd.f32 %v827_v59, %v778_v58 }
 0x3e8   : > { %v1135_v62 = vpop.f32.mrf.mxu1 }
 0x3e9   : > { %v834_v63 = vadd.f32 %v828_v61, %v757_v60 }
 0x3ea   : > { %v830_v1 = vpop.f32.mrf.mxu1 }
 0x3eb   : > { %v836_v3 = vmax.f32 %v834_v63, 0.0  ;;  %v831_v4 = vadd.f32 %v830_v1, %v783_v0 }
 0x3ec   : > { %v1136_v5 = vpop.f32.mrf.mxu1 }
 0x3ed   : > { %v1088_v6 = vpack.c.bf16 %v836_v3, %v836_v3  ;;  %v835_v7 = vadd.f32 %v831_v4, %v760_v2 }
 0x3ef   : > { %847 = vst.msk [vmem:[%s525_s19] sm:$0xf] %vm846_vm8, %v1088_v6  ;;  %v837_v8 = vmax.f32 %v835_v7, 0.0 }
 0x3f1   : > { %v1089_v9 = vpack.c.bf16 %v837_v8, %v837_v8 }
 0x3f3   : > { %848 = vst.msk [vmem:[%s525_s19 + $0x4] sm:$0xf] %vm846_vm8, %v1089_v9 }
 0x3f4 PF: > { %s19_s13 = sadd.s32 1, %s1227_s13   ;;  %s1434_s30 = smov %s1219_s11 }
 0x3f5   : > { %p16_p7 = scmp.ge.s32.totalorder %s19_s13, 6   ;;  %s1435_s10 = smov %s1223_s12 }
 0x3f6   : > { %s1436_s11 = smov %s1439_s14  ;;  %s1437_s12 = smov %s1443_s15 }
 0x3f7   :  { %18 = sbr.rel (!%p16_p7) target bundleno = 3 (0x3), region = 110 }

// kernel: model_forward.9
= control target key start
LH: loop header
LB: loop body
LE: loop exit
PB: predicated region body
PF: predicated region fallthrough
CT: control target
= control target key end

     0   :  { %s1181_s30 = smov 0   ;;  %s1183_s10 = smov 0   ;;  %s1317_s0 = inlined_call_operand.vmem [shape: bf16[2,2,2,16], index: 0, kind: input, shape index: {}]   ;;  %s1318_s1 = inlined_call_operand.vmem [shape: bf16[2,8,6], index: 1, kind: input, shape index: {}]   ;;  %s1319_s2 = inlined_call_operand.vmem [shape: f32[2,8,1], index: 2, kind: input, shape index: {}]   ;;  %s1320_s3 = inlined_call_operand.vmem [shape: bf16[2,8,24], index: 3, kind: input, shape index: {}]   ;;  %s1321_s4 = inlined_call_operand.vmem [shape: f32[2,8,1], index: 4, kind: input, shape index: {}]   ;;  %s1322_s5 = inlined_call_operand.vmem [shape: bf16[2,8,24], index: 5, kind: input, shape index: {}]   ;;  %s1323_s6 = inlined_call_operand.vmem [shape: f32[2,8,1], index: 6, kind: input, shape index: {}]   ;;  %s1324_s7 = inlined_call_operand.vmem [shape: bf16[2,8,2], index: 7, kind: input, shape index: {}]   ;;  %s1325_s8 = inlined_call_operand.vmem [shape: f32[2,8,1], index: 8, kind: input, shape index: {}]   ;;  %s1326_s9 = inlined_call_operand.vmem [shape: bf16[2,2,8,16], index: 9, kind: output, shape index: {}]  }
   0x1   :  { %s1185_s11 = smov 0   ;;  %s1187_s12 = smov 0  }
   0x2   :  { %s1189_s13 = smov 0  }
   0x3 LB: > { %s28_s14 = sadd.s32 1, %s1115_s11  ;;  %s31_s15 = sadd.s32 1, %s1119_s12  ;;  %s1123_s13 = sphi %s1189_s13, %s19_s13   ;;  %s1119_s12 = sphi %s1187_s12, %s1330_s12   ;;  %s1115_s11 = sphi %s1185_s11, %s1329_s11   ;;  %s1111_s10 = sphi %s1183_s10, %s1328_s10   ;;  %s1107_s30 = sphi %s1181_s30, %s1327_s30  }
   0x4   : > { %p29_p0 = scmp.ge.s32.totalorder %s28_s14, 2  ;;  %p980_p1 = scmp.ge.s32.totalorder %s1123_s13, 1 }
   0x5   : > { %p377_p2 = scmp.lt.s32.totalorder %s1123_s13, 5 }
   0x6   : > { %s1332_s14 = smov (%p29_p0, %s28_s14), 0  ;;  %s1334_s15 = smov (!%p29_p0, %s31_s15), %s1119_s12 }
   0x7   : > { %p378_p3 = pnand %p980_p1, %p377_p2  ;;  %p33_p4 = scmp.ge.s32.totalorder %s1334_s15, 2 }
   0x8   : > { %p450_p5 = scmp.lt.s32.totalorder (!%p378_p3), %s1111_s10, 1  ;;  %p452_p6 = scmp.lt.s32.totalorder (!%p378_p3), %s1107_s30, 1 }
   0x9   : > { %s1336_s15 = smov (%p33_p4, %s1334_s15), 0  ;;  %381 = sbr.rel (%p378_p3) target bundleno = 999 (0x3e7), region = 56 }
   0xa   : > { %s1129_s25 = smov (!%p378_p3), 127   ;;  %s1130_s26 = smov (!%p378_p3), 1  }
   0xe   : > { %v511_v0 = vlaneseq  ;;  %v1125_v1 = vmov 1966171168   ;;  %s1338_s10 = smov (!%p450_p5, %s1111_s10), 1  ;;  %s1340_s30 = smov (!%p452_p6, %s1107_s30), 1  ;;  %v1126_v6 = vmov 0.0   ;;  %vm1127_vm0 = vmmov 0  }
   0xf   : > { %v509_v2 = vunpack.c.l.s4 %v1125_v1  ;;  %s981_s16 = sshll.u32 %s1338_s10, 1  ;;  %1008 = vmatprep.subr.bf16.mxu0 %v1126_v6  ;;  %1014 = vmatprep.subr.bf16.mxu1 %v1126_v6  ;;  %s1230_s21 = sshll.u32 %s1338_s10, 3  ;;  %v1128_v10 = vmov 0   ;;  %vm530_vm1 = vcmask 121856   ;;  %vm524_vm2 = vcmask 7168  }
  0x10   : > { %v512_v3 = vshrl.u32 %v511_v0, 7  ;;  %s1214_s17 = sadd.s32 %s981_s16, %s1340_s30  ;;  %1010 = vmatprep.mubr.msk.bf16.mxu0 %vm1127_vm0, %v1126_v6  ;;  %1018 = vmatprep.mubr.msk.bf16.mxu1 %vm1127_vm0, %v1126_v6  ;;  %s464_s24 = scalar_lea.vmem %s1319_s2, %s1230_s21  ;;  %vm550_vm3 = vcmask 1040384   ;;  %vm553_vm4 = vcmask 1041408   ;;  %vm565_vm5 = vcmask 1042432  }
  0x11   : > { %v510_v4 = vunpack.c.0.s8 %v509_v2  ;;  %s456_s20 = scalar_lea.vmem %s1317_s0, %s1214_s17  ;;  %1082 = vset.pattern.permute.xlu1 %v1128_v10  ;;  %1083 = vset.pattern.permute.xlu0 %v1128_v10  ;;  %v501_v11 = vld [vmem:[%s464_s24] sm:$0xff]  ;;  %s1242_s27 = sshll.u32 %s1338_s10, 2  ;;  %vm561_vm6 = vcmask 48128   ;;  %vm620_vm7 = vcmask 1043456   ;;  %vm629_vm8 = vcmask 195584  }
  0x12   : > { %v1222_v7 = vld [vmem:[%s456_s20] sm:$0x1]  ;;  %558 = vperm.xlu1 %1082, %v501_v11   ;;  %s460_s30 = scalar_lea.vmem %s1318_s1, %s1242_s27  ;;  %s472_s18 = scalar_lea.vmem %s1321_s4, %s1230_s21  ;;  %vm681_vm9 = vcmask 15360   ;;  %vm795_vm10 = vcmask 125952  }
  0x13   : > { %v513_v5 = vsub.s32 %v510_v4, %v512_v3  ;;  %v533_v12 = vcombine.low %v1222_v7, %v1222_v7  ;;  %v498_v23 = vld [vmem:[%s460_s30] sm:$0xf]  ;;  %s468_s22 = scalar_lea.vmem %s1320_s3, %s1242_s27  ;;  %v686_v41 = vsel %vm550_vm3, %v1222_v7, 0  ;;  %s484_s28 = scalar_lea.vmem %s1324_s7, %s1242_s27 }
  0x14   : > { %v502_v32 = vld [vmem:[%s472_s18] sm:$0xff]  ;;  %s480_s10 = scalar_lea.vmem %s1323_s6, %s1230_s21  ;;  %s488_s19 = scalar_lea.vmem %s1325_s8, %s1230_s21 }
  0x15   : > { %v514_v8 = vrot.slane %v1222_v7, %v513_v5  ;;  %v540_v13 = vrot.slane %v533_v12, %v513_v5  ;;  %v499_v40 = vld [vmem:[%s468_s22] sm:$0xf]  ;;  %s991_s20 = sshll.u32 %s1214_s17, 2 }
  0x16   : > { %v504_v42 = vld [vmem:[%s484_s28] sm:$0xf]  ;;  %s496_s23 = scalar_lea.vmem %s1326_s9, %s991_s20 }
  0x17   : > { %v521_v9 = vrot.slane %v514_v8, %v513_v5  ;;  %v547_v16 = vrot.slane %v540_v13, %v513_v5  ;;  %v503_v51 = vld [vmem:[%s480_s10] sm:$0xff] }
  0x18   : > { %v505_v52 = vld [vmem:[%s488_s19] sm:$0xff] }
  0x19   : > { %528 = vrot.lane.b32.xlu0 %v521_v9, %s1129_s25 }
  0x1d   : > { %522 = vrot.lane.b32.xlu0 %v521_v9, %s1130_s26 }
  0x8b   : > { %v529_v14 = vpop.permute.xlu0 %528 }
  0x8c   : > { %v532_v15 = vsel %vm530_vm1, %v529_v14, 0 }
  0x8d   : > { %v549_v18 = vrot.slane %v532_v15, 6  ;;  %v559_v24 = vpop.permute.xlu1 %558 }
  0x8f   : > { %v523_v17 = vpop.permute.xlu0 %522 }
  0x90   : > { %v527_v19 = vsel %vm524_vm2, 0, %v523_v17 }
  0x91   : > { %v552_v20 = vsel %vm550_vm3, %v527_v19, %v547_v16 }
  0x92   : > { %v555_v21 = vsel %vm553_vm4, %v552_v20, %v549_v18 }
  0x93   : > { %v566_v22 = vsel %vm565_vm5, %v555_v21, 0 }
  0x94   : > { %1009 = vmatpush3.bf16.msra.mxu0 %v566_v22 }
  0x95   : > { %1022 = vmatprep.subr.bf16.mxu0 %v1126_v6 }
  0x97   : > { %1011 = vmatmul.mubr.msk.bf16.vlgmr.msra.gmra.mxu0 %vm561_vm6, %v498_v23 }
  0x98   : > { %1024 = vmatprep.mubr.msk.bf16.mxu0 %vm1127_vm0, %v1126_v6  ;;  %1023 = vmatpush3.bf16.msra.mxu0 %v686_v41 }
  0x9f   : > { %1025 = vmatmul.mubr.msk.bf16.vlgmr.msra.gmra.mxu0 %vm681_vm9, %v504_v42 }
 0x157   : > { %v602_v25 = vpop.f32.mrf.mxu0 }
 0x158   : > { %v603_v26 = vadd.f32 %v602_v25, %v559_v24 }
 0x159   : > { %v1012_v27 = vpop.f32.mrf.mxu0 }
 0x15a   : > { %v608_v28 = vmax.f32 %v603_v26, 0.0 }
 0x15b   : > { %v605_v29 = vpop.f32.mrf.mxu0 }
 0x15c   : > { %v609_v30 = vpack.c.bf16 %v608_v28, %v608_v28 }
 0x15d   : > { %v1013_v31 = vpop.f32.mrf.mxu0 }
 0x15e   : > { %611 = vrot.lane.b32.xlu0 %v609_v30, %s1130_s26  ;;  %615 = vrot.lane.b32.xlu1 %v609_v30, %s1129_s25  ;;  %v619_v38 = vrot.slane %v609_v30, 4 }
 0x15f   : > { %v722_v61 = vpop.f32.mrf.mxu0 }
 0x161   : > { %v1026_v62 = vpop.f32.mrf.mxu0 }
 0x162   : > { %626 = vperm.xlu1 %1082, %v502_v32  }
 0x163   : > { %v725_v63 = vpop.f32.mrf.mxu0 }
 0x165   : > { %v1027_v0 = vpop.f32.mrf.mxu0 }
 0x1d0   : > { %v612_v33 = vpop.permute.xlu0 %611  ;;  %v616_v34 = vpop.permute.xlu1 %615 }
 0x1d1   : > { %v618_v35 = vsel %vm530_vm1, %v616_v34, 0  ;;  %v614_v37 = vsel %vm524_vm2, 0, %v612_v33 }
 0x1d2   : > { %v633_v36 = vsel %vm620_vm7, %v618_v35, 0  ;;  %v622_v39 = vsel %vm620_vm7, %v614_v37, %v619_v38 }
 0x1d3   : > { %1015 = vmatpush3.bf16.msra.mxu1 %v633_v36 }
 0x1d4   : > { %1016 = vmatprep.subr.bf16.mxu1 %v1126_v6 }
 0x1d7   : > { %1017 = vmatpush3.bf16.msra.mxu1 %v622_v39 }
 0x1d8   : > { %1028 = vmatprep.subr.bf16.mxu1 %v1126_v6 }
 0x1da   : > { %1019 = vmatmul.mubr.msk.bf16.vlgmr.msra.gmra.mxu1 %vm629_vm8, %v499_v40 }
 0x1db   : > { %1032 = vmatprep.mubr.msk.bf16.mxu1 %vm1127_vm0, %v1126_v6 }
 0x1dd   : > { %v627_v43 = vpop.permute.xlu1 %626 }
 0x29a   : > { %v669_v44 = vpop.f32.mrf.mxu1 }
 0x29b   : > { %v670_v45 = vadd.f32 %v669_v44, %v627_v43 }
 0x29c   : > { %v1020_v46 = vpop.f32.mrf.mxu1 }
 0x29d   : > { %v675_v47 = vmax.f32 %v670_v45, 0.0 }
 0x29e   : > { %v672_v48 = vpop.f32.mrf.mxu1 }
 0x29f   : > { %v728_v49 = vpack.c.bf16 %v675_v47, %v675_v47 }
 0x2a0   : > { %v1021_v50 = vpop.f32.mrf.mxu1 }
 0x2a1   : > { %730 = vrot.lane.b32.xlu1 %v728_v49, %s1130_s26  ;;  %734 = vrot.lane.b32.xlu0 %v728_v49, %s1129_s25  ;;  %v738_v58 = vrot.slane %v728_v49, 4  ;;  %s476_s25 = scalar_lea.vmem %s1322_s5, %s1242_s27 }
 0x2a2   : > { %v500_v60 = vld [vmem:[%s476_s25] sm:$0xf] }
 0x2a5   : > { %744 = vperm.xlu1 %1082, %v503_v51   ;;  %678 = vperm.xlu0 %1083, %v505_v52  }
 0x313   : > { %v731_v53 = vpop.permute.xlu1 %730  ;;  %v735_v54 = vpop.permute.xlu0 %734 }
 0x314   : > { %v737_v55 = vsel %vm530_vm1, %v735_v54, 0  ;;  %v733_v57 = vsel %vm524_vm2, 0, %v731_v53 }
 0x315   : > { %v750_v56 = vsel %vm620_vm7, %v737_v55, 0  ;;  %v740_v59 = vsel %vm620_vm7, %v733_v57, %v738_v58 }
 0x316   : > { %1029 = vmatpush3.bf16.msra.mxu1 %v750_v56 }
 0x317   : > { %1030 = vmatprep.subr.bf16.mxu1 %v1126_v6 }
 0x31a   : > { %1031 = vmatpush3.bf16.msra.mxu1 %v740_v59 }
 0x31d   : > { %1033 = vmatmul.mubr.msk.bf16.vlgmr.msra.gmra.mxu1 %vm629_vm8, %v500_v60 }
 0x320   : > { %v679_v1 = vpop.permute.xlu0 %678  ;;  %v745_v3 = vpop.permute.xlu1 %744 }
 0x321   : > { %v723_v2 = vadd.f32 %v722_v61, %v679_v1 }
 0x3dd   : > { %v786_v4 = vpop.f32.mrf.mxu1 }
 0x3de   : > { %v787_v5 = vadd.f32 %v786_v4, %v745_v3 }
 0x3df   : > { %v1034_v6 = vpop.f32.mrf.mxu1 }
 0x3e0   : > { %v792_v7 = vadd.f32 %v787_v5, %v723_v2 }
 0x3e1   : > { %v789_v8 = vpop.f32.mrf.mxu1 }
 0x3e2   : > { %v793_v9 = vmax.f32 %v792_v7, 0.0 }
 0x3e3   : > { %v1035_v10 = vpop.f32.mrf.mxu1 }
 0x3e4   : > { %v794_v11 = vpack.c.bf16 %v793_v9, %v793_v9 }
 0x3e6   : > { %796 = vst.msk [vmem:[%s496_s23] sm:$0xf] %vm795_vm10, %v794_v11 }
 0x3e7 PF: > { %s19_s13 = sadd.s32 1, %s1123_s13   ;;  %s1327_s30 = smov %s1115_s11 }
 0x3e8   : > { %p16_p7 = scmp.ge.s32.totalorder %s19_s13, 6   ;;  %s1328_s10 = smov %s1119_s12 }
 0x3e9   : > { %s1329_s11 = smov %s1332_s14  ;;  %s1330_s12 = smov %s1336_s15 }
 0x3ea   :  { %18 = sbr.rel (!%p16_p7) target bundleno = 3 (0x3), region = 110 }

// kernel: model_forward.11
= control target key start
LH: loop header
LB: loop body
LE: loop exit
PB: predicated region body
PF: predicated region fallthrough
CT: control target
= control target key end

     0   :  { %s1440_s30 = smov 0   ;;  %s1442_s10 = smov 0   ;;  %s1600_s0 = inlined_call_operand.vmem [shape: bf16[2,2,16,16], index: 0, kind: input, shape index: {}]   ;;  %s1601_s1 = inlined_call_operand.vmem [shape: bf16[2,24,48], index: 1, kind: input, shape index: {}]   ;;  %s1602_s2 = inlined_call_operand.vmem [shape: f32[2,24,1], index: 2, kind: input, shape index: {}]   ;;  %s1603_s3 = inlined_call_operand.vmem [shape: bf16[2,24,72], index: 3, kind: input, shape index: {}]   ;;  %s1604_s4 = inlined_call_operand.vmem [shape: f32[2,24,1], index: 4, kind: input, shape index: {}]   ;;  %s1605_s5 = inlined_call_operand.vmem [shape: bf16[2,24,72], index: 5, kind: input, shape index: {}]   ;;  %s1606_s6 = inlined_call_operand.vmem [shape: f32[2,24,1], index: 6, kind: input, shape index: {}]   ;;  %s1607_s7 = inlined_call_operand.vmem [shape: bf16[2,24,16], index: 7, kind: input, shape index: {}]   ;;  %s1608_s8 = inlined_call_operand.vmem [shape: f32[2,24,1], index: 8, kind: input, shape index: {}]   ;;  %s1609_s9 = inlined_call_operand.vmem [shape: bf16[2,2,24,16], index: 9, kind: output, shape index: {}]  }
   0x1   :  { %s1444_s11 = smov 0   ;;  %s1446_s12 = smov 0  }
   0x2   :  { %s1448_s13 = smov 0  }
   0x3 LB: > { %s28_s14 = sadd.s32 1, %s1377_s11  ;;  %s31_s15 = sadd.s32 1, %s1381_s12  ;;  %s1385_s13 = sphi %s1448_s13, %s19_s13   ;;  %s1381_s12 = sphi %s1446_s12, %s1615_s12   ;;  %s1377_s11 = sphi %s1444_s11, %s1614_s11   ;;  %s1373_s10 = sphi %s1442_s10, %s1613_s10   ;;  %s1369_s30 = sphi %s1440_s30, %s1612_s30  }
   0x4   : > { %p29_p0 = scmp.ge.s32.totalorder %s28_s14, 2  ;;  %p1174_p1 = scmp.ge.s32.totalorder %s1385_s13, 1 }
   0x5   : > { %p387_p2 = scmp.lt.s32.totalorder %s1385_s13, 5 }
   0x6   : > { %s1617_s14 = smov (%p29_p0, %s28_s14), 0  ;;  %s1619_s15 = smov (!%p29_p0, %s31_s15), %s1381_s12 }
   0x7   : > { %p388_p3 = pnand %p1174_p1, %p387_p2  ;;  %p33_p4 = scmp.ge.s32.totalorder %s1619_s15, 2 }
   0x8   : > { %p471_p5 = scmp.lt.s32.totalorder (!%p388_p3), %s1373_s10, 1  ;;  %p473_p6 = scmp.lt.s32.totalorder (!%p388_p3), %s1369_s30, 1 }
   0x9   : > { %s1621_s15 = smov (%p33_p4, %s1619_s15), 0  ;;  %391 = sbr.rel (%p388_p3) target bundleno = 1028 (0x404), region = 56 }
   0xa   : > { %s1387_s28 = smov (!%p388_p3), 127  }
   0xe   : > { %s1623_s10 = smov (!%p471_p5, %s1373_s10), 1  ;;  %s1625_s30 = smov (!%p473_p6, %s1369_s30), 1  ;;  %vm598_vm0 = vcmask 392192   ;;  %v1388_v2 = vmov 0   ;;  %vm570_vm1 = vcmask 121856   ;;  %vm563_vm2 = vcmask 7168  }
   0xf   : > { %s1176_s16 = sshll.u32 %s1623_s10, 2  ;;  %s1476_s17 = smul.u32 12, %s1623_s10  ;;  %1336 = vset.pattern.permute.xlu1 %v1388_v2  ;;  %1337 = vset.pattern.permute.xlu0 %v1388_v2  ;;  %vm1502_vm3 = vmneg %vm563_vm2  ;;  %vm678_vm4 = vcmask 1043456   ;;  %vm710_vm5 = vcmask 588800   ;;  %vm793_vm6 = vcmask 130048   ;;  %vm975_vm7 = vcmask 125952  }
  0x10   : > { %s1175_s18 = sshll.u32 %s1625_s30, 1  ;;  %s1491_s27 = smul.u32 24, %s1623_s10 }
  0x11   : > { %s477_s19 = sadd.s32 %s1176_s16, %s1175_s18  ;;  %s1483_s22 = scalar_lea.vmem %s1601_s1, %s1476_s17 }
  0x12   : > { %s1177_s23 = sshll.u32 %s477_s19, 2  ;;  %v1339_v0 = vld [vmem:[%s1483_s22] sm:$0xff]   ;;  %s489_s18 = scalar_lea.vmem %s1602_s2, %s1491_s27  ;;  %v1340_v10 = vld [vmem:[%s1483_s22 + $0x8] ss:$0 sps:$4 sm:$0xff]  }
  0x13   : > { %s479_s26 = scalar_lea.vmem %s1600_s0, %s1177_s23  ;;  %1246 = vmatprep.mubr.msk.bf16.mxu1 %vm598_vm0, %v1339_v0  ;;  %v541_v3 = vld [vmem:[%s489_s18 + $0x10] sm:$0xff]  ;;  %s1389_s19 = smov 1   ;;  %v539_v4 = vld [vmem:[%s489_s18] sm:$0xff]  ;;  %v540_v5 = vld [vmem:[%s489_s18 + $0x8] sm:$0xff] }
  0x14   : > { %v1338_v1 = vld [vmem:[%s479_s26] sm:$0xff]   ;;  %587 = vperm.xlu1 %1336, %v541_v3   ;;  %s499_s22 = scalar_lea.vmem %s1604_s4, %s1491_s27  ;;  %s1522_s25 = scalar_lea.vmem %s1603_s3, %s1476_s17 }
  0x15   : > { %568 = vrot.lane.b32.xlu0 %v1338_v1, %s1387_s28  ;;  %1264 = vmatprep.subr.bf16.mxu0 %v1338_v1  ;;  %v544_v23 = vld [vmem:[%s499_s22 + $0x10] sm:$0xff]  ;;  %v543_v28 = vld [vmem:[%s499_s22 + $0x8] sm:$0xff]  ;;  %v1341_v30 = vld [vmem:[%s1522_s25] sm:$0xff]   ;;  %s514_s16 = scalar_lea.vmem %s1607_s7, %s1476_s17  ;;  %s519_s21 = scalar_lea.vmem %s1608_s8, %s1491_s27 }
  0x16   : > { %1265 = vmatpush3.bf16.msra.mxu0 %v1338_v1  ;;  %v542_v32 = vld [vmem:[%s499_s22] sm:$0xff]  ;;  %v1344_v34 = vld [vmem:[%s514_s16 + $0x8] ss:$0 sps:$4 sm:$0xff]   ;;  %s1556_s24 = scalar_lea.vmem %s1605_s5, %s1476_s17  ;;  %s509_s29 = scalar_lea.vmem %s1606_s6, %s1491_s27 }
  0x17   : > { %v1343_v33 = vld [vmem:[%s514_s16] sm:$0xff]   ;;  %v1342_v44 = vld [vmem:[%s1522_s25 + $0x8] ss:$0 sps:$4 sm:$0xff]   ;;  %s1291_s17 = smul.u32 3, %s1625_s30 }
  0x18   : > { %577 = vperm.xlu1 %1336, %v539_v4   ;;  %1266 = vmatprep.mubr.msk.bf16.mxu0 %vm793_vm6, %v1343_v33  ;;  %v551_v63 = vld [vmem:[%s519_s21] sm:$0xff]  ;;  %v553_v4 = vld [vmem:[%s519_s21 + $0x10] sm:$0xff]  ;;  %s1292_s27 = smul.u32 6, %s1623_s10 }
  0x19   : > { %561 = vrot.lane.b32.xlu0 %v1338_v1, %s1389_s19  ;;  %1267 = vmatmul.mubr.msk.bf16.vlgmr.msra.gmra.mxu0 %vm793_vm6, %v1344_v34  ;;  %v1345_v2 = vld [vmem:[%s1556_s24] sm:$0xff]  }
  0x1a   : > { %1280 = vmatprep.mubr.msk.bf16.mxu0 %vm710_vm5, %v1345_v2 }
  0x1d   : > { %582 = vperm.xlu0 %1337, %v540_v5   ;;  %v552_v5 = vld [vmem:[%s519_s21 + $0x8] sm:$0xff] }
  0x87   : > { %v569_v6 = vpop.permute.xlu0 %568 }
  0x88   : > { %1284 = vmatprep.subr.msk.bf16.mxu1 %vm570_vm1, %v569_v6  ;;  %v572_v7 = vsel %vm570_vm1, %v569_v6, 0  ;;  %v546_v6 = vld [vmem:[%s509_s29 + $0x8] sm:$0xff] }
  0x89   : > { %1241 = vmatpush3.bf16.msra.mxu1 %v572_v7  ;;  %v545_v7 = vld [vmem:[%s509_s29] sm:$0xff] }
  0x8a   : > { %1242 = vmatprep.subr.bf16.mxu1 %v1338_v1 }
  0x8b   : > { %v562_v8 = vpop.permute.xlu0 %561 }
  0x8d   : > { %1243 = vmatpush3.bf16.msra.mxu1 %v1338_v1 }
  0x8e   : > { %1244 = vmatprep.subr.msk.bf16.mxu1 %vm1502_vm3, %v562_v8 }
  0x8f   : > { %v588_v11 = vpop.permute.xlu1 %587 }
  0x91   : > { %1245 = vmatpush3.bf16.msk.msra.mxu1 %vm1502_vm3, %v562_v8  ;;  %v547_v8 = vld [vmem:[%s509_s29 + $0x10] sm:$0xff] }
  0x93   : > { %v578_v14 = vpop.permute.xlu1 %577 }
  0x94   : > { %1247 = vmatmul.mubr.msk.bf16.vlgmr.msra.gmra.mxu1 %vm598_vm0, %v1340_v10 }
  0x95   : > { %1260 = vmatprep.mubr.msk.bf16.mxu1 %vm710_vm5, %v1341_v30 }
  0x98   : > { %v583_v18 = vpop.permute.xlu0 %582 }
  0xd9   : > { %v1268_v56 = vpop.f32.mrf.mxu0 }
  0xdb   : > { %v834_v60 = vpop.f32.mrf.mxu0 }
  0xdd   : > { %v1269_v0 = vpop.f32.mrf.mxu0 }
 0x154   : > { %v1248_v12 = vpop.f32.mrf.mxu1 }
 0x155   : > { %v648_v13 = vadd.f32 %v1248_v12, %v588_v11 }
 0x156   : > { %v639_v15 = vpop.f32.mrf.mxu1 }
 0x157   : > { %v655_v16 = vmax.f32 %v648_v13, 0.0  ;;  %v640_v20 = vadd.f32 %v639_v15, %v578_v14 }
 0x158   : > { %v1249_v17 = vpop.f32.mrf.mxu1 }
 0x159   : > { %v657_v19 = vpack.c.bf16 %v655_v16, %v655_v16  ;;  %v653_v24 = vmax.f32 %v640_v20, 0.0 }
 0x15a   : > { %v642_v21 = vpop.f32.mrf.mxu1 }
 0x15b   : > { %v643_v22 = vadd.f32 %v642_v21, %v583_v18  ;;  %662 = vrot.lane.b32.xlu0 %v657_v19, %s1389_s19  ;;  %671 = vrot.lane.b32.xlu1 %v657_v19, %s1387_s28  ;;  %v680_v27 = vrot.slane %v657_v19, 4  ;;  %v1346_v19 = vld [vmem:[%s1556_s24 + $0x8] ss:$0 sps:$4 sm:$0xff]  }
 0x15d   : > { %v654_v25 = vmax.f32 %v643_v22, 0.0 }
 0x15f   : > { %v656_v26 = vpack.c.bf16 %v654_v25, %v653_v24  ;;  %699 = vperm.xlu0 %1337, %v544_v23   ;;  %v837_v24 = vpop.f32.mrf.mxu0 }
 0x161   : > { %669 = vrot.lane.b32.xlu1 %v656_v26, %s1387_s28  ;;  %v679_v29 = vrot.slane %v656_v26, 4 }
 0x163   : > { %694 = vperm.xlu0 %1337, %v543_v28   ;;  %v681_v31 = vsel %vm678_vm4, %v679_v29, %v680_v27 }
 0x165   : > { %660 = vrot.lane.b32.xlu1 %v656_v26, %s1389_s19 }
 0x169   : > { %689 = vperm.xlu1 %1336, %v542_v32  }
 0x1cd   : > { %v672_v35 = vpop.permute.xlu1 %671  ;;  %v663_v38 = vpop.permute.xlu0 %662 }
 0x1ce   : > { %v677_v36 = vsel %vm570_vm1, %v672_v35, 0  ;;  %v668_v41 = vsel %vm563_vm2, 0, %v663_v38 }
 0x1cf   : > { %v717_v37 = vsel %vm678_vm4, %v677_v36, 0  ;;  %1285 = vmatprep.subr.msk.bf16.mxu1 %vm678_vm4, %v677_v36  ;;  %v685_v42 = vsel %vm678_vm4, %v668_v41, %v679_v29 }
 0x1d0   : > { %1251 = vmatpush3.bf16.msra.mxu1 %v717_v37 }
 0x1d3   : > { %v670_v39 = vpop.permute.xlu1 %669 }
 0x1d4   : > { %v674_v40 = vsel %vm570_vm1, %v670_v39, 0  ;;  %1286 = vmatprep.subr.msk.bf16.mxu1 %vm570_vm1, %v670_v39 }
 0x1d5   : > { %1253 = vmatpush3.bf16.msra.mxu1 %v674_v40 }
 0x1d6   : > { %1254 = vmatprep.subr.bf16.mxu1 %v681_v31 }
 0x1d7   : > { %v661_v43 = vpop.permute.xlu1 %660 }
 0x1d9   : > { %1255 = vmatpush3.bf16.msra.mxu1 %v681_v31 }
 0x1da   : > { %1256 = vmatprep.subr.bf16.mxu1 %v685_v42  ;;  %v700_v45 = vpop.permute.xlu0 %699 }
 0x1dd   : > { %1257 = vmatpush3.bf16.msra.mxu1 %v685_v42 }
 0x1de   : > { %1258 = vmatprep.subr.msk.bf16.mxu1 %vm1502_vm3, %v661_v43  ;;  %v695_v52 = vpop.permute.xlu0 %694 }
 0x1e1   : > { %1259 = vmatpush3.bf16.msk.msra.mxu1 %vm1502_vm3, %v661_v43 }
 0x1e4   : > { %1261 = vmatmul.mubr.msk.bf16.vlgmr.msra.gmra.mxu1 %vm710_vm5, %v1342_v44  ;;  %v690_v50 = vpop.permute.xlu1 %689 }
 0x2a4   : > { %v1262_v46 = vpop.f32.mrf.mxu1 }
 0x2a5   : > { %v762_v47 = vadd.f32 %v1262_v46, %v700_v45 }
 0x2a6   : > { %v753_v48 = vpop.f32.mrf.mxu1 }
 0x2a7   : > { %v769_v49 = vmax.f32 %v762_v47, 0.0  ;;  %v754_v54 = vadd.f32 %v753_v48, %v690_v50 }
 0x2a8   : > { %v1263_v51 = vpop.f32.mrf.mxu1 }
 0x2a9   : > { %v849_v53 = vpack.c.bf16 %v769_v49, %v769_v49  ;;  %v767_v58 = vmax.f32 %v754_v54, 0.0 }
 0x2aa   : > { %v756_v55 = vpop.f32.mrf.mxu1 }
 0x2ab   : > { %v757_v57 = vadd.f32 %v756_v55, %v695_v52  ;;  %863 = vrot.lane.b32.xlu1 %v849_v53, %s1387_s28  ;;  %v871_v62 = vrot.slane %v849_v53, 4 }
 0x2ad   : > { %v768_v59 = vmax.f32 %v757_v57, 0.0 }
 0x2af   : > { %v848_v61 = vpack.c.bf16 %v768_v59, %v767_v58  ;;  %854 = vrot.lane.b32.xlu1 %v849_v53, %s1389_s19 }
 0x2b1   : > { %861 = vrot.lane.b32.xlu0 %v848_v61, %s1387_s28  ;;  %v870_v1 = vrot.slane %v848_v61, 4  ;;  %s526_s28 = sadd.s32 %s1292_s27, %s1291_s17 }
 0x2b3   : > { %772 = vperm.xlu1 %1336, %v551_v63   ;;  %v872_v3 = vsel %vm678_vm4, %v870_v1, %v871_v62 }
 0x2b5   : > { %852 = vrot.lane.b32.xlu0 %v848_v61, %s1389_s19  ;;  %s1186_s19 = sshll.u32 %s526_s28, 2 }
 0x2b6   : > { %s528_s30 = scalar_lea.vmem %s1609_s9, %s1186_s19 }
 0x2b7   : > { %782 = vperm.xlu1 %1336, %v553_v4  }
 0x2b9   : > { %777 = vperm.xlu0 %1337, %v552_v5  }
 0x2bb   : > { %884 = vperm.xlu1 %1336, %v546_v6  }
 0x2bd   : > { %879 = vperm.xlu0 %1337, %v545_v7  }
 0x2c1   : > { %889 = vperm.xlu0 %1337, %v547_v8  }
 0x31d   : > { %v864_v10 = vpop.permute.xlu1 %863 }
 0x31e   : > { %v869_v11 = vsel %vm570_vm1, %v864_v10, 0 }
 0x31f   : > { %v906_v12 = vsel %vm678_vm4, %v869_v11, 0  ;;  %1287 = vmatprep.subr.msk.bf16.mxu0 %vm678_vm4, %v869_v11 }
 0x320   : > { %1271 = vmatpush3.bf16.msra.mxu0 %v906_v12 }
 0x321   : > { %v855_v13 = vpop.permute.xlu1 %854 }
 0x322   : > { %v860_v16 = vsel %vm563_vm2, 0, %v855_v13 }
 0x323   : > { %v862_v14 = vpop.permute.xlu0 %861  ;;  %v875_v17 = vsel %vm678_vm4, %v860_v16, %v870_v1 }
 0x324   : > { %v866_v15 = vsel %vm570_vm1, %v862_v14, 0  ;;  %1288 = vmatprep.subr.msk.bf16.mxu0 %vm570_vm1, %v862_v14 }
 0x325   : > { %1273 = vmatpush3.bf16.msra.mxu0 %v866_v15 }
 0x326   : > { %1274 = vmatprep.subr.bf16.mxu0 %v872_v3 }
 0x327   : > { %v853_v18 = vpop.permute.xlu0 %852 }
 0x329   : > { %1275 = vmatpush3.bf16.msra.mxu0 %v872_v3 }
 0x32a   : > { %1276 = vmatprep.subr.bf16.mxu0 %v875_v17 }
 0x32d   : > { %1277 = vmatpush3.bf16.msra.mxu0 %v875_v17 }
 0x32e   : > { %1278 = vmatprep.subr.msk.bf16.mxu0 %vm1502_vm3, %v853_v18  ;;  %v773_v21 = vpop.permute.xlu1 %772 }
 0x32f   : > { %v835_v30 = vadd.f32 %v834_v60, %v773_v21 }
 0x331   : > { %1279 = vmatpush3.bf16.msk.msra.mxu0 %vm1502_vm3, %v853_v18 }
 0x332   : > { %v783_v23 = vpop.permute.xlu1 %782 }
 0x333   : > { %v843_v27 = vadd.f32 %v1268_v56, %v783_v23 }
 0x334   : > { %1281 = vmatmul.mubr.msk.bf16.vlgmr.msra.gmra.mxu0 %vm710_vm5, %v1346_v19  ;;  %v778_v20 = vpop.permute.xlu0 %777 }
 0x335   : > { %v838_v37 = vadd.f32 %v837_v24, %v778_v20 }
 0x336   : > { %v885_v35 = vpop.permute.xlu1 %884 }
 0x338   : > { %v880_v22 = vpop.permute.xlu0 %879 }
 0x33c   : > { %v890_v25 = vpop.permute.xlu0 %889 }
 0x3f4   : > { %v1282_v26 = vpop.f32.mrf.mxu0 }
 0x3f5   : > { %v951_v28 = vadd.f32 %v1282_v26, %v890_v25 }
 0x3f6   : > { %v942_v29 = vpop.f32.mrf.mxu0 }
 0x3f7   : > { %v958_v31 = vadd.f32 %v951_v28, %v843_v27  ;;  %v943_v9 = vadd.f32 %v942_v29, %v880_v22 }
 0x3f8   : > { %v1283_v32 = vpop.f32.mrf.mxu0 }
 0x3f9   : > { %v961_v33 = vmax.f32 %v958_v31, 0.0  ;;  %v956_v34 = vadd.f32 %v943_v9, %v835_v30 }
 0x3fa   : > { %v945_v36 = vpop.f32.mrf.mxu0 }
 0x3fb   : > { %v1217_v38 = vpack.c.bf16 %v961_v33, %v961_v33  ;;  %v959_v39 = vmax.f32 %v956_v34, 0.0  ;;  %v946_v40 = vadd.f32 %v945_v36, %v885_v35 }
 0x3fd   : > { %978 = vst.msk [vmem:[%s528_s30 + $0x8] sm:$0xf] %vm975_vm7, %v1217_v38  ;;  %v1215_v41 = vpack.c.bf16 %v959_v39, %v959_v39  ;;  %v957_v42 = vadd.f32 %v946_v40, %v838_v37 }
 0x3ff   : > { %976 = vst.msk [vmem:[%s528_s30] sm:$0xf] %vm975_vm7, %v1215_v41  ;;  %v960_v43 = vmax.f32 %v957_v42, 0.0 }
 0x401   : > { %v1216_v44 = vpack.c.bf16 %v960_v43, %v960_v43 }
 0x403   : > { %977 = vst.msk [vmem:[%s528_s30 + $0x4] sm:$0xf] %vm975_vm7, %v1216_v44 }
 0x404 PF: > { %s19_s13 = sadd.s32 1, %s1385_s13   ;;  %s1612_s30 = smov %s1377_s11 }
 0x405   : > { %p16_p7 = scmp.ge.s32.totalorder %s19_s13, 6   ;;  %s1613_s10 = smov %s1381_s12 }
 0x406   : > { %s1614_s11 = smov %s1617_s14  ;;  %s1615_s12 = smov %s1621_s15 }
 0x407   :  { %18 = sbr.rel (!%p16_p7) target bundleno = 3 (0x3), region = 110 }

// kernel: model_forward.12
= control target key start
LH: loop header
LB: loop body
LE: loop exit
PB: predicated region body
PF: predicated region fallthrough
CT: control target
= control target key end

     0   :  { %s1243_s24 = smov 0   ;;  %s1245_s25 = smov 0   ;;  %s1408_s0 = inlined_call_operand.vmem [shape: bf16[2,2,24,16], index: 0, kind: input, shape index: {}]   ;;  %s1409_s1 = inlined_call_operand.vmem [shape: bf16[2,24,72], index: 1, kind: input, shape index: {}]   ;;  %s1410_s2 = inlined_call_operand.vmem [shape: f32[2,24,1], index: 2, kind: input, shape index: {}]   ;;  %s1411_s3 = inlined_call_operand.vmem [shape: bf16[2,24,72], index: 3, kind: input, shape index: {}]   ;;  %s1412_s4 = inlined_call_operand.vmem [shape: f32[2,24,1], index: 4, kind: input, shape index: {}]   ;;  %s1413_s5 = inlined_call_operand.vmem [shape: bf16[2,24,72], index: 5, kind: input, shape index: {}]   ;;  %s1414_s6 = inlined_call_operand.vmem [shape: f32[2,24,1], index: 6, kind: input, shape index: {}]   ;;  %s1415_s7 = inlined_call_operand.vmem [shape: bf16[2,2,24,16], index: 7, kind: output, shape index: {}]  }
   0x1   :  { %s1247_s26 = smov 0   ;;  %s1249_s27 = smov 0  }
   0x2   :  { %s1251_s28 = smov 0  }
   0x3 LB: > { %s26_s29 = sadd.s32 1, %s1190_s26  ;;  %s29_s30 = sadd.s32 1, %s1194_s27  ;;  %s1198_s28 = sphi %s1251_s28, %s17_s28   ;;  %s1194_s27 = sphi %s1249_s27, %s1421_s27   ;;  %s1190_s26 = sphi %s1247_s26, %s1420_s26   ;;  %s1186_s25 = sphi %s1245_s25, %s1419_s25   ;;  %s1182_s24 = sphi %s1243_s24, %s1418_s24  }
   0x4   : > { %p27_p0 = scmp.ge.s32.totalorder %s26_s29, 2  ;;  %p993_p1 = scmp.ge.s32.totalorder %s1198_s28, 1 }
   0x5   : > { %p317_p2 = scmp.lt.s32.totalorder %s1198_s28, 5 }
   0x6   : > { %s1423_s29 = smov (%p27_p0, %s26_s29), 0  ;;  %s1425_s30 = smov (!%p27_p0, %s29_s30), %s1194_s27 }
   0x7   : > { %p318_p3 = pnand %p993_p1, %p317_p2  ;;  %p31_p4 = scmp.ge.s32.totalorder %s1425_s30, 2 }
   0x8   : > { %p387_p5 = scmp.lt.s32.totalorder (!%p318_p3), %s1186_s25, 1  ;;  %p389_p6 = scmp.lt.s32.totalorder (!%p318_p3), %s1182_s24, 1 }
   0x9   : > { %s1427_s30 = smov (%p31_p4, %s1425_s30), 0  ;;  %321 = sbr.rel (%p318_p3) target bundleno = 1040 (0x410), region = 48 }
   0xa   : > { %s1200_s15 = smov (!%p318_p3), 127   ;;  %s1201_s16 = smov (!%p318_p3), 1  }
   0xe   : > { %s1429_s25 = smov (!%p387_p5, %s1186_s25), 1  ;;  %s1431_s24 = smov (!%p389_p6, %s1182_s24), 1  ;;  %vm516_vm0 = vcmask 588800   ;;  %v1202_v6 = vmov 0   ;;  %vm480_vm1 = vcmask 121856   ;;  %vm489_vm2 = vcmask 1043456  }
   0xf   : > { %s1102_s8 = smul.u32 6, %s1429_s25  ;;  %1149 = vset.pattern.permute.xlu1 %v1202_v6  ;;  %1148 = vset.pattern.permute.xlu0 %v1202_v6  ;;  %vm469_vm3 = vcmask 7168   ;;  %vm818_vm5 = vcmask 125952  }
  0x10   : > { %s1101_s9 = smul.u32 3, %s1431_s24  ;;  %vm1323_vm4 = vmneg %vm469_vm3 }
  0x11   : > { %s1293_s17 = smul.u32 12, %s1429_s25 }
  0x12   : > { %s1273_s10 = sadd.s32 %s1102_s8, %s1101_s9  ;;  %s1305_s21 = smul.u32 24, %s1429_s25 }
  0x13   : > { %s994_s11 = sshll.u32 %s1273_s10, 2  ;;  %s1301_s20 = scalar_lea.vmem %s1409_s1, %s1293_s17 }
  0x14   : > { %s395_s14 = scalar_lea.vmem %s1408_s0, %s994_s11  ;;  %v1154_v5 = vld [vmem:[%s1301_s20] sm:$0xff]   ;;  %s405_s24 = scalar_lea.vmem %s1410_s2, %s1305_s21  ;;  %v1155_v22 = vld [vmem:[%s1301_s20 + $0x8] ss:$0 sps:$4 sm:$0xff]  }
  0x15   : > { %v1281_v0 = vld [vmem:[%s395_s14 + $0x8] sm:$0xf]  ;;  %v1283_v1 = vld [vmem:[%s395_s14] sm:$0xf]  ;;  %v1285_v2 = vld [vmem:[%s395_s14 + $0x4] sm:$0xf]  ;;  %1063 = vmatprep.mubr.msk.bf16.mxu0 %vm516_vm0, %v1154_v5  ;;  %s415_s9 = scalar_lea.vmem %s1412_s4, %s1305_s21  ;;  %s410_s14 = scalar_lea.vmem %s1411_s3, %s1293_s17 }
  0x16   : > { %v1003_v3 = vcombine.low %v1281_v0, %v1281_v0  ;;  %v1002_v4 = vcombine.low %v1283_v1, %v1285_v2  ;;  %v445_v7 = vld [vmem:[%s405_s24] sm:$0xff]  ;;  %v447_v8 = vld [vmem:[%s405_s24 + $0x10] sm:$0xff]  ;;  %v446_v9 = vld [vmem:[%s405_s24 + $0x8] sm:$0xff]  ;;  %v1005_v15 = vcombine.low %v1285_v2, %v1281_v0  ;;  %v1004_v17 = vcombine.low %v1283_v1, %v1283_v1  ;;  %s425_s20 = scalar_lea.vmem %s1414_s6, %s1305_s21  ;;  %s420_s24 = scalar_lea.vmem %s1413_s5, %s1293_s17 }
  0x17   : > { %v450_v39 = vld [vmem:[%s415_s9 + $0x10] sm:$0xff]  ;;  %v1156_v41 = vld [vmem:[%s410_s14] sm:$0xff]   ;;  %v449_v43 = vld [vmem:[%s415_s9 + $0x8] sm:$0xff]  ;;  %v689_v21 = vunpack.c.l.bf16 %v1285_v2  ;;  %s434_s17 = scalar_lea.vmem %s1415_s7, %s994_s11 }
  0x18   : > { %478 = vrot.lane.b32.xlu0 %v1003_v3, %s1200_s15  ;;  %467 = vrot.lane.b32.xlu1 %v1003_v3, %s1201_s16  ;;  %v448_v44 = vld [vmem:[%s415_s9] sm:$0xff]  ;;  %v1157_v54 = vld [vmem:[%s410_s14 + $0x8] ss:$0 sps:$4 sm:$0xff]  }
  0x19   : > { %1077 = vmatprep.mubr.msk.bf16.mxu1 %vm516_vm0, %v1156_v41 }
  0x1c   : > { %476 = vrot.lane.b32.xlu0 %v1002_v4, %s1200_s15  ;;  %465 = vrot.lane.b32.xlu1 %v1002_v4, %s1201_s16 }
  0x20   : > { %495 = vperm.xlu1 %1149, %v445_v7   ;;  %505 = vperm.xlu0 %1148, %v447_v8  }
  0x24   : > { %500 = vperm.xlu1 %1149, %v446_v9  }
  0x8a   : > { %v479_v10 = vpop.permute.xlu0 %478  ;;  %v468_v13 = vpop.permute.xlu1 %467 }
  0x8b   : > { %v485_v11 = vsel %vm480_vm1, %v479_v10, 0  ;;  %v475_v18 = vsel %vm469_vm3, 0, %v468_v13  ;;  %v451_v10 = vld [vmem:[%s425_s20] sm:$0xff] }
  0x8c   : > { %1095 = vmatprep.subr.msk.bf16.mxu0 %vm489_vm2, %v485_v11  ;;  %v523_v12 = vsel %vm489_vm2, %v485_v11, 0  ;;  %v491_v19 = vsel %vm489_vm2, %v475_v18, %v1004_v17 }
  0x8d   : > { %1054 = vmatpush3.bf16.msra.mxu0 %v523_v12  ;;  %v1158_v12 = vld [vmem:[%s420_s24] sm:$0xff]  }
  0x8e   : > { %v477_v14 = vpop.permute.xlu0 %476  ;;  %v466_v20 = vpop.permute.xlu1 %465 }
  0x8f   : > { %1096 = vmatprep.subr.msk.bf16.mxu0 %vm480_vm1, %v477_v14  ;;  %v482_v16 = vsel %vm480_vm1, %v477_v14, 0  ;;  %v453_v14 = vld [vmem:[%s425_s20 + $0x10] sm:$0xff] }
  0x91   : > { %1056 = vmatpush3.bf16.msra.mxu0 %v482_v16 }
  0x92   : > { %1057 = vmatprep.subr.bf16.mxu0 %v1005_v15 }
  0x95   : > { %1058 = vmatpush3.bf16.msra.mxu0 %v1005_v15  ;;  %v452_v15 = vld [vmem:[%s425_s20 + $0x8] sm:$0xff] }
  0x96   : > { %1059 = vmatprep.subr.bf16.mxu0 %v491_v19 }
  0x99   : > { %1060 = vmatpush3.bf16.msra.mxu0 %v491_v19 }
  0x9a   : > { %1061 = vmatprep.subr.msk.bf16.mxu0 %vm1323_vm4, %v466_v20 }
  0x9b   : > { %v506_v23 = vpop.permute.xlu0 %505  ;;  %v496_v24 = vpop.permute.xlu1 %495 }
  0x9d   : > { %1062 = vmatpush3.bf16.msk.msra.mxu0 %vm1323_vm4, %v466_v20 }
  0x9f   : > { %v501_v32 = vpop.permute.xlu1 %500 }
  0xa0   : > { %1064 = vmatmul.mubr.msk.bf16.vlgmr.msra.gmra.mxu0 %vm516_vm0, %v1155_v22 }
  0xa1   : > { %1091 = vmatprep.mubr.msk.bf16.mxu0 %vm516_vm0, %v1158_v12 }
 0x160   : > { %v1065_v25 = vpop.f32.mrf.mxu0 }
 0x161   : > { %v568_v26 = vadd.f32 %v1065_v25, %v506_v23 }
 0x162   : > { %v559_v27 = vpop.f32.mrf.mxu0 }
 0x163   : > { %v575_v28 = vmax.f32 %v568_v26, 0.0  ;;  %v560_v31 = vadd.f32 %v559_v27, %v496_v24  ;;  %v1159_v26 = vld [vmem:[%s420_s24 + $0x8] ss:$0 sps:$4 sm:$0xff]  }
 0x164   : > { %v1066_v29 = vpop.f32.mrf.mxu0 }
 0x165   : > { %v577_v30 = vpack.c.bf16 %v575_v28, %v575_v28  ;;  %v573_v35 = vmax.f32 %v560_v31, 0.0  ;;  %v690_v28 = vunpack.c.l.bf16 %v1281_v0 }
 0x166   : > { %v562_v33 = vpop.f32.mrf.mxu0 }
 0x167   : > { %v563_v34 = vadd.f32 %v562_v33, %v501_v32  ;;  %591 = vrot.lane.b32.xlu0 %v577_v30, %s1200_s15  ;;  %v600_v38 = vrot.slane %v577_v30, 4  ;;  %v688_v32 = vunpack.c.l.bf16 %v1283_v1 }
 0x169   : > { %v574_v36 = vmax.f32 %v563_v34, 0.0 }
 0x16b   : > { %v576_v37 = vpack.c.bf16 %v574_v36, %v573_v35  ;;  %582 = vrot.lane.b32.xlu0 %v577_v30, %s1201_s16 }
 0x16d   : > { %589 = vrot.lane.b32.xlu1 %v576_v37, %s1200_s15  ;;  %v599_v40 = vrot.slane %v576_v37, 4 }
 0x16f   : > { %618 = vperm.xlu0 %1148, %v450_v39   ;;  %v601_v42 = vsel %vm489_vm2, %v599_v40, %v600_v38 }
 0x171   : > { %580 = vrot.lane.b32.xlu1 %v576_v37, %s1201_s16 }
 0x173   : > { %613 = vperm.xlu0 %1148, %v449_v43  }
 0x175   : > { %608 = vperm.xlu1 %1149, %v448_v44  }
 0x1d9   : > { %v592_v45 = vpop.permute.xlu0 %591 }
 0x1da   : > { %v597_v46 = vsel %vm480_vm1, %v592_v45, 0 }
 0x1db   : > { %1097 = vmatprep.subr.msk.bf16.mxu1 %vm489_vm2, %v597_v46  ;;  %v635_v47 = vsel %vm489_vm2, %v597_v46, 0 }
 0x1dc   : > { %1068 = vmatpush3.bf16.msra.mxu1 %v635_v47 }
 0x1dd   : > { %v583_v48 = vpop.permute.xlu0 %582 }
 0x1de   : > { %v588_v51 = vsel %vm469_vm3, 0, %v583_v48 }
 0x1df   : > { %v590_v49 = vpop.permute.xlu1 %589  ;;  %v604_v52 = vsel %vm489_vm2, %v588_v51, %v599_v40 }
 0x1e0   : > { %1098 = vmatprep.subr.msk.bf16.mxu1 %vm480_vm1, %v590_v49  ;;  %v594_v50 = vsel %vm480_vm1, %v590_v49, 0 }
 0x1e1   : > { %1070 = vmatpush3.bf16.msra.mxu1 %v594_v50 }
 0x1e2   : > { %1071 = vmatprep.subr.bf16.mxu1 %v601_v42 }
 0x1e3   : > { %v581_v53 = vpop.permute.xlu1 %580 }
 0x1e5   : > { %1072 = vmatpush3.bf16.msra.mxu1 %v601_v42 }
 0x1e6   : > { %1073 = vmatprep.subr.bf16.mxu1 %v604_v52 }
 0x1e9   : > { %1074 = vmatpush3.bf16.msra.mxu1 %v604_v52 }
 0x1ea   : > { %1075 = vmatprep.subr.msk.bf16.mxu1 %vm1323_vm4, %v581_v53  ;;  %v619_v55 = vpop.permute.xlu0 %618 }
 0x1ed   : > { %1076 = vmatpush3.bf16.msk.msra.mxu1 %vm1323_vm4, %v581_v53 }
 0x1ee   : > { %v614_v3 = vpop.permute.xlu0 %613 }
 0x1f0   : > { %1078 = vmatmul.mubr.msk.bf16.vlgmr.msra.gmra.mxu1 %vm516_vm0, %v1157_v54  ;;  %v609_v60 = vpop.permute.xlu1 %608 }
 0x2b0   : > { %v1079_v56 = vpop.f32.mrf.mxu1 }
 0x2b1   : > { %v680_v57 = vadd.f32 %v1079_v56, %v619_v55 }
 0x2b2   : > { %v671_v58 = vpop.f32.mrf.mxu1 }
 0x2b3   : > { %v687_v59 = vmax.f32 %v680_v57, 0.0  ;;  %v672_v63 = vadd.f32 %v671_v58, %v609_v60 }
 0x2b4   : > { %v1080_v61 = vpop.f32.mrf.mxu1 }
 0x2b5   : > { %v692_v62 = vpack.c.bf16 %v687_v59, %v687_v59  ;;  %v685_v6 = vmax.f32 %v672_v63, 0.0 }
 0x2b6   : > { %v674_v4 = vpop.f32.mrf.mxu1 }
 0x2b7   : > { %v675_v5 = vadd.f32 %v674_v4, %v614_v3  ;;  %706 = vrot.lane.b32.xlu1 %v692_v62, %s1200_s15  ;;  %v714_v9 = vrot.slane %v692_v62, 4 }
 0x2b9   : > { %v686_v7 = vmax.f32 %v675_v5, 0.0 }
 0x2bb   : > { %v691_v8 = vpack.c.bf16 %v686_v7, %v685_v6  ;;  %697 = vrot.lane.b32.xlu1 %v692_v62, %s1201_s16 }
 0x2bd   : > { %704 = vrot.lane.b32.xlu0 %v691_v8, %s1200_s15  ;;  %v713_v11 = vrot.slane %v691_v8, 4 }
 0x2bf   : > { %722 = vperm.xlu1 %1149, %v451_v10   ;;  %v715_v13 = vsel %vm489_vm2, %v713_v11, %v714_v9 }
 0x2c1   : > { %695 = vrot.lane.b32.xlu0 %v691_v8, %s1201_s16 }
 0x2c3   : > { %732 = vperm.xlu1 %1149, %v453_v14  }
 0x2c5   : > { %727 = vperm.xlu0 %1148, %v452_v15  }
 0x329   : > { %v707_v16 = vpop.permute.xlu1 %706 }
 0x32a   : > { %v712_v17 = vsel %vm480_vm1, %v707_v16, 0 }
 0x32b   : > { %v749_v18 = vsel %vm489_vm2, %v712_v17, 0  ;;  %1099 = vmatprep.subr.msk.bf16.mxu0 %vm489_vm2, %v712_v17 }
 0x32c   : > { %1082 = vmatpush3.bf16.msra.mxu0 %v749_v18 }
 0x32d   : > { %v698_v19 = vpop.permute.xlu1 %697 }
 0x32e   : > { %v703_v23 = vsel %vm469_vm3, 0, %v698_v19 }
 0x32f   : > { %v705_v20 = vpop.permute.xlu0 %704  ;;  %v718_v24 = vsel %vm489_vm2, %v703_v23, %v713_v11 }
 0x330   : > { %v709_v22 = vsel %vm480_vm1, %v705_v20, 0  ;;  %1100 = vmatprep.subr.msk.bf16.mxu0 %vm480_vm1, %v705_v20 }
 0x331   : > { %1084 = vmatpush3.bf16.msra.mxu0 %v709_v22 }
 0x332   : > { %1085 = vmatprep.subr.bf16.mxu0 %v715_v13 }
 0x333   : > { %v696_v25 = vpop.permute.xlu0 %695 }
 0x335   : > { %1086 = vmatpush3.bf16.msra.mxu0 %v715_v13 }
 0x336   : > { %1087 = vmatprep.subr.bf16.mxu0 %v718_v24 }
 0x339   : > { %1088 = vmatpush3.bf16.msra.mxu0 %v718_v24 }
 0x33a   : > { %1089 = vmatprep.subr.msk.bf16.mxu0 %vm1323_vm4, %v696_v25  ;;  %v723_v27 = vpop.permute.xlu1 %722 }
 0x33d   : > { %1090 = vmatpush3.bf16.msk.msra.mxu0 %vm1323_vm4, %v696_v25 }
 0x33e   : > { %v733_v29 = vpop.permute.xlu1 %732 }
 0x340   : > { %1092 = vmatmul.mubr.msk.bf16.vlgmr.msra.gmra.mxu0 %vm516_vm0, %v1159_v26  ;;  %v728_v39 = vpop.permute.xlu0 %727 }
 0x400   : > { %v1093_v30 = vpop.f32.mrf.mxu0 }
 0x401   : > { %v794_v31 = vadd.f32 %v1093_v30, %v733_v29 }
 0x402   : > { %v785_v33 = vpop.f32.mrf.mxu0 }
 0x403   : > { %v801_v34 = vadd.f32 %v794_v31, %v690_v28  ;;  %v786_v35 = vadd.f32 %v785_v33, %v723_v27 }
 0x404   : > { %v1094_v36 = vpop.f32.mrf.mxu0 }
 0x405   : > { %v804_v37 = vmax.f32 %v801_v34, 0.0  ;;  %v799_v38 = vadd.f32 %v786_v35, %v688_v32 }
 0x406   : > { %v788_v0 = vpop.f32.mrf.mxu0 }
 0x407   : > { %v1031_v40 = vpack.c.bf16 %v804_v37, %v804_v37  ;;  %v802_v41 = vmax.f32 %v799_v38, 0.0  ;;  %v789_v42 = vadd.f32 %v788_v0, %v728_v39 }
 0x409   : > { %821 = vst.msk [vmem:[%s434_s17 + $0x8] sm:$0xf] %vm818_vm5, %v1031_v40  ;;  %v1029_v1 = vpack.c.bf16 %v802_v41, %v802_v41  ;;  %v800_v43 = vadd.f32 %v789_v42, %v689_v21 }
 0x40b   : > { %819 = vst.msk [vmem:[%s434_s17] sm:$0xf] %vm818_vm5, %v1029_v1  ;;  %v803_v44 = vmax.f32 %v800_v43, 0.0 }
 0x40d   : > { %v1030_v45 = vpack.c.bf16 %v803_v44, %v803_v44 }
 0x40f   : > { %820 = vst.msk [vmem:[%s434_s17 + $0x4] sm:$0xf] %vm818_vm5, %v1030_v45 }
 0x410 PF: > { %s17_s28 = sadd.s32 1, %s1198_s28   ;;  %s1418_s24 = smov %s1190_s26 }
 0x411   : > { %p14_p7 = scmp.ge.s32.totalorder %s17_s28, 6   ;;  %s1419_s25 = smov %s1194_s27 }
 0x412   : > { %s1420_s26 = smov %s1423_s29  ;;  %s1421_s27 = smov %s1427_s30 }
 0x413   :  { %16 = sbr.rel (!%p14_p7) target bundleno = 3 (0x3), region = 96 }

// kernel: model_forward.13
= control target key start
LH: loop header
LB: loop body
LE: loop exit
PB: predicated region body
PF: predicated region fallthrough
CT: control target
= control target key end

     0   :  { %s1332_s30 = smov 0   ;;  %s1334_s10 = smov 0   ;;  %s1492_s0 = inlined_call_operand.vmem [shape: bf16[2,2,24,16], index: 0, kind: input, shape index: {}]   ;;  %s1493_s1 = inlined_call_operand.vmem [shape: bf16[2,16,72], index: 1, kind: input, shape index: {}]   ;;  %s1494_s2 = inlined_call_operand.vmem [shape: f32[2,16,1], index: 2, kind: input, shape index: {}]   ;;  %s1495_s3 = inlined_call_operand.vmem [shape: bf16[2,16,48], index: 3, kind: input, shape index: {}]   ;;  %s1496_s4 = inlined_call_operand.vmem [shape: f32[2,16,1], index: 4, kind: input, shape index: {}]   ;;  %s1497_s5 = inlined_call_operand.vmem [shape: bf16[2,16,48], index: 5, kind: input, shape index: {}]   ;;  %s1498_s6 = inlined_call_operand.vmem [shape: f32[2,16,1], index: 6, kind: input, shape index: {}]   ;;  %s1499_s7 = inlined_call_operand.vmem [shape: bf16[2,16,24], index: 7, kind: input, shape index: {}]   ;;  %s1500_s8 = inlined_call_operand.vmem [shape: f32[2,16,1], index: 8, kind: input, shape index: {}]   ;;  %s1501_s9 = inlined_call_operand.vmem [shape: bf16[2,2,16,16], index: 9, kind: output, shape index: {}]  }
   0x1   :  { %s1336_s11 = smov 0   ;;  %s1338_s12 = smov 0  }
   0x2   :  { %s1340_s13 = smov 0  }
   0x3 LB: > { %s28_s14 = sadd.s32 1, %s1267_s11  ;;  %s31_s15 = sadd.s32 1, %s1271_s12  ;;  %s1275_s13 = sphi %s1340_s13, %s19_s13   ;;  %s1271_s12 = sphi %s1338_s12, %s1507_s12   ;;  %s1267_s11 = sphi %s1336_s11, %s1506_s11   ;;  %s1263_s10 = sphi %s1334_s10, %s1505_s10   ;;  %s1259_s30 = sphi %s1332_s30, %s1504_s30  }
   0x4   : > { %p29_p0 = scmp.ge.s32.totalorder %s28_s14, 2  ;;  %p1068_p1 = scmp.ge.s32.totalorder %s1275_s13, 1 }
   0x5   : > { %p387_p2 = scmp.lt.s32.totalorder %s1275_s13, 5 }
   0x6   : > { %s1509_s14 = smov (%p29_p0, %s28_s14), 0  ;;  %s1511_s15 = smov (!%p29_p0, %s31_s15), %s1271_s12 }
   0x7   : > { %p388_p3 = pnand %p1068_p1, %p387_p2  ;;  %p33_p4 = scmp.ge.s32.totalorder %s1511_s15, 2 }
   0x8   : > { %p471_p5 = scmp.lt.s32.totalorder (!%p388_p3), %s1263_s10, 1  ;;  %p473_p6 = scmp.lt.s32.totalorder (!%p388_p3), %s1259_s30, 1 }
   0x9   : > { %s1513_s15 = smov (%p33_p4, %s1511_s15), 0  ;;  %391 = sbr.rel (%p388_p3) target bundleno = 1026 (0x402), region = 56 }
   0xa   : > { %s1278_s23 = smov (!%p388_p3), 127   ;;  %s1279_s24 = smov (!%p388_p3), 1  }
   0xe   : > { %v1277_v0 = vmov 0.0   ;;  %s1515_s10 = smov (!%p471_p5, %s1263_s10), 1  ;;  %s1517_s30 = smov (!%p473_p6, %s1259_s30), 1  ;;  %vm1280_vm0 = vmmov 0   ;;  %v1281_v7 = vmov 0   ;;  %vm572_vm1 = vcmask 121856  }
   0xf   : > { %1138 = vmatprep.subr.bf16.mxu0 %v1277_v0  ;;  %1152 = vmatprep.subr.bf16.mxu1 %v1277_v0  ;;  %s1181_s16 = smul.u32 6, %s1515_s10  ;;  %s1386_s25 = sshll.u32 %s1515_s10, 3  ;;  %vm581_vm2 = vcmask 1043456   ;;  %vm561_vm3 = vcmask 7168   ;;  %vm600_vm5 = vcmask 588800   ;;  %vm676_vm6 = vcmask 392192  }
  0x10   : > { %s1180_s17 = smul.u32 3, %s1517_s30  ;;  %s484_s28 = scalar_lea.vmem %s1493_s1, %s1386_s25  ;;  %1148 = vmatprep.mubr.msk.bf16.mxu0 %vm1280_vm0, %v1277_v0  ;;  %1158 = vmatprep.mubr.msk.bf16.mxu1 %vm1280_vm0, %v1277_v0  ;;  %vm1410_vm4 = vmneg %vm561_vm3  ;;  %vm739_vm7 = vcmask 195584   ;;  %vm870_vm8 = vcmask 125952  }
  0x11   : > { %s1397_s29 = sshll.u32 %s1515_s10, 4  ;;  %1227 = vset.pattern.permute.xlu0 %v1281_v7  ;;  %1228 = vset.pattern.permute.xlu1 %v1281_v7  ;;  %v1233_v21 = vld [vmem:[%s484_s28] sm:$0xff]   ;;  %s494_s26 = scalar_lea.vmem %s1495_s3, %s1386_s25 }
  0x12   : > { %s477_s18 = sadd.s32 %s1181_s16, %s1180_s17  ;;  %s499_s16 = scalar_lea.vmem %s1496_s4, %s1397_s29  ;;  %v1234_v38 = vld [vmem:[%s494_s26] sm:$0xff]  }
  0x13   : > { %s1069_s19 = sshll.u32 %s477_s18, 2  ;;  %s489_s18 = scalar_lea.vmem %s1494_s2, %s1397_s29  ;;  %v539_v33 = vld [vmem:[%s499_s16 + $0x8] sm:$0xff]  ;;  %v538_v34 = vld [vmem:[%s499_s16] sm:$0xff] }
  0x14   : > { %s479_s22 = scalar_lea.vmem %s1492_s0, %s1069_s19  ;;  %v536_v8 = vld [vmem:[%s489_s18] sm:$0xff]  ;;  %v537_v9 = vld [vmem:[%s489_s18 + $0x8] sm:$0xff]  ;;  %s514_s19 = scalar_lea.vmem %s1499_s7, %s1386_s25 }
  0x15   : > { %v548_v1 = vld [vmem:[%s479_s22 + $0x8] sm:$0xf]  ;;  %v546_v2 = vld [vmem:[%s479_s22] sm:$0xf]  ;;  %v547_v3 = vld [vmem:[%s479_s22 + $0x4] sm:$0xf]  ;;  %s504_s22 = scalar_lea.vmem %s1497_s5, %s1386_s25  ;;  %s519_s28 = scalar_lea.vmem %s1500_s8, %s1397_s29 }
  0x16   : > { %v1373_v4 = vcombine.low %v548_v1, %v548_v1  ;;  %v1092_v5 = vcombine.low %v547_v3, %v548_v1  ;;  %v1377_v6 = vcombine.low %v546_v2, %v547_v3  ;;  %v1091_v16 = vcombine.low %v546_v2, %v546_v2  ;;  %v1235_v40 = vld [vmem:[%s514_s19] sm:$0xff]   ;;  %v545_v54 = vld [vmem:[%s519_s28 + $0x8] sm:$0xff]  ;;  %s509_s18 = scalar_lea.vmem %s1498_s6, %s1397_s29 }
  0x17   : > { %v544_v55 = vld [vmem:[%s519_s28] sm:$0xff]  ;;  %v541_v58 = vld [vmem:[%s509_s18 + $0x8] sm:$0xff] }
  0x18   : > { %570 = vrot.lane.b32.xlu0 %v1373_v4, %s1278_s23  ;;  %559 = vrot.lane.b32.xlu1 %v1373_v4, %s1279_s24  ;;  %v744_v39 = vsel %vm581_vm2, %v1373_v4, 0  ;;  %v540_v59 = vld [vmem:[%s509_s18] sm:$0xff] }
  0x19   : > { %v1236_v63 = vld [vmem:[%s504_s22] sm:$0xff]  }
  0x1c   : > { %568 = vrot.lane.b32.xlu0 %v1377_v6, %s1278_s23  ;;  %557 = vrot.lane.b32.xlu1 %v1377_v6, %s1279_s24 }
  0x20   : > { %587 = vperm.xlu0 %1227, %v536_v8   ;;  %592 = vperm.xlu1 %1228, %v537_v9  }
  0x8a   : > { %v571_v10 = vpop.permute.xlu0 %570  ;;  %v560_v15 = vpop.permute.xlu1 %559 }
  0x8b   : > { %v577_v11 = vsel %vm572_vm1, %v571_v10, 0  ;;  %v567_v17 = vsel %vm561_vm3, 0, %v560_v15 }
  0x8c   : > { %v604_v12 = vsel %vm581_vm2, %v577_v11, 0  ;;  %v583_v18 = vsel %vm581_vm2, %v567_v17, %v1091_v16 }
  0x8d   : > { %1139 = vmatpush3.bf16.msra.mxu0 %v604_v12 }
  0x8e   : > { %v569_v13 = vpop.permute.xlu0 %568  ;;  %1140 = vmatprep.subr.bf16.mxu0 %v1277_v0  ;;  %v558_v20 = vpop.permute.xlu1 %557 }
  0x8f   : > { %v574_v14 = vsel %vm572_vm1, %v569_v13, 0 }
  0x91   : > { %1141 = vmatpush3.bf16.msra.mxu0 %v574_v14 }
  0x92   : > { %1142 = vmatprep.subr.bf16.mxu0 %v1277_v0 }
  0x95   : > { %1143 = vmatpush3.bf16.msra.mxu0 %v1092_v5 }
  0x96   : > { %1144 = vmatprep.subr.bf16.mxu0 %v1277_v0 }
  0x99   : > { %1145 = vmatpush3.bf16.msra.mxu0 %v583_v18 }
  0x9a   : > { %1146 = vmatprep.subr.bf16.mxu0 %v1277_v0 }
  0x9b   : > { %v588_v23 = vpop.permute.xlu0 %587  ;;  %v593_v25 = vpop.permute.xlu1 %592 }
  0x9d   : > { %1147 = vmatpush3.bf16.msk.msra.mxu0 %vm1410_vm4, %v558_v20 }
  0x9e   : > { %1170 = vmatprep.subr.bf16.mxu0 %v1277_v0 }
  0xa0   : > { %1149 = vmatmul.mubr.msk.bf16.vlgmr.msra.gmra.mxu0 %vm600_vm5, %v1233_v21 }
  0xa1   : > { %1176 = vmatprep.mubr.msk.bf16.mxu0 %vm1280_vm0, %v1277_v0 }
 0x160   : > { %v640_v22 = vpop.f32.mrf.mxu0 }
 0x161   : > { %v641_v26 = vadd.f32 %v640_v22, %v588_v23 }
 0x162   : > { %v1150_v24 = vpop.f32.mrf.mxu0 }
 0x163   : > { %v647_v30 = vmax.f32 %v641_v26, 0.0 }
 0x164   : > { %v643_v27 = vpop.f32.mrf.mxu0 }
 0x165   : > { %v644_v28 = vadd.f32 %v643_v27, %v593_v25 }
 0x166   : > { %v1151_v29 = vpop.f32.mrf.mxu0 }
 0x167   : > { %v648_v31 = vmax.f32 %v644_v28, 0.0 }
 0x169   : > { %v649_v32 = vpack.c.bf16 %v648_v31, %v647_v30 }
 0x16b   : > { %651 = vrot.lane.b32.xlu0 %v649_v32, %s1279_s24  ;;  %656 = vrot.lane.b32.xlu1 %v649_v32, %s1278_s23 }
 0x16f   : > { %668 = vperm.xlu0 %1227, %v539_v33   ;;  %663 = vperm.xlu1 %1228, %v538_v34  }
 0x1dd   : > { %v657_v35 = vpop.permute.xlu1 %656  ;;  %v652_v37 = vpop.permute.xlu0 %651 }
 0x1de   : > { %v659_v36 = vsel %vm572_vm1, %v657_v35, 0 }
 0x1df   : > { %1153 = vmatpush3.bf16.msra.mxu1 %v659_v36 }
 0x1e0   : > { %1154 = vmatprep.subr.bf16.mxu1 %v1277_v0 }
 0x1e3   : > { %1155 = vmatpush3.bf16.msra.mxu1 %v649_v32 }
 0x1e4   : > { %1156 = vmatprep.subr.bf16.mxu1 %v1277_v0 }
 0x1e7   : > { %1157 = vmatpush3.bf16.msk.msra.mxu1 %vm1410_vm4, %v652_v37 }
 0x1e8   : > { %1162 = vmatprep.subr.bf16.mxu1 %v1277_v0 }
 0x1ea   : > { %1159 = vmatmul.mubr.msk.bf16.vlgmr.msra.gmra.mxu1 %vm676_vm6, %v1234_v38  ;;  %v664_v42 = vpop.permute.xlu1 %663  ;;  %v669_v45 = vpop.permute.xlu0 %668 }
 0x1eb   : > { %1163 = vmatpush3.bf16.msra.mxu1 %v744_v39  ;;  %1166 = vmatprep.mubr.msk.bf16.mxu1 %vm1280_vm0, %v1277_v0 }
 0x1ec   : > { %1164 = vmatprep.subr.bf16.mxu1 %v1277_v0 }
 0x1ef   : > { %1165 = vmatpush3.bf16.msra.mxu1 %v1377_v6 }
 0x1f2   : > { %1167 = vmatmul.mubr.msk.bf16.vlgmr.msra.gmra.mxu1 %vm739_vm7, %v1235_v40 }
 0x2aa   : > { %v714_v41 = vpop.f32.mrf.mxu1 }
 0x2ab   : > { %v715_v44 = vadd.f32 %v714_v41, %v664_v42 }
 0x2ac   : > { %v1160_v43 = vpop.f32.mrf.mxu1 }
 0x2ad   : > { %v721_v49 = vmax.f32 %v715_v44, 0.0 }
 0x2ae   : > { %v717_v46 = vpop.f32.mrf.mxu1 }
 0x2af   : > { %v718_v47 = vadd.f32 %v717_v46, %v669_v45 }
 0x2b0   : > { %v1161_v48 = vpop.f32.mrf.mxu1 }
 0x2b1   : > { %v722_v50 = vmax.f32 %v718_v47, 0.0 }
 0x2b2   : > { %v780_v51 = vpop.f32.mrf.mxu1 }
 0x2b3   : > { %v787_v52 = vpack.c.bf16 %v722_v50, %v721_v49 }
 0x2b4   : > { %v1168_v53 = vpop.f32.mrf.mxu1 }
 0x2b5   : > { %789 = vrot.lane.b32.xlu0 %v787_v52, %s1279_s24  ;;  %794 = vrot.lane.b32.xlu1 %v787_v52, %s1278_s23  ;;  %s1086_s23 = sshll.u32 %s1517_s30, 1  ;;  %s1087_s24 = sshll.u32 %s1515_s10, 2 }
 0x2b6   : > { %v783_v56 = vpop.f32.mrf.mxu1  ;;  %s526_s25 = sadd.s32 %s1087_s24, %s1086_s23 }
 0x2b7   : > { %s1088_s29 = sshll.u32 %s526_s25, 2 }
 0x2b8   : > { %v1169_v57 = vpop.f32.mrf.mxu1  ;;  %s528_s21 = scalar_lea.vmem %s1501_s9, %s1088_s29 }
 0x2b9   : > { %730 = vperm.xlu0 %1227, %v545_v54   ;;  %725 = vperm.xlu1 %1228, %v544_v55  }
 0x2bd   : > { %806 = vperm.xlu0 %1227, %v541_v58   ;;  %801 = vperm.xlu1 %1228, %v540_v59  }
 0x327   : > { %v795_v60 = vpop.permute.xlu1 %794  ;;  %v790_v62 = vpop.permute.xlu0 %789 }
 0x328   : > { %v797_v61 = vsel %vm572_vm1, %v795_v60, 0 }
 0x329   : > { %1171 = vmatpush3.bf16.msra.mxu0 %v797_v61 }
 0x32a   : > { %1172 = vmatprep.subr.bf16.mxu0 %v1277_v0 }
 0x32d   : > { %1173 = vmatpush3.bf16.msra.mxu0 %v787_v52 }
 0x32e   : > { %1174 = vmatprep.subr.bf16.mxu0 %v1277_v0 }
 0x331   : > { %1175 = vmatpush3.bf16.msk.msra.mxu0 %vm1410_vm4, %v790_v62 }
 0x334   : > { %1177 = vmatmul.mubr.msk.bf16.vlgmr.msra.gmra.mxu0 %vm676_vm6, %v1236_v63  ;;  %v726_v1 = vpop.permute.xlu1 %725  ;;  %v731_v2 = vpop.permute.xlu0 %730 }
 0x335   : > { %v781_v5 = vadd.f32 %v780_v51, %v726_v1  ;;  %v784_v10 = vadd.f32 %v783_v56, %v731_v2 }
 0x338   : > { %v802_v3 = vpop.permute.xlu1 %801  ;;  %v807_v0 = vpop.permute.xlu0 %806 }
 0x3f4   : > { %v851_v4 = vpop.f32.mrf.mxu0 }
 0x3f5   : > { %v852_v6 = vadd.f32 %v851_v4, %v802_v3 }
 0x3f6   : > { %v1178_v7 = vpop.f32.mrf.mxu0 }
 0x3f7   : > { %v858_v8 = vadd.f32 %v852_v6, %v781_v5 }
 0x3f8   : > { %v854_v9 = vpop.f32.mrf.mxu0 }
 0x3f9   : > { %v860_v11 = vmax.f32 %v858_v8, 0.0  ;;  %v855_v12 = vadd.f32 %v854_v9, %v807_v0 }
 0x3fa   : > { %v1179_v13 = vpop.f32.mrf.mxu0 }
 0x3fb   : > { %v1119_v14 = vpack.c.bf16 %v860_v11, %v860_v11  ;;  %v859_v15 = vadd.f32 %v855_v12, %v784_v10 }
 0x3fd   : > { %871 = vst.msk [vmem:[%s528_s21] sm:$0xf] %vm870_vm8, %v1119_v14  ;;  %v861_v16 = vmax.f32 %v859_v15, 0.0 }
 0x3ff   : > { %v1120_v17 = vpack.c.bf16 %v861_v16, %v861_v16 }
 0x401   : > { %872 = vst.msk [vmem:[%s528_s21 + $0x4] sm:$0xf] %vm870_vm8, %v1120_v17 }
 0x402 PF: > { %s19_s13 = sadd.s32 1, %s1275_s13   ;;  %s1504_s30 = smov %s1267_s11 }
 0x403   : > { %p16_p7 = scmp.ge.s32.totalorder %s19_s13, 6   ;;  %s1505_s10 = smov %s1271_s12 }
 0x404   : > { %s1506_s11 = smov %s1509_s14  ;;  %s1507_s12 = smov %s1513_s15 }
 0x405   :  { %18 = sbr.rel (!%p16_p7) target bundleno = 3 (0x3), region = 110 }

// kernel: model_forward.14
= control target key start
LH: loop header
LB: loop body
LE: loop exit
PB: predicated region body
PF: predicated region fallthrough
CT: control target
= control target key end

     0   :  { %s1006_s30 = smov 0   ;;  %s1008_s10 = smov 0   ;;  %s1156_s0 = inlined_call_operand.vmem [shape: bf16[2,2,16,16], index: 0, kind: input, shape index: {}]   ;;  %s1157_s1 = inlined_call_operand.vmem [shape: bf16[16,96], index: 1, kind: input, shape index: {}]   ;;  %s1158_s2 = inlined_call_operand.vmem [shape: f32[16,1], index: 2, kind: input, shape index: {}]   ;;  %s1159_s3 = inlined_call_operand.vmem [shape: bf16[16,48], index: 3, kind: input, shape index: {}]   ;;  %s1160_s4 = inlined_call_operand.vmem [shape: f32[16,1], index: 4, kind: input, shape index: {}]   ;;  %s1161_s5 = inlined_call_operand.vmem [shape: bf16[16,48], index: 5, kind: input, shape index: {}]   ;;  %s1162_s6 = inlined_call_operand.vmem [shape: f32[16,1], index: 6, kind: input, shape index: {}]   ;;  %s1163_s7 = inlined_call_operand.vmem [shape: bf16[16,32], index: 7, kind: input, shape index: {}]   ;;  %s1164_s8 = inlined_call_operand.vmem [shape: f32[16,1], index: 8, kind: input, shape index: {}]   ;;  %s1165_s9 = inlined_call_operand.vmem [shape: bf16[2,16,16], index: 9, kind: output, shape index: {}]  }
   0x1   :  { %s1010_s11 = smov 0  }
   0x2 LB: > { %s789_s12 = sadd.s32 4294967295, %s949_s11   ;;  %s1023_s13 = sadd.s32 1, %s949_s11   ;;  %s949_s11 = sphi %s1010_s11, %s1170_s11   ;;  %s945_s10 = sphi %s1008_s10, %s1169_s10   ;;  %s941_s30 = sphi %s1006_s30, %s1168_s30  }
   0x3   : > { %s23_s14 = ssub.s32 %s949_s11, %s1023_s13  ;;  %s26_s15 = sadd.s32 1, %s945_s10 }
   0x4   : > { %p24_p0 = scmp.eq.s32.totalorder %s23_s14, 0  ;;  %p33_p1 = scmp.ne.s32.totalorder %s945_s10, %s941_s30 }
   0x5   : > { %p34_p2 = scmp.eq.s32.totalorder %s949_s11, 0  ;;  %p792_p4 = scmp.ge.s32.totalorder %s949_s11, 2 }
   0x6   : > { %s1032_s16 = scalar_select %p24_p0, %s945_s10, %s26_s15  }
   0x7   : > { %p35_p3 = por %p34_p2, %p33_p1  ;;  %277 = sbr.rel (%p792_p4) target bundleno = 17 (0x11), region = 48 }
   0xc   : > { %280 = sbr.rel (!%p35_p3) target bundleno = 17 (0x11), region = 52  ;;  %s282_s17 = sand.u32 (%p35_p3), 1, %s945_s10  }
   0xd   : > { %s824_s18 = sshll.u32 (%p35_p3), %s949_s11, 3  ;;  %s793_s19 = sshll.u32 (%p35_p3), %s282_s17, 4 }
   0xe   : > { %s287_s22 = scalar_lea.vmem (%p35_p3), %s1156_s0, %s824_s18  ;;  %s284_s23 = scalar_lea.vmem (%p35_p3), [#allocation2], %s793_s19 }
   0xf   : > { %v304_v0 = vld [vmem:[%s287_s22] sm:$0xff] (%p35_p3)   ;;  %v308_v1 = vld [vmem:[%s287_s22 + $0x10] sm:$0xff] (%p35_p3)  }
  0x10   : > { %305 = vst [vmem:[%s284_s23] sm:$0xff] (%p35_p3), %v304_v0   ;;  %309 = vst [vmem:[%s284_s23 + $0x8] sm:$0xff] (%p35_p3), %v308_v1  }
  0x11 PF: > { %p796_p5 = scmp.ge.s32.totalorder %s949_s11, 1  ;;  %p342_p6 = scmp.lt.s32.totalorder %s949_s11, 3 }
  0x13   : > { %p343_p7 = pnand %p796_p5, %p342_p6 }
  0x14   : > { %s349_s24 = sand.u32 (!%p343_p7), 1, %s941_s30   ;;  %s952_s27 = smov (!%p343_p7), 127  }
  0x15   : > { %346 = sbr.rel (%p343_p7) target bundleno = 1033 (0x409), region = 93  ;;  %s797_s25 = sshll.u32 (!%p343_p7), %s349_s24, 4 }
  0x16   : > { %s351_s26 = scalar_lea.vmem (!%p343_p7), [#allocation2], %s797_s25  ;;  %s953_s28 = smov (!%p343_p7), 1  }
  0x17   : > { %p384_p8 = scmp.lt.s32.totalorder (!%p343_p7), %s789_s12, 1 }
  0x1a   : > { %v951_v2 = vmov 0.0   ;;  %v1045_v3 = vld [vmem:[%s351_s26 + $0x8] sm:$0xff]   ;;  %v1047_v4 = vld [vmem:[%s351_s26] sm:$0xff]   ;;  %vm954_vm0 = vmmov 0   ;;  %v955_v7 = vmov 0   ;;  %vm439_vm1 = vcmask 121856  }
  0x1b   : > { %846 = vmatprep.subr.bf16.mxu0 %v951_v2  ;;  %862 = vmatprep.subr.bf16.mxu1 %v951_v2  ;;  %v396_v5 = vld [vmem:[%s1158_s2] sm:$0xff]  ;;  %v397_v6 = vld [vmem:[%s1158_s2 + $0x8] sm:$0xff]  ;;  %vm427_vm2 = vcmask 7168   ;;  %vm461_vm4 = vcmask 785408   ;;  %vm535_vm5 = vcmask 392192   ;;  %vm597_vm6 = vcmask 261120  }
  0x1c   : > { %437 = vrot.lane.b32.xlu0 %v1045_v3, %s952_s27  ;;  %425 = vrot.lane.b32.xlu1 %v1045_v3, %s953_s28  ;;  %vm1075_vm3 = vmneg %vm427_vm2  ;;  %v923_v15 = vld [vmem:[%s1157_s1] sm:$0xff]   ;;  %v399_v27 = vld [vmem:[%s1160_s4 + $0x8] sm:$0xff]  ;;  %s1172_s12 = smov (!%p384_p8, %s789_s12), 1  ;;  %vm725_vm7 = vcmask 125952  }
  0x1d   : > { %858 = vmatprep.mubr.msk.bf16.mxu0 %vm954_vm0, %v951_v2  ;;  %868 = vmatprep.mubr.msk.bf16.mxu1 %vm954_vm0, %v951_v2  ;;  %v398_v28 = vld [vmem:[%s1160_s4] sm:$0xff]  ;;  %v405_v47 = vld [vmem:[%s1164_s8 + $0x8] sm:$0xff]  ;;  %s825_s21 = sshll.u32 %s1172_s12, 3 }
  0x1e   : > { %919 = vset.pattern.permute.xlu0 %v955_v7  ;;  %920 = vset.pattern.permute.xlu1 %v955_v7  ;;  %v924_v32 = vld [vmem:[%s1159_s3] sm:$0xff]   ;;  %v401_v51 = vld [vmem:[%s1162_s6 + $0x8] sm:$0xff]  ;;  %s388_s24 = scalar_lea.vmem %s1165_s9, %s825_s21 }
  0x1f   : > { %v925_v33 = vld [vmem:[%s1163_s7] sm:$0xff]  }
  0x20   : > { %435 = vrot.lane.b32.xlu0 %v1047_v4, %s952_s27  ;;  %423 = vrot.lane.b32.xlu1 %v1047_v4, %s953_s28  ;;  %v404_v48 = vld [vmem:[%s1164_s8] sm:$0xff] }
  0x21   : > { %v400_v52 = vld [vmem:[%s1162_s6] sm:$0xff] }
  0x22   : > { %v926_v56 = vld [vmem:[%s1161_s5] sm:$0xff]  }
  0x24   : > { %448 = vperm.xlu0 %919, %v396_v5   ;;  %453 = vperm.xlu1 %920, %v397_v6  }
  0x8e   : > { %v438_v8 = vpop.permute.xlu0 %437  ;;  %v426_v12 = vpop.permute.xlu1 %425 }
  0x8f   : > { %v444_v9 = vsel %vm439_vm1, %v438_v8, 0 }
  0x90   : > { %847 = vmatpush3.bf16.msra.mxu0 %v444_v9 }
  0x91   : > { %848 = vmatprep.subr.bf16.mxu0 %v951_v2 }
  0x92   : > { %v436_v10 = vpop.permute.xlu0 %435  ;;  %v424_v14 = vpop.permute.xlu1 %423 }
  0x93   : > { %v441_v11 = vsel %vm439_vm1, %v436_v10, 0 }
  0x94   : > { %849 = vmatpush3.bf16.msra.mxu0 %v441_v11 }
  0x95   : > { %850 = vmatprep.subr.bf16.mxu0 %v951_v2 }
  0x98   : > { %851 = vmatpush3.bf16.msra.mxu0 %v1045_v3 }
  0x99   : > { %852 = vmatprep.subr.bf16.mxu0 %v951_v2 }
  0x9c   : > { %853 = vmatpush3.bf16.msra.mxu0 %v1047_v4 }
  0x9d   : > { %854 = vmatprep.subr.bf16.mxu0 %v951_v2 }
  0x9f   : > { %v449_v17 = vpop.permute.xlu0 %448  ;;  %v454_v19 = vpop.permute.xlu1 %453 }
  0xa0   : > { %855 = vmatpush3.bf16.msk.msra.mxu0 %vm1075_vm3, %v426_v12 }
  0xa1   : > { %856 = vmatprep.subr.bf16.mxu0 %v951_v2 }
  0xa4   : > { %857 = vmatpush3.bf16.msk.msra.mxu0 %vm1075_vm3, %v424_v14 }
  0xa7   : > { %859 = vmatmul.mubr.msk.bf16.vlgmr.msra.gmra.mxu0 %vm461_vm4, %v923_v15 }
 0x167   : > { %v499_v16 = vpop.f32.mrf.mxu0 }
 0x168   : > { %v500_v20 = vadd.f32 %v499_v16, %v449_v17 }
 0x169   : > { %v860_v18 = vpop.f32.mrf.mxu0 }
 0x16a   : > { %v506_v24 = vmax.f32 %v500_v20, 0.0 }
 0x16b   : > { %v502_v21 = vpop.f32.mrf.mxu0 }
 0x16c   : > { %v503_v22 = vadd.f32 %v502_v21, %v454_v19 }
 0x16d   : > { %v861_v23 = vpop.f32.mrf.mxu0 }
 0x16e   : > { %v507_v25 = vmax.f32 %v503_v22, 0.0 }
 0x170   : > { %v508_v26 = vpack.c.bf16 %v507_v25, %v506_v24 }
 0x172   : > { %510 = vrot.lane.b32.xlu0 %v508_v26, %s953_s28  ;;  %515 = vrot.lane.b32.xlu1 %v508_v26, %s952_s27 }
 0x176   : > { %527 = vperm.xlu0 %919, %v399_v27   ;;  %522 = vperm.xlu1 %920, %v398_v28  }
 0x1e4   : > { %v516_v29 = vpop.permute.xlu1 %515  ;;  %v511_v31 = vpop.permute.xlu0 %510 }
 0x1e5   : > { %v518_v30 = vsel %vm439_vm1, %v516_v29, 0 }
 0x1e6   : > { %863 = vmatpush3.bf16.msra.mxu1 %v518_v30 }
 0x1e7   : > { %864 = vmatprep.subr.bf16.mxu1 %v951_v2 }
 0x1ea   : > { %865 = vmatpush3.bf16.msra.mxu1 %v508_v26 }
 0x1eb   : > { %866 = vmatprep.subr.bf16.mxu1 %v951_v2 }
 0x1ee   : > { %867 = vmatpush3.bf16.msk.msra.mxu1 %vm1075_vm3, %v511_v31 }
 0x1ef   : > { %872 = vmatprep.subr.bf16.mxu1 %v951_v2 }
 0x1f1   : > { %869 = vmatmul.mubr.msk.bf16.vlgmr.msra.gmra.mxu1 %vm535_vm5, %v924_v32  ;;  %v523_v35 = vpop.permute.xlu1 %522  ;;  %v528_v38 = vpop.permute.xlu0 %527 }
 0x1f2   : > { %873 = vmatpush3.bf16.msra.mxu1 %v1045_v3  ;;  %876 = vmatprep.mubr.msk.bf16.mxu1 %vm954_vm0, %v951_v2 }
 0x1f3   : > { %874 = vmatprep.subr.bf16.mxu1 %v951_v2 }
 0x1f6   : > { %875 = vmatpush3.bf16.msra.mxu1 %v1047_v4 }
 0x1f7   : > { %880 = vmatprep.subr.bf16.mxu1 %v951_v2 }
 0x1f9   : > { %877 = vmatmul.mubr.msk.bf16.vlgmr.msra.gmra.mxu1 %vm597_vm6, %v925_v33 }
 0x1fa   : > { %886 = vmatprep.mubr.msk.bf16.mxu1 %vm954_vm0, %v951_v2 }
 0x2b1   : > { %v573_v34 = vpop.f32.mrf.mxu1 }
 0x2b2   : > { %v574_v37 = vadd.f32 %v573_v34, %v523_v35 }
 0x2b3   : > { %v870_v36 = vpop.f32.mrf.mxu1 }
 0x2b4   : > { %v580_v42 = vmax.f32 %v574_v37, 0.0 }
 0x2b5   : > { %v576_v39 = vpop.f32.mrf.mxu1 }
 0x2b6   : > { %v577_v40 = vadd.f32 %v576_v39, %v528_v38 }
 0x2b7   : > { %v871_v41 = vpop.f32.mrf.mxu1 }
 0x2b8   : > { %v581_v43 = vmax.f32 %v577_v40, 0.0 }
 0x2b9   : > { %v635_v44 = vpop.f32.mrf.mxu1 }
 0x2ba   : > { %v642_v45 = vpack.c.bf16 %v581_v43, %v580_v42 }
 0x2bb   : > { %v878_v46 = vpop.f32.mrf.mxu1 }
 0x2bc   : > { %644 = vrot.lane.b32.xlu0 %v642_v45, %s953_s28  ;;  %649 = vrot.lane.b32.xlu1 %v642_v45, %s952_s27 }
 0x2bd   : > { %v638_v49 = vpop.f32.mrf.mxu1 }
 0x2bf   : > { %v879_v50 = vpop.f32.mrf.mxu1 }
 0x2c0   : > { %589 = vperm.xlu0 %919, %v405_v47   ;;  %584 = vperm.xlu1 %920, %v404_v48  }
 0x2c4   : > { %661 = vperm.xlu0 %919, %v401_v51   ;;  %656 = vperm.xlu1 %920, %v400_v52  }
 0x32e   : > { %v650_v53 = vpop.permute.xlu1 %649  ;;  %v645_v55 = vpop.permute.xlu0 %644 }
 0x32f   : > { %v652_v54 = vsel %vm439_vm1, %v650_v53, 0 }
 0x330   : > { %881 = vmatpush3.bf16.msra.mxu1 %v652_v54 }
 0x331   : > { %882 = vmatprep.subr.bf16.mxu1 %v951_v2 }
 0x334   : > { %883 = vmatpush3.bf16.msra.mxu1 %v642_v45 }
 0x335   : > { %884 = vmatprep.subr.bf16.mxu1 %v951_v2 }
 0x338   : > { %885 = vmatpush3.bf16.msk.msra.mxu1 %vm1075_vm3, %v645_v55 }
 0x33b   : > { %887 = vmatmul.mubr.msk.bf16.vlgmr.msra.gmra.mxu1 %vm535_vm5, %v926_v56  ;;  %v585_v57 = vpop.permute.xlu1 %584  ;;  %v590_v58 = vpop.permute.xlu0 %589 }
 0x33c   : > { %v636_v61 = vadd.f32 %v635_v44, %v585_v57  ;;  %v639_v3 = vadd.f32 %v638_v49, %v590_v58 }
 0x33f   : > { %v657_v59 = vpop.permute.xlu1 %656  ;;  %v662_v1 = vpop.permute.xlu0 %661 }
 0x3fb   : > { %v706_v60 = vpop.f32.mrf.mxu1 }
 0x3fc   : > { %v707_v62 = vadd.f32 %v706_v60, %v657_v59 }
 0x3fd   : > { %v888_v63 = vpop.f32.mrf.mxu1 }
 0x3fe   : > { %v713_v0 = vadd.f32 %v707_v62, %v636_v61 }
 0x3ff   : > { %v709_v2 = vpop.f32.mrf.mxu1 }
 0x400   : > { %v715_v4 = vmax.f32 %v713_v0, 0.0  ;;  %v710_v5 = vadd.f32 %v709_v2, %v662_v1 }
 0x401   : > { %v889_v6 = vpop.f32.mrf.mxu1 }
 0x402   : > { %v826_v7 = vpack.c.bf16 %v715_v4, %v715_v4  ;;  %v714_v8 = vadd.f32 %v710_v5, %v639_v3 }
 0x404   : > { %726 = vst.msk [vmem:[%s388_s24] sm:$0xf] %vm725_vm7, %v826_v7  ;;  %v716_v9 = vmax.f32 %v714_v8, 0.0 }
 0x406   : > { %v827_v10 = vpack.c.bf16 %v716_v9, %v716_v9 }
 0x408   : > { %727 = vst.msk [vmem:[%s388_s24 + $0x4] sm:$0xf] %vm725_vm7, %v827_v10 }
 0x409 PF: > { %p16_p9 = scmp.ge.s32.totalorder %s1023_s13, 4   ;;  %s1168_s30 = smov %s945_s10 }
 0x40a   : > { %s1169_s10 = smov %s1032_s16  ;;  %s1170_s11 = smov %s1023_s13 }
 0x40b   :  { %18 = sbr.rel (!%p16_p9) target bundleno = 2 (0x2), region = 133 }

// kernel: model_forward.15
= control target key start
LH: loop header
LB: loop body
LE: loop exit
PB: predicated region body
PF: predicated region fallthrough
CT: control target
= control target key end

     0   :  { %v293_v6 = vmov 1966171168   ;;  %v66_v8 = vlaneseq  ;;  %v294_v26 = vmov 0.0   ;;  %s372_s1 = inlined_call_operand.vmem [shape: bf16[256,128], index: 1, kind: input, shape index: {}]   ;;  %s373_s0 = inlined_call_operand.vmem [shape: bf16[2,256], index: 0, kind: input, shape index: {}]   ;;  %s374_s2 = inlined_call_operand.vmem [shape: f32[1,128], index: 2, kind: input, shape index: {}]   ;;  %s375_s3 = inlined_call_operand.vmem [shape: f32[2,128], index: 3, kind: output, shape index: {}]  }
   0x1   :  { %v277_v0 = vld [vmem:[%s372_s1 + $0x78] sm:$0xff]   ;;  %v279_v2 = vld [vmem:[%s372_s1 + $0x70] sm:$0xff]   ;;  %v281_v4 = vld [vmem:[%s372_s1 + $0x68] sm:$0xff]   ;;  %v64_v7 = vunpack.c.l.s4 %v293_v6  ;;  %19 = vst [vmem:[#allocation2] sm:$0x3] %v294_v26 }
   0x2   :  { %v278_v1 = vld [vmem:[%s372_s1 + $0x38] sm:$0xff]   ;;  %253 = vmatprep.subr.bf16.mxu0 %v277_v0  ;;  %v280_v3 = vld [vmem:[%s372_s1 + $0x30] sm:$0xff]   ;;  %v282_v5 = vld [vmem:[%s372_s1 + $0x28] sm:$0xff]   ;;  %v67_v12 = vshrl.u32 %v66_v8, 7 }
   0x3   :  { %254 = vmatpush3.bf16.msra.mxu0 %v278_v1  ;;  %v283_v9 = vld [vmem:[%s372_s1 + $0x60] sm:$0xff]   ;;  %v65_v11 = vunpack.c.0.s8 %v64_v7  ;;  %v285_v13 = vld [vmem:[%s372_s1 + $0x58] sm:$0xff]   ;;  %v287_v16 = vld [vmem:[%s372_s1 + $0x50] sm:$0xff]  }
   0x4   :  { %255 = vmatprep.subr.bf16.mxu0 %v279_v2  ;;  %v284_v10 = vld [vmem:[%s372_s1 + $0x20] sm:$0xff]   ;;  %v286_v14 = vld [vmem:[%s372_s1 + $0x18] sm:$0xff]   ;;  %v288_v19 = vld [vmem:[%s372_s1 + $0x10] sm:$0xff]  }
   0x5   :  { %v68_v15 = vsub.s32 %v65_v11, %v67_v12  ;;  %v235_v17 = vld.sshfl [vmem:[%s373_s0] sm:$0x11 pattern:$0x75316420]  ;;  %v289_v21 = vld [vmem:[%s372_s1 + $0x48] sm:$0xff]  }
   0x6   :  { %v62_v18 = vcombine.high %v235_v17, %v235_v17  ;;  %v290_v22 = vld [vmem:[%s372_s1 + $0x8] sm:$0xff]   ;;  %v291_v23 = vld [vmem:[%s372_s1 + $0x40] sm:$0xff]  }
   0x7   :  { %256 = vmatpush3.bf16.msra.mxu0 %v280_v3  ;;  %v292_v24 = vld [vmem:[%s372_s1] sm:$0xff]   ;;  %v69_v25 = vrot.slane %v235_v17, %v68_v15 }
   0x8   :  { %257 = vmatprep.subr.bf16.mxu0 %v281_v4  ;;  %v76_v20 = vrot.slane %v62_v18, %v68_v15  ;;  %v20_v28 = vld [vmem:[#allocation2] sm:$0x3] }
   0x9   :  { %v252_v34 = vld [vmem:[%s374_s2] ss:$0 sm:$0xff] }
   0xa   :  { %207 = vmatprep.mubr.bf16.mxu0 %v76_v20 }
   0xb   :  { %258 = vmatpush3.bf16.msra.mxu0 %v282_v5 }
   0xc   :  { %259 = vmatprep.subr.bf16.mxu0 %v283_v9 }
   0xf   :  { %260 = vmatpush3.bf16.msra.mxu0 %v284_v10 }
  0x10   :  { %261 = vmatprep.subr.bf16.mxu0 %v285_v13 }
  0x13   :  { %262 = vmatpush3.bf16.msra.mxu0 %v286_v14 }
  0x14   :  { %263 = vmatprep.subr.bf16.mxu0 %v287_v16 }
  0x17   :  { %264 = vmatpush3.bf16.msra.mxu0 %v288_v19 }
  0x18   :  { %265 = vmatprep.subr.bf16.mxu0 %v289_v21 }
  0x1b   :  { %266 = vmatpush3.bf16.msra.mxu0 %v290_v22 }
  0x1c   :  { %267 = vmatprep.subr.bf16.mxu0 %v291_v23 }
  0x1f   :  { %268 = vmatpush3.bf16.msra.mxu0 %v292_v24 }
  0x22   :  { %208 = vmatmul.mubr.bf16.vlgmr.msra.gmra.mxu0 %v69_v25 }
  0xe2   :  { %v269_v27 = vpop.f32.mrf.mxu0 }
  0xe4   :  { %v270_v29 = vpop.f32.mrf.mxu0 }
  0xe5   :  { %v271_v30 = vadd.f32 %v270_v29, %v269_v27 }
  0xe6   :  { %v272_v31 = vpop.f32.mrf.mxu0 }
  0xe7   :  { %v215_v32 = vadd.f32 %v271_v30, %v20_v28 }
  0xe8   :  { %v273_v33 = vpop.f32.mrf.mxu0 }
  0xe9   :  { %216 = vst [vmem:[#allocation2] sm:$0x3] %v215_v32 }
  0xf0   :  { %v220_v35 = vld [vmem:[#allocation2] sm:$0x3] }
  0xf1   :  { %v228_v36 = vadd.f32 %v252_v34, %v220_v35 }
  0xf3   :  { %v229_v37 = vmax.f32 %v228_v36, 0.0 }
  0xf5   :  { %230 = vst [vmem:[%s375_s3] sm:$0x3] %v229_v37 }

// kernel: model_forward.16
= control target key start
LH: loop header
LB: loop body
LE: loop exit
PB: predicated region body
PF: predicated region fallthrough
CT: control target
= control target key end

     0   :  { %v194_v0 = vmov 0.0   ;;  %vm195_vm0 = vmmov 0   ;;  %s249_s1 = inlined_call_operand.vmem [shape: bf16[128,128], index: 1, kind: input, shape index: {}]   ;;  %s250_s0 = inlined_call_operand.vmem [shape: bf16[2,128], index: 0, kind: input, shape index: {}]   ;;  %s251_s2 = inlined_call_operand.vmem [shape: f32[1,128], index: 2, kind: input, shape index: {}]   ;;  %s252_s3 = inlined_call_operand.vmem [shape: f32[2,128], index: 3, kind: output, shape index: {}]  }
   0x1   :  { %164 = vmatprep.subr.bf16.mxu0 %v194_v0  ;;  %19 = vst [vmem:[#allocation2] sm:$0x3] %v194_v0  ;;  %v186_v1 = vld [vmem:[%s249_s1 + $0x38] sm:$0xff]   ;;  %180 = vmatprep.mubr.msk.bf16.mxu0 %vm195_vm0, %v194_v0  ;;  %v187_v2 = vld [vmem:[%s249_s1 + $0x30] sm:$0xff]   ;;  %v188_v3 = vld [vmem:[%s249_s1 + $0x28] sm:$0xff]  }
   0x2   :  { %165 = vmatpush3.bf16.msra.mxu0 %v186_v1  ;;  %v189_v4 = vld [vmem:[%s249_s1 + $0x20] sm:$0xff]   ;;  %v190_v5 = vld [vmem:[%s249_s1 + $0x18] sm:$0xff]   ;;  %v191_v6 = vld [vmem:[%s249_s1 + $0x10] sm:$0xff]  }
   0x3   :  { %166 = vmatprep.subr.bf16.mxu0 %v194_v0  ;;  %v192_v7 = vld [vmem:[%s249_s1 + $0x8] sm:$0xff]   ;;  %v193_v8 = vld [vmem:[%s249_s1] sm:$0xff]  }
   0x4   :  { %v21_v9 = vld [vmem:[%s250_s0] sm:$0x1] }
   0x5   :  { %v154_v16 = vld [vmem:[%s251_s2] ss:$0 sm:$0xff] }
   0x6   :  { %167 = vmatpush3.bf16.msra.mxu0 %v187_v2 }
   0x7   :  { %168 = vmatprep.subr.bf16.mxu0 %v194_v0 }
   0x8   :  { %v20_v10 = vld [vmem:[#allocation2] sm:$0x3] }
   0xa   :  { %169 = vmatpush3.bf16.msra.mxu0 %v188_v3 }
   0xb   :  { %170 = vmatprep.subr.bf16.mxu0 %v194_v0 }
   0xe   :  { %171 = vmatpush3.bf16.msra.mxu0 %v189_v4 }
   0xf   :  { %172 = vmatprep.subr.bf16.mxu0 %v194_v0 }
  0x12   :  { %173 = vmatpush3.bf16.msra.mxu0 %v190_v5 }
  0x13   :  { %174 = vmatprep.subr.bf16.mxu0 %v194_v0 }
  0x16   :  { %175 = vmatpush3.bf16.msra.mxu0 %v191_v6 }
  0x17   :  { %176 = vmatprep.subr.bf16.mxu0 %v194_v0 }
  0x1a   :  { %177 = vmatpush3.bf16.msra.mxu0 %v192_v7 }
  0x1b   :  { %178 = vmatprep.subr.bf16.mxu0 %v194_v0 }
  0x1e   :  { %179 = vmatpush3.bf16.msra.mxu0 %v193_v8 }
  0x21   :  { %181 = vmatmul.mubr.bf16.vlgmr.msra.gmra.mxu0 %v21_v9 }
  0xe1   :  { %v120_v11 = vpop.f32.mrf.mxu0 }
  0xe2   :  { %v126_v12 = vadd.f32 %v120_v11, %v20_v10 }
  0xe3   :  { %v182_v13 = vpop.f32.mrf.mxu0 }
  0xe4   :  { %127 = vst [vmem:[#allocation2] sm:$0x3] %v126_v12 }
  0xe5   :  { %v123_v14 = vpop.f32.mrf.mxu0 }
  0xe7   :  { %v183_v15 = vpop.f32.mrf.mxu0 }
  0xeb   :  { %v131_v17 = vld [vmem:[#allocation2] sm:$0x3] }
  0xec   :  { %v139_v18 = vadd.f32 %v154_v16, %v131_v17 }
  0xee   :  { %v140_v19 = vmax.f32 %v139_v18, 0.0 }
  0xf0   :  { %141 = vst [vmem:[%s252_s3] sm:$0x3] %v140_v19 }

// kernel: model_forward.17
= control target key start
LH: loop header
LB: loop body
LE: loop exit
PB: predicated region body
PF: predicated region fallthrough
CT: control target
= control target key end

     0   :  { %v227_v1 = vmov 0.0   ;;  %vm228_vm0 = vmmov 0   ;;  %s283_s0 = inlined_call_operand.vmem [shape: bf16[2,128], index: 0, kind: input, shape index: {}]   ;;  %s284_s1 = inlined_call_operand.vmem [shape: bf16[128,128], index: 1, kind: input, shape index: {}]   ;;  %s285_s2 = inlined_call_operand.vmem [shape: f32[1,128], index: 2, kind: input, shape index: {}]   ;;  %s286_s3 = inlined_call_operand.hbm [shape: f32[2,128], index: 3, kind: output, shape index: {}]  }
   0x1   :  { %v197_v0 = vld [vmem:[%s284_s1 + $0x38] sm:$0xff]   ;;  %174 = vmatprep.subr.bf16.mxu0 %v227_v1  ;;  %20 = vst [vmem:[#allocation2] sm:$0x3] %v227_v1  ;;  %v198_v2 = vld [vmem:[%s284_s1 + $0x30] sm:$0xff]   ;;  %190 = vmatprep.mubr.msk.bf16.mxu0 %vm228_vm0, %v227_v1  ;;  %v199_v3 = vld [vmem:[%s284_s1 + $0x28] sm:$0xff]  }
   0x2   :  { %175 = vmatpush3.bf16.msra.mxu0 %v197_v0 }
   0x3   :  { %176 = vmatprep.subr.bf16.mxu0 %v227_v1 }
   0x6   :  { %177 = vmatpush3.bf16.msra.mxu0 %v198_v2 }
   0x7   :  { %178 = vmatprep.subr.bf16.mxu0 %v227_v1 }
   0x8   :  { %8 = vsyncpa [#allocation4], 0  ;;  %v200_v4 = vld [vmem:[%s284_s1 + $0x20] sm:$0xff]   ;;  %v201_v5 = vld [vmem:[%s284_s1 + $0x18] sm:$0xff]   ;;  %s229_s5 = smov [#allocation3]  }
   0x9   :  { %v202_v6 = vld [vmem:[%s284_s1 + $0x10] sm:$0xff]   ;;  %v203_v7 = vld [vmem:[%s284_s1 + $0x8] sm:$0xff]   ;;  %v204_v8 = vld [vmem:[%s284_s1] sm:$0xff]   ;;  %s148_s1 = sshll.u32 %s229_s5, 4  ;;  %s149_s1 = int_to_ptr.vmem [resolvable:$true] %s148_s1 }
   0xa   :  { %179 = vmatpush3.bf16.msra.mxu0 %v199_v3  ;;  %v22_v9 = vld [vmem:[%s283_s0] sm:$0x1]  ;;  %s205_s6 = scalar_lea.vmem %s149_s1, 32  ;;  %p210_p1 = scmp.lt.s32.totalorder %s149_s1, %s149_s1 }
   0xb   :  { %180 = vmatprep.subr.bf16.mxu0 %v227_v1  ;;  %v21_v10 = vld [vmem:[#allocation2] sm:$0x3]  ;;  %p206_p0 = scmp.ne.s32.totalorder %s149_s1, %s205_s6  ;;  %p211_p2 = scmp.lt.s32.totalorder %s205_s6, %s205_s6 }
   0xc   :  { %v164_v16 = vld [vmem:[%s285_s2] ss:$0 sm:$0xff] }
   0xd   :  { %p212_p3 = por %p211_p2, %p210_p1 }
   0xe   :  { %181 = vmatpush3.bf16.msra.mxu0 %v200_v4 }
   0xf   :  { %182 = vmatprep.subr.bf16.mxu0 %v227_v1  ;;  %p213_p4 = pnand %p212_p3, %p206_p0 }
  0x12   :  { %183 = vmatpush3.bf16.msra.mxu0 %v201_v5 }
  0x13   :  { %184 = vmatprep.subr.bf16.mxu0 %v227_v1 }
  0x16   :  { %185 = vmatpush3.bf16.msra.mxu0 %v202_v6 }
  0x17   :  { %186 = vmatprep.subr.bf16.mxu0 %v227_v1 }
  0x1a   :  { %187 = vmatpush3.bf16.msra.mxu0 %v203_v7 }
  0x1b   :  { %188 = vmatprep.subr.bf16.mxu0 %v227_v1 }
  0x1e   :  { %189 = vmatpush3.bf16.msra.mxu0 %v204_v8 }
  0x21   :  { %191 = vmatmul.mubr.bf16.vlgmr.msra.gmra.mxu0 %v22_v9 }
  0xe1   :  { %v121_v11 = vpop.f32.mrf.mxu0 }
  0xe2   :  { %v127_v12 = vadd.f32 %v121_v11, %v21_v10 }
  0xe3   :  { %v192_v13 = vpop.f32.mrf.mxu0 }
  0xe4   :  { %128 = vst [vmem:[#allocation2] sm:$0x3] %v127_v12 }
  0xe5   :  { %v124_v14 = vpop.f32.mrf.mxu0 }
  0xe7   :  { %v193_v15 = vpop.f32.mrf.mxu0 }
  0xeb   :  { %v132_v17 = vld [vmem:[#allocation2] sm:$0x3] }
  0xec   :  { %v140_v18 = vadd.f32 %v164_v16, %v132_v17 }
  0xee   :  { %141 = vst [vmem:[#allocation3] sm:$0x3] %v140_v18 }
  0xef   :  { %216 = shalt.err (!%p213_p4)
}
  0xf0   :  { %151 = dma.vmem_to_hbm [thread:$0]  %s149_s1, 32, %s286_s3, [#allocation4]  }
  0xf1   :  { %225 = dma.done.wait [#allocation4], 32  }
  0xf2   :  { %226 = vsyncadd [#allocation4], 4294967264 }
  0xf3   :  { %155 = vsyncpa [#allocation4], 1 }

</bundles_post_ra>
